<compile_context>
chip_gen: v7x
topology: tpu7x:2x2x1
jax: 0.10.0
libtpu: 0.0.40
codegen_flags: <defaults>
</compile_context>

<pallas_src>
import functools

import jax
import jax.numpy as jnp
import numpy as np
from jax import lax
from jax.experimental import pallas as pl
from jax.experimental.pallas import tpu as pltpu


def _layer_norm(v, w, b, eps=1e-5):
    mu = jnp.mean(v, axis=-1, keepdims=True)
    c = v - mu
    var = jnp.mean(c * c, axis=-1, keepdims=True)
    return c * lax.rsqrt(var + eps) * w + b


def _softmax(s):
    m = jnp.max(s, axis=-1, keepdims=True)
    e = jnp.exp(s - m)
    return e * pl.reciprocal(jnp.sum(e, axis=-1, keepdims=True), approx=True)


def transformer_adapter_kernel(
    aid_ref,                              # scalar prefetch: adapter id (used in index_maps)
    x_ref,                                # (Bb, T, C)  f32
    wqkv_ref, bqkv_ref,                   # (C, 3C) bf16 (q-scale folded), (1, 3C) f32
    wo_ref, bo_ref,                       # (C, C) bf16,  (1, C)  f32
    ln1w_ref, ln1b_ref,                   # (1, C) f32
    w1_ref, b1_ref,                       # (C, F) bf16,  (1, F)  f32
    w2_ref, b2_ref,                       # (F, C) bf16,  (1, C)  f32
    ln2w_ref, ln2b_ref,                   # (1, C) f32
    awa_ref, aba_ref,                     # (1, C, Hp) bf16, (1, 1, Hp) f32  (selected adapter)
    awb_ref, abb_ref,                     # (1, Hp, C) bf16, (1, 1, C)  f32
    alnw_ref, alnb_ref,                   # (1, 1, C) f32
    out_ref,                              # (Bb, T, C) f32
    layer_res_ref,                        # (Bb, T, C) bf16 (or f32)
    attn_scratch,                         # (Bb*T, C) bf16 VMEM: per-head P@V outputs
    *, num_heads):
    f32 = jnp.float32
    bf16 = jnp.bfloat16

    xb = x_ref[...]                       # (Bb, T, C) f32
    Bb, T, C = xb.shape
    Dh = C // num_heads
    x = xb.reshape(Bb * T, C)             # (M, C) f32  -- leading-dim collapse, no relayout

    x_bf = x.astype(bf16)

    # ---- multi-head self attention (no mask; dropouts identity in eval) ----
    # Fused QKV projection: one bf16 MXU matmul with f32 accumulation.  The q scale is
    # already folded into wq/bq, so one bf16 cast over the whole (M, 3C) qkv suffices.
    qkv = jnp.dot(x_bf, wqkv_ref[...], preferred_element_type=f32) + bqkv_ref[...]
    qkv_bf = qkv.astype(bf16)

    # Per (batch row, head): scores / softmax / P@V only.  The head output goes straight
    # into its column slot of the bf16 scratch (heads are contiguous in the last axis),
    # so the out-projection below is one full-depth K=C matmul.
    for b in range(Bb):
        r0 = b * T
        for h in range(num_heads):
            lo = h * Dh
            qh = qkv_bf[r0:r0 + T, lo:lo + Dh]
            kh = qkv_bf[r0:r0 + T, C + lo:C + lo + Dh]
            vh = qkv_bf[r0:r0 + T, 2 * C + lo:2 * C + lo + Dh]
            s = lax.dot_general(qh, kh, (((1,), (1,)), ((), ())),
                                preferred_element_type=f32)          # (T, T) f32
            p = _softmax(s)                                           # f32
            attn_scratch[r0:r0 + T, lo:lo + Dh] = jnp.dot(
                p.astype(bf16), vh, preferred_element_type=f32).astype(bf16)

    attn = jnp.dot(attn_scratch[...], wo_ref[...],
                   preferred_element_type=f32) + bo_ref[...]          # (M, C) f32

    x1 = _layer_norm(x + attn, ln1w_ref[...], ln1b_ref[...])

    # ---- feed-forward (relu) ----
    hid = jnp.maximum(
        jnp.dot(x1.astype(bf16), w1_ref[...], preferred_element_type=f32) + b1_ref[...], 0.0)
    ffn = jnp.dot(hid.astype(bf16), w2_ref[...], preferred_element_type=f32) + b2_ref[...]
    layer_res_ref[...] = ffn.reshape(Bb, T, C).astype(layer_res_ref.dtype)   # layer_result
    x2 = _layer_norm(x1 + ffn, ln2w_ref[...], ln2b_ref[...])

    # ---- adapter (params selected by adapter id through scalar-prefetch index_map) ----
    ha = _layer_norm(x2, alnw_ref[0], alnb_ref[0])
    ha = jnp.maximum(
        jnp.dot(ha.astype(bf16), awa_ref[0], preferred_element_type=f32) + aba_ref[0], 0.0)
    ya = jnp.dot(ha.astype(bf16), awb_ref[0], preferred_element_type=f32) + abb_ref[0]

    out_ref[...] = (x2 + ya).reshape(Bb, T, C)


def pack_params(params, num_heads):
    """One-time weight prep (call at parameter-load time, NOT per forward).

    Concatenates QKV, folds the 1/sqrt(Dh) query scale into wq/bq, casts MXU operands
    to bf16, and zero-pads the adapter hidden dim to a lane multiple (exact).
    """
    bf16 = jnp.bfloat16
    f32 = jnp.float32
    C = params["wq"].shape[0]
    Dh = C // num_heads
    scale = Dh ** -0.5

    wqkv = jnp.concatenate(
        [params["wq"] * scale, params["wk"], params["wv"]], axis=1).astype(bf16)
    bqkv = jnp.concatenate(
        [params["bq"] * scale, params["bk"], params["bv"]], axis=1).astype(f32)

    a_wa, a_ba, a_wb = params["a_wa"], params["a_ba"], params["a_wb"]
    hd = a_wa.shape[2]
    hd_pad = ((hd + 127) // 128) * 128
    if hd_pad != hd:
        pad = hd_pad - hd
        a_wa = jnp.pad(a_wa, ((0, 0), (0, 0), (0, pad)))
        a_ba = jnp.pad(a_ba, ((0, 0), (0, 0), (0, pad)))
        a_wb = jnp.pad(a_wb, ((0, 0), (0, pad), (0, 0)))

    return dict(
        wqkv=wqkv, bqkv=bqkv,
        wo=params["wo"].astype(bf16), bo=params["bo"].astype(f32),
        ln1w=params["ln1w"].astype(f32), ln1b=params["ln1b"].astype(f32),
        w1=params["w1"].astype(bf16), b1=params["b1"].astype(f32),
        w2=params["w2"].astype(bf16), b2=params["b2"].astype(f32),
        ln2w=params["ln2w"].astype(f32), ln2b=params["ln2b"].astype(f32),
        a_wa=a_wa.astype(bf16), a_ba=a_ba.astype(f32),
        a_wb=a_wb.astype(bf16), a_bb=params["a_bb"].astype(f32),
        a_lnw=params["a_lnw"].astype(f32), a_lnb=params["a_lnb"].astype(f32),
    )


def _pick_batch_block(B, T, max_rows=512, max_block=8):
    """Fold Bb batch rows into the matmul M dim, keeping >=2 grid steps when possible
    (so the "parallel" axis can feed both v7x TensorCores) and bounding block size."""
    best = 1
    for bb in range(1, min(B, max_block) + 1):
        if B % bb:
            continue
        if bb * T > max(T, max_rows):
            continue
        if B >= 2 and B // bb < 2:
            continue
        best = bb
    return best


def _vmem_limit_bytes():
    try:
        cap = pltpu.get_tpu_info().vmem_capacity_bytes
    except Exception:
        cap = 128 * 1024 * 1024
    return int(min(cap // 2, 64 * 1024 * 1024))


def transformer_adapter_forward(x_tbc, packed, corpus_key, num_heads,
                                layer_result_dtype=jnp.bfloat16):
    """Mirrors TransformerSentenceEncoderWithAdapterLayer.forward (layer_norm_first=False).

    x_tbc: (T, B, C) as in fairseq.  `packed` comes from pack_params().  Returns
    (x, (attn, layer_result)) with attn=None (need_weights=False in the reference module).
    """
    assert corpus_key is not None
    assert len(set(corpus_key)) == 1, f"corpus_key items are not same {corpus_key}"
    adapter_id = int(corpus_key[0])

    x_btc = jnp.transpose(x_tbc, (1, 0, 2)).astype(jnp.float32)
    B, T, C = x_btc.shape
    assert C % num_heads == 0, "embedding_dim must be divisible by num_attention_heads"
    F_dim = packed["w1"].shape[1]
    aid = jnp.array([adapter_id], dtype=jnp.int32)

    Bb = _pick_batch_block(B, T)
    grid = (B // Bb,)

    def build_specs(single_buffer):
        # Constant weights: their block index never changes across the batch grid, so the
        # default double buffer is pure VMEM waste -> request a single buffer.
        wkw = dict(pipeline_mode=pl.Buffered(1)) if single_buffer else {}

        def fixed(shape):
            nd = len(shape)
            return pl.BlockSpec(shape, lambda b, a, _nd=nd: (0,) * _nd, **wkw)

        def per_adapter(shape):
            nd = len(shape) - 1
            return pl.BlockSpec((1,) + tuple(shape[1:]),
                                lambda b, a, _nd=nd: (a[0],) + (0,) * _nd, **wkw)

        x_spec = pl.BlockSpec((Bb, T, C), lambda b, a: (b, 0, 0))

        in_specs = [
            x_spec,
            fixed((C, 3 * C)), fixed((1, 3 * C)),                        # qkv proj
            fixed((C, C)), fixed((1, C)),                                # out proj
            fixed((1, C)), fixed((1, C)),                                # ln1
            fixed((C, F_dim)), fixed((1, F_dim)),                        # fc1
            fixed((F_dim, C)), fixed((1, C)),                            # fc2
            fixed((1, C)), fixed((1, C)),                                # ln2
            per_adapter(packed["a_wa"].shape), per_adapter(packed["a_ba"].shape),
            per_adapter(packed["a_wb"].shape), per_adapter(packed["a_bb"].shape),
            per_adapter(packed["a_lnw"].shape), per_adapter(packed["a_lnb"].shape),
        ]
        out_specs = [x_spec, x_spec]
        return in_specs, out_specs

    kernel = functools.partial(transformer_adapter_kernel, num_heads=num_heads)

    def run(single_buffer):
        in_specs, out_specs = build_specs(single_buffer)
        return pl.pallas_call(
            kernel,
            out_shape=(jax.ShapeDtypeStruct((B, T, C), jnp.float32),
                       jax.ShapeDtypeStruct((B, T, C), layer_result_dtype)),
            grid_spec=pltpu.PrefetchScalarGridSpec(
                num_scalar_prefetch=1,
                grid=grid,
                in_specs=in_specs,
                out_specs=out_specs,
                scratch_shapes=[pltpu.VMEM((Bb * T, C), jnp.bfloat16)],
            ),
            compiler_params=pltpu.CompilerParams(
                dimension_semantics=("parallel",),        # batch blocks are independent
                vmem_limit_bytes=_vmem_limit_bytes(),
            ),
        )(
            aid, x_btc,
            packed["wqkv"], packed["bqkv"], packed["wo"], packed["bo"],
            packed["ln1w"], packed["ln1b"],
            packed["w1"], packed["b1"], packed["w2"], packed["b2"],
            packed["ln2w"], packed["ln2b"],
            packed["a_wa"], packed["a_ba"], packed["a_wb"], packed["a_bb"],
            packed["a_lnw"], packed["a_lnb"],
        )

    try:
        out, layer_res = run(single_buffer=True)
    except Exception:
        # pipeline_mode=pl.Buffered(1) not supported on this JAX version -> default buffering.
        out, layer_res = run(single_buffer=False)

    x_out = jnp.transpose(out, (1, 0, 2))
    layer_result = jnp.transpose(layer_res, (1, 0, 2))
    return x_out, (None, layer_result)


def reference(x_tbc, params, adapter_id, num_heads):
    """Pure-JAX f32 reference for correctness checking."""
    def ln(v, w, b, eps=1e-5):
        mu = jnp.mean(v, axis=-1, keepdims=True)
        var = jnp.mean((v - mu) ** 2, axis=-1, keepdims=True)
        return (v - mu) / jnp.sqrt(var + eps) * w + b

    x = jnp.transpose(x_tbc, (1, 0, 2))
    B, T, C = x.shape
    Dh = C // num_heads
    q = (x @ params["wq"] + params["bq"]) * Dh ** -0.5
    k = x @ params["wk"] + params["bk"]
    v = x @ params["wv"] + params["bv"]
    qh = q.reshape(B, T, num_heads, Dh).transpose(0, 2, 1, 3)
    kh = k.reshape(B, T, num_heads, Dh).transpose(0, 2, 1, 3)
    vh = v.reshape(B, T, num_heads, Dh).transpose(0, 2, 1, 3)
    p = jax.nn.softmax(qh @ kh.transpose(0, 1, 3, 2), axis=-1)
    o = (p @ vh).transpose(0, 2, 1, 3).reshape(B, T, C)
    attn = o @ params["wo"] + params["bo"]
    x1 = ln(x + attn, params["ln1w"], params["ln1b"])
    ffn = jnp.maximum(x1 @ params["w1"] + params["b1"], 0.0) @ params["w2"] + params["b2"]
    x2 = ln(x1 + ffn, params["ln2w"], params["ln2b"])
    ha = ln(x2, params["a_lnw"][adapter_id], params["a_lnb"][adapter_id])
    ha = jnp.maximum(ha @ params["a_wa"][adapter_id] + params["a_ba"][adapter_id], 0.0)
    y = ha @ params["a_wb"][adapter_id] + params["a_bb"][adapter_id]
    out = x2 + y
    return jnp.transpose(out, (1, 0, 2)), jnp.transpose(ffn, (1, 0, 2))


if __name__ == "__main__":
    # Small shapes consistent with the module's forward semantics.
    B, T, C = 2, 16, 128          # batch, seq_len, embedding_dim
    H = 4                         # num_attention_heads
    FFN = 256                     # ffn_embedding_dim
    A_NUM, A_HID = 3, 64          # adapter_num, adapter_dim

    key = jax.random.PRNGKey(0)
    ks = jax.random.split(key, 20)

    def w(k, shape, scale=0.05):
        return jax.random.normal(k, shape, jnp.float32) * scale

    # Deterministic synthetic parameters (shapes follow the PyTorch __init__;
    # linear weights pre-transposed to (in, out); adapter W_a/W_b pre-transposed too).
    params = dict(
        wq=w(ks[0], (C, C)), bq=w(ks[1], (1, C)),
        wk=w(ks[2], (C, C)), bk=w(ks[3], (1, C)),
        wv=w(ks[4], (C, C)), bv=w(ks[5], (1, C)),
        wo=w(ks[6], (C, C)), bo=w(ks[7], (1, C)),
        ln1w=jnp.ones((1, C), jnp.float32), ln1b=jnp.zeros((1, C), jnp.float32),
        w1=w(ks[8], (C, FFN)), b1=w(ks[9], (1, FFN)),
        w2=w(ks[10], (FFN, C)), b2=w(ks[11], (1, C)),
        ln2w=jnp.ones((1, C), jnp.float32), ln2b=jnp.zeros((1, C), jnp.float32),
        a_wa=w(ks[12], (A_NUM, C, A_HID)),       # W_a^T per adapter
        a_ba=w(ks[13], (A_NUM, 1, A_HID)),
        a_wb=w(ks[14], (A_NUM, A_HID, C)),       # W_b^T per adapter
        a_bb=w(ks[15], (A_NUM, 1, C)),
        a_lnw=jnp.ones((A_NUM, 1, C), jnp.float32),
        a_lnb=jnp.zeros((A_NUM, 1, C), jnp.float32),
    )

    x_tbc = jax.random.normal(ks[16], (T, B, C), jnp.float32)   # fairseq (T, B, C)
    corpus_key = [2, 2]

    packed = pack_params(params, H)   # one-time weight prep (hoisted out of forward)
    out, (attn, layer_result) = transformer_adapter_forward(x_tbc, packed, corpus_key, H)
    jax.block_until_ready(out)
    jax.block_until_ready(layer_result)

    ref_out, ref_lr = reference(x_tbc, params, int(corpus_key[0]), H)
    np.testing.assert_allclose(np.asarray(out), np.asarray(ref_out), atol=3e-2, rtol=3e-2)
    np.testing.assert_allclose(np.asarray(layer_result).astype(np.float32),
                               np.asarray(ref_lr), atol=3e-2, rtol=3e-2)
    assert np.all(np.isfinite(np.asarray(out)))

    print("KERNEL_OK")
</pallas_src>

<mosaic_0001>
module attributes {stable_mosaic.version = 11 : i64} {
  func.func @transformer_adapter_kernel(%arg0: i32, %arg1: memref<1xi32, #tpu.memory_space<smem>>, %arg2: memref<1x16x128xf32, #tpu.memory_space<vmem>>, %arg3: memref<128x384xbf16, #tpu.memory_space<vmem>>, %arg4: memref<1x384xf32, #tpu.memory_space<vmem>>, %arg5: memref<128x128xbf16, #tpu.memory_space<vmem>>, %arg6: memref<1x128xf32, #tpu.memory_space<vmem>>, %arg7: memref<1x128xf32, #tpu.memory_space<vmem>>, %arg8: memref<1x128xf32, #tpu.memory_space<vmem>>, %arg9: memref<128x256xbf16, #tpu.memory_space<vmem>>, %arg10: memref<1x256xf32, #tpu.memory_space<vmem>>, %arg11: memref<256x128xbf16, #tpu.memory_space<vmem>>, %arg12: memref<1x128xf32, #tpu.memory_space<vmem>>, %arg13: memref<1x128xf32, #tpu.memory_space<vmem>>, %arg14: memref<1x128xf32, #tpu.memory_space<vmem>>, %arg15: memref<1x128x128xbf16, #tpu.memory_space<vmem>>, %arg16: memref<1x1x128xf32, #tpu.memory_space<vmem>>, %arg17: memref<1x128x128xbf16, #tpu.memory_space<vmem>>, %arg18: memref<1x1x128xf32, #tpu.memory_space<vmem>>, %arg19: memref<1x1x128xf32, #tpu.memory_space<vmem>>, %arg20: memref<1x1x128xf32, #tpu.memory_space<vmem>>, %arg21: memref<1x16x128xf32, #tpu.memory_space<vmem>>, %arg22: memref<1x16x128xbf16, #tpu.memory_space<vmem>>, %arg23: memref<16x128xbf16, #tpu.memory_space<vmem>>) attributes {dimension_semantics = [#tpu.dimension_semantics<parallel>], iteration_bounds = array<i64: 2>, scalar_prefetch = 1 : i64, scratch_operands = 1 : i64, tpu.core_type = #tpu.core_type<tc>, window_params = [{transform_indices = @transform_0, window_bounds = array<i64: 1, 16, 128>}, {pipeline_mode = #tpu.pipeline_mode<synchronous>, transform_indices = @transform_1, window_bounds = array<i64: 128, 384>}, {pipeline_mode = #tpu.pipeline_mode<synchronous>, transform_indices = @transform_2, window_bounds = array<i64: 1, 384>}, {pipeline_mode = #tpu.pipeline_mode<synchronous>, transform_indices = @transform_3, window_bounds = array<i64: 128, 128>}, {pipeline_mode = #tpu.pipeline_mode<synchronous>, transform_indices = @transform_4, window_bounds = array<i64: 1, 128>}, {pipeline_mode = #tpu.pipeline_mode<synchronous>, transform_indices = @transform_5, window_bounds = array<i64: 1, 128>}, {pipeline_mode = #tpu.pipeline_mode<synchronous>, transform_indices = @transform_6, window_bounds = array<i64: 1, 128>}, {pipeline_mode = #tpu.pipeline_mode<synchronous>, transform_indices = @transform_7, window_bounds = array<i64: 128, 256>}, {pipeline_mode = #tpu.pipeline_mode<synchronous>, transform_indices = @transform_8, window_bounds = array<i64: 1, 256>}, {pipeline_mode = #tpu.pipeline_mode<synchronous>, transform_indices = @transform_9, window_bounds = array<i64: 256, 128>}, {pipeline_mode = #tpu.pipeline_mode<synchronous>, transform_indices = @transform_10, window_bounds = array<i64: 1, 128>}, {pipeline_mode = #tpu.pipeline_mode<synchronous>, transform_indices = @transform_11, window_bounds = array<i64: 1, 128>}, {pipeline_mode = #tpu.pipeline_mode<synchronous>, transform_indices = @transform_12, window_bounds = array<i64: 1, 128>}, {pipeline_mode = #tpu.pipeline_mode<synchronous>, transform_indices = @transform_13, window_bounds = array<i64: 1, 128, 128>}, {pipeline_mode = #tpu.pipeline_mode<synchronous>, transform_indices = @transform_14, window_bounds = array<i64: 1, 1, 128>}, {pipeline_mode = #tpu.pipeline_mode<synchronous>, transform_indices = @transform_15, window_bounds = array<i64: 1, 128, 128>}, {pipeline_mode = #tpu.pipeline_mode<synchronous>, transform_indices = @transform_16, window_bounds = array<i64: 1, 1, 128>}, {pipeline_mode = #tpu.pipeline_mode<synchronous>, transform_indices = @transform_17, window_bounds = array<i64: 1, 1, 128>}, {pipeline_mode = #tpu.pipeline_mode<synchronous>, transform_indices = @transform_18, window_bounds = array<i64: 1, 1, 128>}, {transform_indices = @transform_19, window_bounds = array<i64: 1, 16, 128>}, {transform_indices = @transform_20, window_bounds = array<i64: 1, 16, 128>}]} {
    %c0 = arith.constant 0 : index
    %c0_0 = arith.constant 0 : index
    %c0_1 = arith.constant 0 : index
    %0 = vector.load %arg2[%c0, %c0_0, %c0_1] : memref<1x16x128xf32, #tpu.memory_space<vmem>>, vector<1x16x128xf32>
    %1 = vector.shape_cast %0 : vector<1x16x128xf32> to vector<16x128xf32>
    %2 = arith.truncf %1 : vector<16x128xf32> to vector<16x128xbf16>
    %c0_2 = arith.constant 0 : index
    %c0_3 = arith.constant 0 : index
    %3 = vector.load %arg3[%c0_2, %c0_3] : memref<128x384xbf16, #tpu.memory_space<vmem>>, vector<128x384xbf16>
    %cst = arith.constant dense<0.000000e+00> : vector<16x384xf32>
    %4 = tpu.matmul %2, %3, %cst {dimension_numbers = #tpu.dot_dimension_numbers<[1], [0], [0], [1], [0, 0, 1, 1], [], []>} : vector<16x128xbf16>, vector<128x384xbf16>, vector<16x384xf32> -> vector<16x384xf32>
    %c0_4 = arith.constant 0 : index
    %c0_5 = arith.constant 0 : index
    %5 = vector.load %arg4[%c0_4, %c0_5] : memref<1x384xf32, #tpu.memory_space<vmem>>, vector<1x384xf32>
    %6 = vector.broadcast %5 : vector<1x384xf32> to vector<16x384xf32>
    %7 = arith.addf %4, %6 : vector<16x384xf32>
    %8 = arith.truncf %7 : vector<16x384xf32> to vector<16x384xbf16>
    %9 = vector.extract_strided_slice %8 {offsets = [0, 0], sizes = [16, 32], strides = [1, 1]} : vector<16x384xbf16> to vector<16x32xbf16>
    %10 = vector.extract_strided_slice %8 {offsets = [0, 128], sizes = [16, 32], strides = [1, 1]} : vector<16x384xbf16> to vector<16x32xbf16>
    %11 = vector.extract_strided_slice %8 {offsets = [0, 256], sizes = [16, 32], strides = [1, 1]} : vector<16x384xbf16> to vector<16x32xbf16>
    %cst_6 = arith.constant dense<0.000000e+00> : vector<16x16xf32>
    %12 = tpu.matmul %9, %10, %cst_6 {dimension_numbers = #tpu.dot_dimension_numbers<[1], [1], [0], [0], [0, 0, 1, 0], [], []>} : vector<16x32xbf16>, vector<16x32xbf16>, vector<16x16xf32> -> vector<16x16xf32>
    %cst_7 = arith.constant dense<0xFF800000> : vector<16xf32>
    %13 = vector.multi_reduction <maximumf>, %12, %cst_7 [1] : vector<16x16xf32> to vector<16xf32>
    %14 = vector.shape_cast %13 : vector<16xf32> to vector<16x1xf32>
    %15 = vector.broadcast %14 : vector<16x1xf32> to vector<16x16xf32>
    %16 = arith.subf %12, %15 : vector<16x16xf32>
    %17 = math.exp %16 : vector<16x16xf32>
    %cst_8 = arith.constant dense<0.000000e+00> : vector<16xf32>
    %18 = vector.multi_reduction <add>, %17, %cst_8 [1] : vector<16x16xf32> to vector<16xf32>
    %19 = vector.shape_cast %18 : vector<16xf32> to vector<16x1xf32>
    %20 = tpu.reciprocal %19 {approx = true} : vector<16x1xf32> -> vector<16x1xf32>
    %21 = vector.broadcast %20 : vector<16x1xf32> to vector<16x16xf32>
    %22 = arith.mulf %17, %21 : vector<16x16xf32>
    %23 = arith.truncf %22 : vector<16x16xf32> to vector<16x16xbf16>
    %cst_9 = arith.constant dense<0.000000e+00> : vector<16x32xf32>
    %24 = tpu.matmul %23, %11, %cst_9 {dimension_numbers = #tpu.dot_dimension_numbers<[1], [0], [0], [1], [0, 0, 1, 1], [], []>} : vector<16x16xbf16>, vector<16x32xbf16>, vector<16x32xf32> -> vector<16x32xf32>
    %25 = arith.truncf %24 : vector<16x32xf32> to vector<16x32xbf16>
    %c0_10 = arith.constant 0 : index
    %c0_11 = arith.constant 0 : index
    %26 = vector.load %arg23[%c0_10, %c0_11] : memref<16x128xbf16, #tpu.memory_space<vmem>>, vector<16x32xbf16>
    tpu.vector_store %arg23[%c0_10, %c0_11], %25 {strides = array<i32>} : memref<16x128xbf16, #tpu.memory_space<vmem>>, vector<16x32xbf16>,
    %27 = vector.extract_strided_slice %8 {offsets = [0, 32], sizes = [16, 32], strides = [1, 1]} : vector<16x384xbf16> to vector<16x32xbf16>
    %28 = vector.extract_strided_slice %8 {offsets = [0, 160], sizes = [16, 32], strides = [1, 1]} : vector<16x384xbf16> to vector<16x32xbf16>
    %29 = vector.extract_strided_slice %8 {offsets = [0, 288], sizes = [16, 32], strides = [1, 1]} : vector<16x384xbf16> to vector<16x32xbf16>
    %cst_12 = arith.constant dense<0.000000e+00> : vector<16x16xf32>
    %30 = tpu.matmul %27, %28, %cst_12 {dimension_numbers = #tpu.dot_dimension_numbers<[1], [1], [0], [0], [0, 0, 1, 0], [], []>} : vector<16x32xbf16>, vector<16x32xbf16>, vector<16x16xf32> -> vector<16x16xf32>
    %cst_13 = arith.constant dense<0xFF800000> : vector<16xf32>
    %31 = vector.multi_reduction <maximumf>, %30, %cst_13 [1] : vector<16x16xf32> to vector<16xf32>
    %32 = vector.shape_cast %31 : vector<16xf32> to vector<16x1xf32>
    %33 = vector.broadcast %32 : vector<16x1xf32> to vector<16x16xf32>
    %34 = arith.subf %30, %33 : vector<16x16xf32>
    %35 = math.exp %34 : vector<16x16xf32>
    %cst_14 = arith.constant dense<0.000000e+00> : vector<16xf32>
    %36 = vector.multi_reduction <add>, %35, %cst_14 [1] : vector<16x16xf32> to vector<16xf32>
    %37 = vector.shape_cast %36 : vector<16xf32> to vector<16x1xf32>
    %38 = tpu.reciprocal %37 {approx = true} : vector<16x1xf32> -> vector<16x1xf32>
    %39 = vector.broadcast %38 : vector<16x1xf32> to vector<16x16xf32>
    %40 = arith.mulf %35, %39 : vector<16x16xf32>
    %41 = arith.truncf %40 : vector<16x16xf32> to vector<16x16xbf16>
    %cst_15 = arith.constant dense<0.000000e+00> : vector<16x32xf32>
    %42 = tpu.matmul %41, %29, %cst_15 {dimension_numbers = #tpu.dot_dimension_numbers<[1], [0], [0], [1], [0, 0, 1, 1], [], []>} : vector<16x16xbf16>, vector<16x32xbf16>, vector<16x32xf32> -> vector<16x32xf32>
    %43 = arith.truncf %42 : vector<16x32xf32> to vector<16x32xbf16>
    %c0_16 = arith.constant 0 : index
    %c32 = arith.constant 32 : index
    %44 = vector.load %arg23[%c0_16, %c32] : memref<16x128xbf16, #tpu.memory_space<vmem>>, vector<16x32xbf16>
    tpu.vector_store %arg23[%c0_16, %c32], %43 {strides = array<i32>} : memref<16x128xbf16, #tpu.memory_space<vmem>>, vector<16x32xbf16>,
    %45 = vector.extract_strided_slice %8 {offsets = [0, 64], sizes = [16, 32], strides = [1, 1]} : vector<16x384xbf16> to vector<16x32xbf16>
    %46 = vector.extract_strided_slice %8 {offsets = [0, 192], sizes = [16, 32], strides = [1, 1]} : vector<16x384xbf16> to vector<16x32xbf16>
    %47 = vector.extract_strided_slice %8 {offsets = [0, 320], sizes = [16, 32], strides = [1, 1]} : vector<16x384xbf16> to vector<16x32xbf16>
    %cst_17 = arith.constant dense<0.000000e+00> : vector<16x16xf32>
    %48 = tpu.matmul %45, %46, %cst_17 {dimension_numbers = #tpu.dot_dimension_numbers<[1], [1], [0], [0], [0, 0, 1, 0], [], []>} : vector<16x32xbf16>, vector<16x32xbf16>, vector<16x16xf32> -> vector<16x16xf32>
    %cst_18 = arith.constant dense<0xFF800000> : vector<16xf32>
    %49 = vector.multi_reduction <maximumf>, %48, %cst_18 [1] : vector<16x16xf32> to vector<16xf32>
    %50 = vector.shape_cast %49 : vector<16xf32> to vector<16x1xf32>
    %51 = vector.broadcast %50 : vector<16x1xf32> to vector<16x16xf32>
    %52 = arith.subf %48, %51 : vector<16x16xf32>
    %53 = math.exp %52 : vector<16x16xf32>
    %cst_19 = arith.constant dense<0.000000e+00> : vector<16xf32>
    %54 = vector.multi_reduction <add>, %53, %cst_19 [1] : vector<16x16xf32> to vector<16xf32>
    %55 = vector.shape_cast %54 : vector<16xf32> to vector<16x1xf32>
    %56 = tpu.reciprocal %55 {approx = true} : vector<16x1xf32> -> vector<16x1xf32>
    %57 = vector.broadcast %56 : vector<16x1xf32> to vector<16x16xf32>
    %58 = arith.mulf %53, %57 : vector<16x16xf32>
    %59 = arith.truncf %58 : vector<16x16xf32> to vector<16x16xbf16>
    %cst_20 = arith.constant dense<0.000000e+00> : vector<16x32xf32>
    %60 = tpu.matmul %59, %47, %cst_20 {dimension_numbers = #tpu.dot_dimension_numbers<[1], [0], [0], [1], [0, 0, 1, 1], [], []>} : vector<16x16xbf16>, vector<16x32xbf16>, vector<16x32xf32> -> vector<16x32xf32>
    %61 = arith.truncf %60 : vector<16x32xf32> to vector<16x32xbf16>
    %c0_21 = arith.constant 0 : index
    %c64 = arith.constant 64 : index
    %62 = vector.load %arg23[%c0_21, %c64] : memref<16x128xbf16, #tpu.memory_space<vmem>>, vector<16x32xbf16>
    tpu.vector_store %arg23[%c0_21, %c64], %61 {strides = array<i32>} : memref<16x128xbf16, #tpu.memory_space<vmem>>, vector<16x32xbf16>,
    %63 = vector.extract_strided_slice %8 {offsets = [0, 96], sizes = [16, 32], strides = [1, 1]} : vector<16x384xbf16> to vector<16x32xbf16>
    %64 = vector.extract_strided_slice %8 {offsets = [0, 224], sizes = [16, 32], strides = [1, 1]} : vector<16x384xbf16> to vector<16x32xbf16>
    %65 = vector.extract_strided_slice %8 {offsets = [0, 352], sizes = [16, 32], strides = [1, 1]} : vector<16x384xbf16> to vector<16x32xbf16>
    %cst_22 = arith.constant dense<0.000000e+00> : vector<16x16xf32>
    %66 = tpu.matmul %63, %64, %cst_22 {dimension_numbers = #tpu.dot_dimension_numbers<[1], [1], [0], [0], [0, 0, 1, 0], [], []>} : vector<16x32xbf16>, vector<16x32xbf16>, vector<16x16xf32> -> vector<16x16xf32>
    %cst_23 = arith.constant dense<0xFF800000> : vector<16xf32>
    %67 = vector.multi_reduction <maximumf>, %66, %cst_23 [1] : vector<16x16xf32> to vector<16xf32>
    %68 = vector.shape_cast %67 : vector<16xf32> to vector<16x1xf32>
    %69 = vector.broadcast %68 : vector<16x1xf32> to vector<16x16xf32>
    %70 = arith.subf %66, %69 : vector<16x16xf32>
    %71 = math.exp %70 : vector<16x16xf32>
    %cst_24 = arith.constant dense<0.000000e+00> : vector<16xf32>
    %72 = vector.multi_reduction <add>, %71, %cst_24 [1] : vector<16x16xf32> to vector<16xf32>
    %73 = vector.shape_cast %72 : vector<16xf32> to vector<16x1xf32>
    %74 = tpu.reciprocal %73 {approx = true} : vector<16x1xf32> -> vector<16x1xf32>
    %75 = vector.broadcast %74 : vector<16x1xf32> to vector<16x16xf32>
    %76 = arith.mulf %71, %75 : vector<16x16xf32>
    %77 = arith.truncf %76 : vector<16x16xf32> to vector<16x16xbf16>
    %cst_25 = arith.constant dense<0.000000e+00> : vector<16x32xf32>
    %78 = tpu.matmul %77, %65, %cst_25 {dimension_numbers = #tpu.dot_dimension_numbers<[1], [0], [0], [1], [0, 0, 1, 1], [], []>} : vector<16x16xbf16>, vector<16x32xbf16>, vector<16x32xf32> -> vector<16x32xf32>
    %79 = arith.truncf %78 : vector<16x32xf32> to vector<16x32xbf16>
    %c0_26 = arith.constant 0 : index
    %c96 = arith.constant 96 : index
    %80 = vector.load %arg23[%c0_26, %c96] : memref<16x128xbf16, #tpu.memory_space<vmem>>, vector<16x32xbf16>
    tpu.vector_store %arg23[%c0_26, %c96], %79 {strides = array<i32>} : memref<16x128xbf16, #tpu.memory_space<vmem>>, vector<16x32xbf16>,
    %c0_27 = arith.constant 0 : index
    %c0_28 = arith.constant 0 : index
    %81 = vector.load %arg23[%c0_27, %c0_28] : memref<16x128xbf16, #tpu.memory_space<vmem>>, vector<16x128xbf16>
    %c0_29 = arith.constant 0 : index
    %c0_30 = arith.constant 0 : index
    %82 = vector.load %arg5[%c0_29, %c0_30] : memref<128x128xbf16, #tpu.memory_space<vmem>>, vector<128x128xbf16>
    %cst_31 = arith.constant dense<0.000000e+00> : vector<16x128xf32>
    %83 = tpu.matmul %81, %82, %cst_31 {dimension_numbers = #tpu.dot_dimension_numbers<[1], [0], [0], [1], [0, 0, 1, 1], [], []>} : vector<16x128xbf16>, vector<128x128xbf16>, vector<16x128xf32> -> vector<16x128xf32>
    %c0_32 = arith.constant 0 : index
    %c0_33 = arith.constant 0 : index
    %84 = vector.load %arg6[%c0_32, %c0_33] : memref<1x128xf32, #tpu.memory_space<vmem>>, vector<1x128xf32>
    %85 = vector.broadcast %84 : vector<1x128xf32> to vector<16x128xf32>
    %86 = arith.addf %83, %85 : vector<16x128xf32>
    %87 = arith.addf %1, %86 : vector<16x128xf32>
    %c0_34 = arith.constant 0 : index
    %c0_35 = arith.constant 0 : index
    %88 = vector.load %arg7[%c0_34, %c0_35] : memref<1x128xf32, #tpu.memory_space<vmem>>, vector<1x128xf32>
    %c0_36 = arith.constant 0 : index
    %c0_37 = arith.constant 0 : index
    %89 = vector.load %arg8[%c0_36, %c0_37] : memref<1x128xf32, #tpu.memory_space<vmem>>, vector<1x128xf32>
    %cst_38 = arith.constant dense<0.000000e+00> : vector<16xf32>
    %90 = vector.multi_reduction <add>, %87, %cst_38 [1] : vector<16x128xf32> to vector<16xf32>
    %91 = vector.shape_cast %90 : vector<16xf32> to vector<16x1xf32>
    %cst_39 = arith.constant 1.280000e+02 : f32
    %92 = vector.broadcast %cst_39 : f32 to vector<16x1xf32>
    %93 = arith.divf %91, %92 : vector<16x1xf32>
    %94 = vector.broadcast %93 : vector<16x1xf32> to vector<16x128xf32>
    %95 = arith.subf %87, %94 : vector<16x128xf32>
    %96 = arith.mulf %95, %95 : vector<16x128xf32>
    %cst_40 = arith.constant dense<0.000000e+00> : vector<16xf32>
    %97 = vector.multi_reduction <add>, %96, %cst_40 [1] : vector<16x128xf32> to vector<16xf32>
    %98 = vector.shape_cast %97 : vector<16xf32> to vector<16x1xf32>
    %cst_41 = arith.constant 1.280000e+02 : f32
    %99 = vector.broadcast %cst_41 : f32 to vector<16x1xf32>
    %100 = arith.divf %98, %99 : vector<16x1xf32>
    %cst_42 = arith.constant 9.99999974E-6 : f32
    %101 = vector.broadcast %cst_42 : f32 to vector<16x1xf32>
    %102 = arith.addf %100, %101 : vector<16x1xf32>
    %103 = math.rsqrt %102 : vector<16x1xf32>
    %104 = vector.broadcast %103 : vector<16x1xf32> to vector<16x128xf32>
    %105 = arith.mulf %95, %104 : vector<16x128xf32>
    %106 = vector.broadcast %88 : vector<1x128xf32> to vector<16x128xf32>
    %107 = arith.mulf %105, %106 : vector<16x128xf32>
    %108 = vector.broadcast %89 : vector<1x128xf32> to vector<16x128xf32>
    %109 = arith.addf %107, %108 : vector<16x128xf32>
    %110 = arith.truncf %109 : vector<16x128xf32> to vector<16x128xbf16>
    %c0_43 = arith.constant 0 : index
    %c0_44 = arith.constant 0 : index
    %111 = vector.load %arg9[%c0_43, %c0_44] : memref<128x256xbf16, #tpu.memory_space<vmem>>, vector<128x256xbf16>
    %cst_45 = arith.constant dense<0.000000e+00> : vector<16x256xf32>
    %112 = tpu.matmul %110, %111, %cst_45 {dimension_numbers = #tpu.dot_dimension_numbers<[1], [0], [0], [1], [0, 0, 1, 1], [], []>} : vector<16x128xbf16>, vector<128x256xbf16>, vector<16x256xf32> -> vector<16x256xf32>
    %c0_46 = arith.constant 0 : index
    %c0_47 = arith.constant 0 : index
    %113 = vector.load %arg10[%c0_46, %c0_47] : memref<1x256xf32, #tpu.memory_space<vmem>>, vector<1x256xf32>
    %114 = vector.broadcast %113 : vector<1x256xf32> to vector<16x256xf32>
    %115 = arith.addf %112, %114 : vector<16x256xf32>
    %cst_48 = arith.constant 0.000000e+00 : f32
    %116 = vector.broadcast %cst_48 : f32 to vector<16x256xf32>
    %117 = arith.maximumf %115, %116 : vector<16x256xf32>
    %118 = arith.truncf %117 : vector<16x256xf32> to vector<16x256xbf16>
    %c0_49 = arith.constant 0 : index
    %c0_50 = arith.constant 0 : index
    %119 = vector.load %arg11[%c0_49, %c0_50] : memref<256x128xbf16, #tpu.memory_space<vmem>>, vector<256x128xbf16>
    %cst_51 = arith.constant dense<0.000000e+00> : vector<16x128xf32>
    %120 = tpu.matmul %118, %119, %cst_51 {dimension_numbers = #tpu.dot_dimension_numbers<[1], [0], [0], [1], [0, 0, 1, 1], [], []>} : vector<16x256xbf16>, vector<256x128xbf16>, vector<16x128xf32> -> vector<16x128xf32>
    %c0_52 = arith.constant 0 : index
    %c0_53 = arith.constant 0 : index
    %121 = vector.load %arg12[%c0_52, %c0_53] : memref<1x128xf32, #tpu.memory_space<vmem>>, vector<1x128xf32>
    %122 = vector.broadcast %121 : vector<1x128xf32> to vector<16x128xf32>
    %123 = arith.addf %120, %122 : vector<16x128xf32>
    %124 = vector.shape_cast %123 : vector<16x128xf32> to vector<1x16x128xf32>
    %125 = arith.truncf %124 : vector<1x16x128xf32> to vector<1x16x128xbf16>
    %c0_54 = arith.constant 0 : index
    %c0_55 = arith.constant 0 : index
    %c0_56 = arith.constant 0 : index
    %126 = vector.load %arg22[%c0_54, %c0_55, %c0_56] : memref<1x16x128xbf16, #tpu.memory_space<vmem>>, vector<1x16x128xbf16>
    tpu.vector_store %arg22[%c0_54, %c0_55, %c0_56], %125 {strides = array<i32>} : memref<1x16x128xbf16, #tpu.memory_space<vmem>>, vector<1x16x128xbf16>,
    %127 = arith.addf %109, %123 : vector<16x128xf32>
    %c0_57 = arith.constant 0 : index
    %c0_58 = arith.constant 0 : index
    %128 = vector.load %arg13[%c0_57, %c0_58] : memref<1x128xf32, #tpu.memory_space<vmem>>, vector<1x128xf32>
    %c0_59 = arith.constant 0 : index
    %c0_60 = arith.constant 0 : index
    %129 = vector.load %arg14[%c0_59, %c0_60] : memref<1x128xf32, #tpu.memory_space<vmem>>, vector<1x128xf32>
    %cst_61 = arith.constant dense<0.000000e+00> : vector<16xf32>
    %130 = vector.multi_reduction <add>, %127, %cst_61 [1] : vector<16x128xf32> to vector<16xf32>
    %131 = vector.shape_cast %130 : vector<16xf32> to vector<16x1xf32>
    %cst_62 = arith.constant 1.280000e+02 : f32
    %132 = vector.broadcast %cst_62 : f32 to vector<16x1xf32>
    %133 = arith.divf %131, %132 : vector<16x1xf32>
    %134 = vector.broadcast %133 : vector<16x1xf32> to vector<16x128xf32>
    %135 = arith.subf %127, %134 : vector<16x128xf32>
    %136 = arith.mulf %135, %135 : vector<16x128xf32>
    %cst_63 = arith.constant dense<0.000000e+00> : vector<16xf32>
    %137 = vector.multi_reduction <add>, %136, %cst_63 [1] : vector<16x128xf32> to vector<16xf32>
    %138 = vector.shape_cast %137 : vector<16xf32> to vector<16x1xf32>
    %cst_64 = arith.constant 1.280000e+02 : f32
    %139 = vector.broadcast %cst_64 : f32 to vector<16x1xf32>
    %140 = arith.divf %138, %139 : vector<16x1xf32>
    %cst_65 = arith.constant 9.99999974E-6 : f32
    %141 = vector.broadcast %cst_65 : f32 to vector<16x1xf32>
    %142 = arith.addf %140, %141 : vector<16x1xf32>
    %143 = math.rsqrt %142 : vector<16x1xf32>
    %144 = vector.broadcast %143 : vector<16x1xf32> to vector<16x128xf32>
    %145 = arith.mulf %135, %144 : vector<16x128xf32>
    %146 = vector.broadcast %128 : vector<1x128xf32> to vector<16x128xf32>
    %147 = arith.mulf %145, %146 : vector<16x128xf32>
    %148 = vector.broadcast %129 : vector<1x128xf32> to vector<16x128xf32>
    %149 = arith.addf %147, %148 : vector<16x128xf32>
    %c0_66 = arith.constant 0 : index
    %c0_67 = arith.constant 0 : index
    %c0_68 = arith.constant 0 : index
    %150 = vector.load %arg19[%c0_66, %c0_67, %c0_68] : memref<1x1x128xf32, #tpu.memory_space<vmem>>, vector<1x1x128xf32>
    %151 = vector.shape_cast %150 : vector<1x1x128xf32> to vector<1x128xf32>
    %c0_69 = arith.constant 0 : index
    %c0_70 = arith.constant 0 : index
    %c0_71 = arith.constant 0 : index
    %152 = vector.load %arg20[%c0_69, %c0_70, %c0_71] : memref<1x1x128xf32, #tpu.memory_space<vmem>>, vector<1x1x128xf32>
    %153 = vector.shape_cast %152 : vector<1x1x128xf32> to vector<1x128xf32>
    %cst_72 = arith.constant dense<0.000000e+00> : vector<16xf32>
    %154 = vector.multi_reduction <add>, %149, %cst_72 [1] : vector<16x128xf32> to vector<16xf32>
    %155 = vector.shape_cast %154 : vector<16xf32> to vector<16x1xf32>
    %cst_73 = arith.constant 1.280000e+02 : f32
    %156 = vector.broadcast %cst_73 : f32 to vector<16x1xf32>
    %157 = arith.divf %155, %156 : vector<16x1xf32>
    %158 = vector.broadcast %157 : vector<16x1xf32> to vector<16x128xf32>
    %159 = arith.subf %149, %158 : vector<16x128xf32>
    %160 = arith.mulf %159, %159 : vector<16x128xf32>
    %cst_74 = arith.constant dense<0.000000e+00> : vector<16xf32>
    %161 = vector.multi_reduction <add>, %160, %cst_74 [1] : vector<16x128xf32> to vector<16xf32>
    %162 = vector.shape_cast %161 : vector<16xf32> to vector<16x1xf32>
    %cst_75 = arith.constant 1.280000e+02 : f32
    %163 = vector.broadcast %cst_75 : f32 to vector<16x1xf32>
    %164 = arith.divf %162, %163 : vector<16x1xf32>
    %cst_76 = arith.constant 9.99999974E-6 : f32
    %165 = vector.broadcast %cst_76 : f32 to vector<16x1xf32>
    %166 = arith.addf %164, %165 : vector<16x1xf32>
    %167 = math.rsqrt %166 : vector<16x1xf32>
    %168 = vector.broadcast %167 : vector<16x1xf32> to vector<16x128xf32>
    %169 = arith.mulf %159, %168 : vector<16x128xf32>
    %170 = vector.broadcast %151 : vector<1x128xf32> to vector<16x128xf32>
    %171 = arith.mulf %169, %170 : vector<16x128xf32>
    %172 = vector.broadcast %153 : vector<1x128xf32> to vector<16x128xf32>
    %173 = arith.addf %171, %172 : vector<16x128xf32>
    %174 = arith.truncf %173 : vector<16x128xf32> to vector<16x128xbf16>
    %c0_77 = arith.constant 0 : index
    %c0_78 = arith.constant 0 : index
    %c0_79 = arith.constant 0 : index
    %175 = vector.load %arg15[%c0_77, %c0_78, %c0_79] : memref<1x128x128xbf16, #tpu.memory_space<vmem>>, vector<1x128x128xbf16>
    %176 = vector.shape_cast %175 : vector<1x128x128xbf16> to vector<128x128xbf16>
    %cst_80 = arith.constant dense<0.000000e+00> : vector<16x128xf32>
    %177 = tpu.matmul %174, %176, %cst_80 {dimension_numbers = #tpu.dot_dimension_numbers<[1], [0], [0], [1], [0, 0, 1, 1], [], []>} : vector<16x128xbf16>, vector<128x128xbf16>, vector<16x128xf32> -> vector<16x128xf32>
    %c0_81 = arith.constant 0 : index
    %c0_82 = arith.constant 0 : index
    %c0_83 = arith.constant 0 : index
    %178 = vector.load %arg16[%c0_81, %c0_82, %c0_83] : memref<1x1x128xf32, #tpu.memory_space<vmem>>, vector<1x1x128xf32>
    %179 = vector.shape_cast %178 : vector<1x1x128xf32> to vector<1x128xf32>
    %180 = vector.broadcast %179 : vector<1x128xf32> to vector<16x128xf32>
    %181 = arith.addf %177, %180 : vector<16x128xf32>
    %cst_84 = arith.constant 0.000000e+00 : f32
    %182 = vector.broadcast %cst_84 : f32 to vector<16x128xf32>
    %183 = arith.maximumf %181, %182 : vector<16x128xf32>
    %184 = arith.truncf %183 : vector<16x128xf32> to vector<16x128xbf16>
    %c0_85 = arith.constant 0 : index
    %c0_86 = arith.constant 0 : index
    %c0_87 = arith.constant 0 : index
    %185 = vector.load %arg17[%c0_85, %c0_86, %c0_87] : memref<1x128x128xbf16, #tpu.memory_space<vmem>>, vector<1x128x128xbf16>
    %186 = vector.shape_cast %185 : vector<1x128x128xbf16> to vector<128x128xbf16>
    %cst_88 = arith.constant dense<0.000000e+00> : vector<16x128xf32>
    %187 = tpu.matmul %184, %186, %cst_88 {dimension_numbers = #tpu.dot_dimension_numbers<[1], [0], [0], [1], [0, 0, 1, 1], [], []>} : vector<16x128xbf16>, vector<128x128xbf16>, vector<16x128xf32> -> vector<16x128xf32>
    %c0_89 = arith.constant 0 : index
    %c0_90 = arith.constant 0 : index
    %c0_91 = arith.constant 0 : index
    %188 = vector.load %arg18[%c0_89, %c0_90, %c0_91] : memref<1x1x128xf32, #tpu.memory_space<vmem>>, vector<1x1x128xf32>
    %189 = vector.shape_cast %188 : vector<1x1x128xf32> to vector<1x128xf32>
    %190 = vector.broadcast %189 : vector<1x128xf32> to vector<16x128xf32>
    %191 = arith.addf %187, %190 : vector<16x128xf32>
    %192 = arith.addf %149, %191 : vector<16x128xf32>
    %193 = vector.shape_cast %192 : vector<16x128xf32> to vector<1x16x128xf32>
    %c0_92 = arith.constant 0 : index
    %c0_93 = arith.constant 0 : index
    %c0_94 = arith.constant 0 : index
    %194 = vector.load %arg21[%c0_92, %c0_93, %c0_94] : memref<1x16x128xf32, #tpu.memory_space<vmem>>, vector<1x16x128xf32>
    tpu.vector_store %arg21[%c0_92, %c0_93, %c0_94], %193 {strides = array<i32>} : memref<1x16x128xf32, #tpu.memory_space<vmem>>, vector<1x16x128xf32>,
    return
  }
  func.func @transform_0(%arg0: i32, %arg1: memref<1xi32, #tpu.memory_space<smem>>) -> (i32, i32, i32) {
    %c0_i32 = arith.constant 0 : i32
    %c0_i32_0 = arith.constant 0 : i32
    %c0_i32_1 = arith.constant 0 : i32
    return %arg0, %c0_i32, %c0_i32_0 : i32, i32, i32
  }
  func.func @transform_1(%arg0: i32, %arg1: memref<1xi32, #tpu.memory_space<smem>>) -> (i32, i32) {
    %c0_i32 = arith.constant 0 : i32
    %c0_i32_0 = arith.constant 0 : i32
    %c0_i32_1 = arith.constant 0 : i32
    return %c0_i32, %c0_i32_0 : i32, i32
  }
  func.func @transform_2(%arg0: i32, %arg1: memref<1xi32, #tpu.memory_space<smem>>) -> (i32, i32) {
    %c0_i32 = arith.constant 0 : i32
    %c0_i32_0 = arith.constant 0 : i32
    %c0_i32_1 = arith.constant 0 : i32
    return %c0_i32, %c0_i32_0 : i32, i32
  }
  func.func @transform_3(%arg0: i32, %arg1: memref<1xi32, #tpu.memory_space<smem>>) -> (i32, i32) {
    %c0_i32 = arith.constant 0 : i32
    %c0_i32_0 = arith.constant 0 : i32
    %c0_i32_1 = arith.constant 0 : i32
    return %c0_i32, %c0_i32_0 : i32, i32
  }
  func.func @transform_4(%arg0: i32, %arg1: memref<1xi32, #tpu.memory_space<smem>>) -> (i32, i32) {
    %c0_i32 = arith.constant 0 : i32
    %c0_i32_0 = arith.constant 0 : i32
    %c0_i32_1 = arith.constant 0 : i32
    return %c0_i32, %c0_i32_0 : i32, i32
  }
  func.func @transform_5(%arg0: i32, %arg1: memref<1xi32, #tpu.memory_space<smem>>) -> (i32, i32) {
    %c0_i32 = arith.constant 0 : i32
    %c0_i32_0 = arith.constant 0 : i32
    %c0_i32_1 = arith.constant 0 : i32
    return %c0_i32, %c0_i32_0 : i32, i32
  }
  func.func @transform_6(%arg0: i32, %arg1: memref<1xi32, #tpu.memory_space<smem>>) -> (i32, i32) {
    %c0_i32 = arith.constant 0 : i32
    %c0_i32_0 = arith.constant 0 : i32
    %c0_i32_1 = arith.constant 0 : i32
    return %c0_i32, %c0_i32_0 : i32, i32
  }
  func.func @transform_7(%arg0: i32, %arg1: memref<1xi32, #tpu.memory_space<smem>>) -> (i32, i32) {
    %c0_i32 = arith.constant 0 : i32
    %c0_i32_0 = arith.constant 0 : i32
    %c0_i32_1 = arith.constant 0 : i32
    return %c0_i32, %c0_i32_0 : i32, i32
  }
  func.func @transform_8(%arg0: i32, %arg1: memref<1xi32, #tpu.memory_space<smem>>) -> (i32, i32) {
    %c0_i32 = arith.constant 0 : i32
    %c0_i32_0 = arith.constant 0 : i32
    %c0_i32_1 = arith.constant 0 : i32
    return %c0_i32, %c0_i32_0 : i32, i32
  }
  func.func @transform_9(%arg0: i32, %arg1: memref<1xi32, #tpu.memory_space<smem>>) -> (i32, i32) {
    %c0_i32 = arith.constant 0 : i32
    %c0_i32_0 = arith.constant 0 : i32
    %c0_i32_1 = arith.constant 0 : i32
    return %c0_i32, %c0_i32_0 : i32, i32
  }
  func.func @transform_10(%arg0: i32, %arg1: memref<1xi32, #tpu.memory_space<smem>>) -> (i32, i32) {
    %c0_i32 = arith.constant 0 : i32
    %c0_i32_0 = arith.constant 0 : i32
    %c0_i32_1 = arith.constant 0 : i32
    return %c0_i32, %c0_i32_0 : i32, i32
  }
  func.func @transform_11(%arg0: i32, %arg1: memref<1xi32, #tpu.memory_space<smem>>) -> (i32, i32) {
    %c0_i32 = arith.constant 0 : i32
    %c0_i32_0 = arith.constant 0 : i32
    %c0_i32_1 = arith.constant 0 : i32
    return %c0_i32, %c0_i32_0 : i32, i32
  }
  func.func @transform_12(%arg0: i32, %arg1: memref<1xi32, #tpu.memory_space<smem>>) -> (i32, i32) {
    %c0_i32 = arith.constant 0 : i32
    %c0_i32_0 = arith.constant 0 : i32
    %c0_i32_1 = arith.constant 0 : i32
    return %c0_i32, %c0_i32_0 : i32, i32
  }
  func.func @transform_13(%arg0: i32, %arg1: memref<1xi32, #tpu.memory_space<smem>>) -> (i32, i32, i32) {
    %c0 = arith.constant 0 : index
    %0 = memref.load %arg1[%c0] : memref<1xi32, #tpu.memory_space<smem>>
    %c0_i32 = arith.constant 0 : i32
    %c0_i32_0 = arith.constant 0 : i32
    %c0_i32_1 = arith.constant 0 : i32
    return %0, %c0_i32, %c0_i32_0 : i32, i32, i32
  }
  func.func @transform_14(%arg0: i32, %arg1: memref<1xi32, #tpu.memory_space<smem>>) -> (i32, i32, i32) {
    %c0 = arith.constant 0 : index
    %0 = memref.load %arg1[%c0] : memref<1xi32, #tpu.memory_space<smem>>
    %c0_i32 = arith.constant 0 : i32
    %c0_i32_0 = arith.constant 0 : i32
    %c0_i32_1 = arith.constant 0 : i32
    return %0, %c0_i32, %c0_i32_0 : i32, i32, i32
  }
  func.func @transform_15(%arg0: i32, %arg1: memref<1xi32, #tpu.memory_space<smem>>) -> (i32, i32, i32) {
    %c0 = arith.constant 0 : index
    %0 = memref.load %arg1[%c0] : memref<1xi32, #tpu.memory_space<smem>>
    %c0_i32 = arith.constant 0 : i32
    %c0_i32_0 = arith.constant 0 : i32
    %c0_i32_1 = arith.constant 0 : i32
    return %0, %c0_i32, %c0_i32_0 : i32, i32, i32
  }
  func.func @transform_16(%arg0: i32, %arg1: memref<1xi32, #tpu.memory_space<smem>>) -> (i32, i32, i32) {
    %c0 = arith.constant 0 : index
    %0 = memref.load %arg1[%c0] : memref<1xi32, #tpu.memory_space<smem>>
    %c0_i32 = arith.constant 0 : i32
    %c0_i32_0 = arith.constant 0 : i32
    %c0_i32_1 = arith.constant 0 : i32
    return %0, %c0_i32, %c0_i32_0 : i32, i32, i32
  }
  func.func @transform_17(%arg0: i32, %arg1: memref<1xi32, #tpu.memory_space<smem>>) -> (i32, i32, i32) {
    %c0 = arith.constant 0 : index
    %0 = memref.load %arg1[%c0] : memref<1xi32, #tpu.memory_space<smem>>
    %c0_i32 = arith.constant 0 : i32
    %c0_i32_0 = arith.constant 0 : i32
    %c0_i32_1 = arith.constant 0 : i32
    return %0, %c0_i32, %c0_i32_0 : i32, i32, i32
  }
  func.func @transform_18(%arg0: i32, %arg1: memref<1xi32, #tpu.memory_space<smem>>) -> (i32, i32, i32) {
    %c0 = arith.constant 0 : index
    %0 = memref.load %arg1[%c0] : memref<1xi32, #tpu.memory_space<smem>>
    %c0_i32 = arith.constant 0 : i32
    %c0_i32_0 = arith.constant 0 : i32
    %c0_i32_1 = arith.constant 0 : i32
    return %0, %c0_i32, %c0_i32_0 : i32, i32, i32
  }
  func.func @transform_19(%arg0: i32, %arg1: memref<1xi32, #tpu.memory_space<smem>>) -> (i32, i32, i32) {
    %c0_i32 = arith.constant 0 : i32
    %c0_i32_0 = arith.constant 0 : i32
    %c0_i32_1 = arith.constant 0 : i32
    return %arg0, %c0_i32, %c0_i32_0 : i32, i32, i32
  }
  func.func @transform_20(%arg0: i32, %arg1: memref<1xi32, #tpu.memory_space<smem>>) -> (i32, i32, i32) {
    %c0_i32 = arith.constant 0 : i32
    %c0_i32_0 = arith.constant 0 : i32
    %c0_i32_1 = arith.constant 0 : i32
    return %arg0, %c0_i32, %c0_i32_0 : i32, i32, i32
  }
}

module attributes {stable_mosaic.version = 11 : i64} {
  func.func @transformer_adapter_kernel(%arg0: i32, %arg1: memref<1xi32, #tpu.memory_space<smem>>, %arg2: memref<1x16x128xf32, #tpu.memory_space<vmem>>, %arg3: memref<128x384xbf16, #tpu.memory_space<vmem>>, %arg4: memref<1x384xf32, #tpu.memory_space<vmem>>, %arg5: memref<128x128xbf16, #tpu.memory_space<vmem>>, %arg6: memref<1x128xf32, #tpu.memory_space<vmem>>, %arg7: memref<1x128xf32, #tpu.memory_space<vmem>>, %arg8: memref<1x128xf32, #tpu.memory_space<vmem>>, %arg9: memref<128x256xbf16, #tpu.memory_space<vmem>>, %arg10: memref<1x256xf32, #tpu.memory_space<vmem>>, %arg11: memref<256x128xbf16, #tpu.memory_space<vmem>>, %arg12: memref<1x128xf32, #tpu.memory_space<vmem>>, %arg13: memref<1x128xf32, #tpu.memory_space<vmem>>, %arg14: memref<1x128xf32, #tpu.memory_space<vmem>>, %arg15: memref<1x128x128xbf16, #tpu.memory_space<vmem>>, %arg16: memref<1x1x128xf32, #tpu.memory_space<vmem>>, %arg17: memref<1x128x128xbf16, #tpu.memory_space<vmem>>, %arg18: memref<1x1x128xf32, #tpu.memory_space<vmem>>, %arg19: memref<1x1x128xf32, #tpu.memory_space<vmem>>, %arg20: memref<1x1x128xf32, #tpu.memory_space<vmem>>, %arg21: memref<1x16x128xf32, #tpu.memory_space<vmem>>, %arg22: memref<1x16x128xbf16, #tpu.memory_space<vmem>>, %arg23: memref<16x128xbf16, #tpu.memory_space<vmem>>) attributes {dimension_semantics = [#tpu.dimension_semantics<parallel>], iteration_bounds = array<i64: 2>, scalar_prefetch = 1 : i64, scratch_operands = 1 : i64, tpu.core_type = #tpu.core_type<tc>, window_params = [{transform_indices = @transform_0, window_bounds = array<i64: 1, 16, 128>}, {pipeline_mode = #tpu.pipeline_mode<synchronous>, transform_indices = @transform_1, window_bounds = array<i64: 128, 384>}, {pipeline_mode = #tpu.pipeline_mode<synchronous>, transform_indices = @transform_2, window_bounds = array<i64: 1, 384>}, {pipeline_mode = #tpu.pipeline_mode<synchronous>, transform_indices = @transform_3, window_bounds = array<i64: 128, 128>}, {pipeline_mode = #tpu.pipeline_mode<synchronous>, transform_indices = @transform_4, window_bounds = array<i64: 1, 128>}, {pipeline_mode = #tpu.pipeline_mode<synchronous>, transform_indices = @transform_5, window_bounds = array<i64: 1, 128>}, {pipeline_mode = #tpu.pipeline_mode<synchronous>, transform_indices = @transform_6, window_bounds = array<i64: 1, 128>}, {pipeline_mode = #tpu.pipeline_mode<synchronous>, transform_indices = @transform_7, window_bounds = array<i64: 128, 256>}, {pipeline_mode = #tpu.pipeline_mode<synchronous>, transform_indices = @transform_8, window_bounds = array<i64: 1, 256>}, {pipeline_mode = #tpu.pipeline_mode<synchronous>, transform_indices = @transform_9, window_bounds = array<i64: 256, 128>}, {pipeline_mode = #tpu.pipeline_mode<synchronous>, transform_indices = @transform_10, window_bounds = array<i64: 1, 128>}, {pipeline_mode = #tpu.pipeline_mode<synchronous>, transform_indices = @transform_11, window_bounds = array<i64: 1, 128>}, {pipeline_mode = #tpu.pipeline_mode<synchronous>, transform_indices = @transform_12, window_bounds = array<i64: 1, 128>}, {transform_indices = @transform_13, window_bounds = array<i64: 1, 128, 128>}, {transform_indices = @transform_14, window_bounds = array<i64: 1, 1, 128>}, {transform_indices = @transform_15, window_bounds = array<i64: 1, 128, 128>}, {transform_indices = @transform_16, window_bounds = array<i64: 1, 1, 128>}, {transform_indices = @transform_17, window_bounds = array<i64: 1, 1, 128>}, {transform_indices = @transform_18, window_bounds = array<i64: 1, 1, 128>}, {transform_indices = @transform_19, window_bounds = array<i64: 1, 16, 128>}, {transform_indices = @transform_20, window_bounds = array<i64: 1, 16, 128>}]} {
    %c0 = arith.constant 0 : index
    %c0_0 = arith.constant 0 : index
    %c0_1 = arith.constant 0 : index
    %0 = vector.load %arg2[%c0, %c0_0, %c0_1] : memref<1x16x128xf32, #tpu.memory_space<vmem>>, vector<1x16x128xf32>
    %1 = vector.shape_cast %0 : vector<1x16x128xf32> to vector<16x128xf32>
    %2 = arith.truncf %1 : vector<16x128xf32> to vector<16x128xbf16>
    %c0_2 = arith.constant 0 : index
    %c0_3 = arith.constant 0 : index
    %3 = vector.load %arg3[%c0_2, %c0_3] : memref<128x384xbf16, #tpu.memory_space<vmem>>, vector<128x384xbf16>
    %cst = arith.constant dense<0.000000e+00> : vector<16x384xf32>
    %4 = tpu.matmul %2, %3, %cst {dimension_numbers = #tpu.dot_dimension_numbers<[1], [0], [0], [1], [0, 0, 1, 1], [], []>} : vector<16x128xbf16>, vector<128x384xbf16>, vector<16x384xf32> -> vector<16x384xf32>
    %c0_4 = arith.constant 0 : index
    %c0_5 = arith.constant 0 : index
    %5 = vector.load %arg4[%c0_4, %c0_5] : memref<1x384xf32, #tpu.memory_space<vmem>>, vector<1x384xf32>
    %6 = vector.broadcast %5 : vector<1x384xf32> to vector<16x384xf32>
    %7 = arith.addf %4, %6 : vector<16x384xf32>
    %8 = arith.truncf %7 : vector<16x384xf32> to vector<16x384xbf16>
    %9 = vector.extract_strided_slice %8 {offsets = [0, 0], sizes = [16, 32], strides = [1, 1]} : vector<16x384xbf16> to vector<16x32xbf16>
    %10 = vector.extract_strided_slice %8 {offsets = [0, 128], sizes = [16, 32], strides = [1, 1]} : vector<16x384xbf16> to vector<16x32xbf16>
    %11 = vector.extract_strided_slice %8 {offsets = [0, 256], sizes = [16, 32], strides = [1, 1]} : vector<16x384xbf16> to vector<16x32xbf16>
    %cst_6 = arith.constant dense<0.000000e+00> : vector<16x16xf32>
    %12 = tpu.matmul %9, %10, %cst_6 {dimension_numbers = #tpu.dot_dimension_numbers<[1], [1], [0], [0], [0, 0, 1, 0], [], []>} : vector<16x32xbf16>, vector<16x32xbf16>, vector<16x16xf32> -> vector<16x16xf32>
    %cst_7 = arith.constant dense<0xFF800000> : vector<16xf32>
    %13 = vector.multi_reduction <maximumf>, %12, %cst_7 [1] : vector<16x16xf32> to vector<16xf32>
    %14 = vector.shape_cast %13 : vector<16xf32> to vector<16x1xf32>
    %15 = vector.broadcast %14 : vector<16x1xf32> to vector<16x16xf32>
    %16 = arith.subf %12, %15 : vector<16x16xf32>
    %17 = math.exp %16 : vector<16x16xf32>
    %cst_8 = arith.constant dense<0.000000e+00> : vector<16xf32>
    %18 = vector.multi_reduction <add>, %17, %cst_8 [1] : vector<16x16xf32> to vector<16xf32>
    %19 = vector.shape_cast %18 : vector<16xf32> to vector<16x1xf32>
    %20 = tpu.reciprocal %19 {approx = true} : vector<16x1xf32> -> vector<16x1xf32>
    %21 = vector.broadcast %20 : vector<16x1xf32> to vector<16x16xf32>
    %22 = arith.mulf %17, %21 : vector<16x16xf32>
    %23 = arith.truncf %22 : vector<16x16xf32> to vector<16x16xbf16>
    %cst_9 = arith.constant dense<0.000000e+00> : vector<16x32xf32>
    %24 = tpu.matmul %23, %11, %cst_9 {dimension_numbers = #tpu.dot_dimension_numbers<[1], [0], [0], [1], [0, 0, 1, 1], [], []>} : vector<16x16xbf16>, vector<16x32xbf16>, vector<16x32xf32> -> vector<16x32xf32>
    %25 = arith.truncf %24 : vector<16x32xf32> to vector<16x32xbf16>
    %c0_10 = arith.constant 0 : index
    %c0_11 = arith.constant 0 : index
    %26 = vector.load %arg23[%c0_10, %c0_11] : memref<16x128xbf16, #tpu.memory_space<vmem>>, vector<16x32xbf16>
    tpu.vector_store %arg23[%c0_10, %c0_11], %25 {strides = array<i32>} : memref<16x128xbf16, #tpu.memory_space<vmem>>, vector<16x32xbf16>,
    %27 = vector.extract_strided_slice %8 {offsets = [0, 32], sizes = [16, 32], strides = [1, 1]} : vector<16x384xbf16> to vector<16x32xbf16>
    %28 = vector.extract_strided_slice %8 {offsets = [0, 160], sizes = [16, 32], strides = [1, 1]} : vector<16x384xbf16> to vector<16x32xbf16>
    %29 = vector.extract_strided_slice %8 {offsets = [0, 288], sizes = [16, 32], strides = [1, 1]} : vector<16x384xbf16> to vector<16x32xbf16>
    %cst_12 = arith.constant dense<0.000000e+00> : vector<16x16xf32>
    %30 = tpu.matmul %27, %28, %cst_12 {dimension_numbers = #tpu.dot_dimension_numbers<[1], [1], [0], [0], [0, 0, 1, 0], [], []>} : vector<16x32xbf16>, vector<16x32xbf16>, vector<16x16xf32> -> vector<16x16xf32>
    %cst_13 = arith.constant dense<0xFF800000> : vector<16xf32>
    %31 = vector.multi_reduction <maximumf>, %30, %cst_13 [1] : vector<16x16xf32> to vector<16xf32>
    %32 = vector.shape_cast %31 : vector<16xf32> to vector<16x1xf32>
    %33 = vector.broadcast %32 : vector<16x1xf32> to vector<16x16xf32>
    %34 = arith.subf %30, %33 : vector<16x16xf32>
    %35 = math.exp %34 : vector<16x16xf32>
    %cst_14 = arith.constant dense<0.000000e+00> : vector<16xf32>
    %36 = vector.multi_reduction <add>, %35, %cst_14 [1] : vector<16x16xf32> to vector<16xf32>
    %37 = vector.shape_cast %36 : vector<16xf32> to vector<16x1xf32>
    %38 = tpu.reciprocal %37 {approx = true} : vector<16x1xf32> -> vector<16x1xf32>
    %39 = vector.broadcast %38 : vector<16x1xf32> to vector<16x16xf32>
    %40 = arith.mulf %35, %39 : vector<16x16xf32>
    %41 = arith.truncf %40 : vector<16x16xf32> to vector<16x16xbf16>
    %cst_15 = arith.constant dense<0.000000e+00> : vector<16x32xf32>
    %42 = tpu.matmul %41, %29, %cst_15 {dimension_numbers = #tpu.dot_dimension_numbers<[1], [0], [0], [1], [0, 0, 1, 1], [], []>} : vector<16x16xbf16>, vector<16x32xbf16>, vector<16x32xf32> -> vector<16x32xf32>
    %43 = arith.truncf %42 : vector<16x32xf32> to vector<16x32xbf16>
    %c0_16 = arith.constant 0 : index
    %c32 = arith.constant 32 : index
    %44 = vector.load %arg23[%c0_16, %c32] : memref<16x128xbf16, #tpu.memory_space<vmem>>, vector<16x32xbf16>
    tpu.vector_store %arg23[%c0_16, %c32], %43 {strides = array<i32>} : memref<16x128xbf16, #tpu.memory_space<vmem>>, vector<16x32xbf16>,
    %45 = vector.extract_strided_slice %8 {offsets = [0, 64], sizes = [16, 32], strides = [1, 1]} : vector<16x384xbf16> to vector<16x32xbf16>
    %46 = vector.extract_strided_slice %8 {offsets = [0, 192], sizes = [16, 32], strides = [1, 1]} : vector<16x384xbf16> to vector<16x32xbf16>
    %47 = vector.extract_strided_slice %8 {offsets = [0, 320], sizes = [16, 32], strides = [1, 1]} : vector<16x384xbf16> to vector<16x32xbf16>
    %cst_17 = arith.constant dense<0.000000e+00> : vector<16x16xf32>
    %48 = tpu.matmul %45, %46, %cst_17 {dimension_numbers = #tpu.dot_dimension_numbers<[1], [1], [0], [0], [0, 0, 1, 0], [], []>} : vector<16x32xbf16>, vector<16x32xbf16>, vector<16x16xf32> -> vector<16x16xf32>
    %cst_18 = arith.constant dense<0xFF800000> : vector<16xf32>
    %49 = vector.multi_reduction <maximumf>, %48, %cst_18 [1] : vector<16x16xf32> to vector<16xf32>
    %50 = vector.shape_cast %49 : vector<16xf32> to vector<16x1xf32>
    %51 = vector.broadcast %50 : vector<16x1xf32> to vector<16x16xf32>
    %52 = arith.subf %48, %51 : vector<16x16xf32>
    %53 = math.exp %52 : vector<16x16xf32>
    %cst_19 = arith.constant dense<0.000000e+00> : vector<16xf32>
    %54 = vector.multi_reduction <add>, %53, %cst_19 [1] : vector<16x16xf32> to vector<16xf32>
    %55 = vector.shape_cast %54 : vector<16xf32> to vector<16x1xf32>
    %56 = tpu.reciprocal %55 {approx = true} : vector<16x1xf32> -> vector<16x1xf32>
    %57 = vector.broadcast %56 : vector<16x1xf32> to vector<16x16xf32>
    %58 = arith.mulf %53, %57 : vector<16x16xf32>
    %59 = arith.truncf %58 : vector<16x16xf32> to vector<16x16xbf16>
    %cst_20 = arith.constant dense<0.000000e+00> : vector<16x32xf32>
    %60 = tpu.matmul %59, %47, %cst_20 {dimension_numbers = #tpu.dot_dimension_numbers<[1], [0], [0], [1], [0, 0, 1, 1], [], []>} : vector<16x16xbf16>, vector<16x32xbf16>, vector<16x32xf32> -> vector<16x32xf32>
    %61 = arith.truncf %60 : vector<16x32xf32> to vector<16x32xbf16>
    %c0_21 = arith.constant 0 : index
    %c64 = arith.constant 64 : index
    %62 = vector.load %arg23[%c0_21, %c64] : memref<16x128xbf16, #tpu.memory_space<vmem>>, vector<16x32xbf16>
    tpu.vector_store %arg23[%c0_21, %c64], %61 {strides = array<i32>} : memref<16x128xbf16, #tpu.memory_space<vmem>>, vector<16x32xbf16>,
    %63 = vector.extract_strided_slice %8 {offsets = [0, 96], sizes = [16, 32], strides = [1, 1]} : vector<16x384xbf16> to vector<16x32xbf16>
    %64 = vector.extract_strided_slice %8 {offsets = [0, 224], sizes = [16, 32], strides = [1, 1]} : vector<16x384xbf16> to vector<16x32xbf16>
    %65 = vector.extract_strided_slice %8 {offsets = [0, 352], sizes = [16, 32], strides = [1, 1]} : vector<16x384xbf16> to vector<16x32xbf16>
    %cst_22 = arith.constant dense<0.000000e+00> : vector<16x16xf32>
    %66 = tpu.matmul %63, %64, %cst_22 {dimension_numbers = #tpu.dot_dimension_numbers<[1], [1], [0], [0], [0, 0, 1, 0], [], []>} : vector<16x32xbf16>, vector<16x32xbf16>, vector<16x16xf32> -> vector<16x16xf32>
    %cst_23 = arith.constant dense<0xFF800000> : vector<16xf32>
    %67 = vector.multi_reduction <maximumf>, %66, %cst_23 [1] : vector<16x16xf32> to vector<16xf32>
    %68 = vector.shape_cast %67 : vector<16xf32> to vector<16x1xf32>
    %69 = vector.broadcast %68 : vector<16x1xf32> to vector<16x16xf32>
    %70 = arith.subf %66, %69 : vector<16x16xf32>
    %71 = math.exp %70 : vector<16x16xf32>
    %cst_24 = arith.constant dense<0.000000e+00> : vector<16xf32>
    %72 = vector.multi_reduction <add>, %71, %cst_24 [1] : vector<16x16xf32> to vector<16xf32>
    %73 = vector.shape_cast %72 : vector<16xf32> to vector<16x1xf32>
    %74 = tpu.reciprocal %73 {approx = true} : vector<16x1xf32> -> vector<16x1xf32>
    %75 = vector.broadcast %74 : vector<16x1xf32> to vector<16x16xf32>
    %76 = arith.mulf %71, %75 : vector<16x16xf32>
    %77 = arith.truncf %76 : vector<16x16xf32> to vector<16x16xbf16>
    %cst_25 = arith.constant dense<0.000000e+00> : vector<16x32xf32>
    %78 = tpu.matmul %77, %65, %cst_25 {dimension_numbers = #tpu.dot_dimension_numbers<[1], [0], [0], [1], [0, 0, 1, 1], [], []>} : vector<16x16xbf16>, vector<16x32xbf16>, vector<16x32xf32> -> vector<16x32xf32>
    %79 = arith.truncf %78 : vector<16x32xf32> to vector<16x32xbf16>
    %c0_26 = arith.constant 0 : index
    %c96 = arith.constant 96 : index
    %80 = vector.load %arg23[%c0_26, %c96] : memref<16x128xbf16, #tpu.memory_space<vmem>>, vector<16x32xbf16>
    tpu.vector_store %arg23[%c0_26, %c96], %79 {strides = array<i32>} : memref<16x128xbf16, #tpu.memory_space<vmem>>, vector<16x32xbf16>,
    %c0_27 = arith.constant 0 : index
    %c0_28 = arith.constant 0 : index
    %81 = vector.load %arg23[%c0_27, %c0_28] : memref<16x128xbf16, #tpu.memory_space<vmem>>, vector<16x128xbf16>
    %c0_29 = arith.constant 0 : index
    %c0_30 = arith.constant 0 : index
    %82 = vector.load %arg5[%c0_29, %c0_30] : memref<128x128xbf16, #tpu.memory_space<vmem>>, vector<128x128xbf16>
    %cst_31 = arith.constant dense<0.000000e+00> : vector<16x128xf32>
    %83 = tpu.matmul %81, %82, %cst_31 {dimension_numbers = #tpu.dot_dimension_numbers<[1], [0], [0], [1], [0, 0, 1, 1], [], []>} : vector<16x128xbf16>, vector<128x128xbf16>, vector<16x128xf32> -> vector<16x128xf32>
    %c0_32 = arith.constant 0 : index
    %c0_33 = arith.constant 0 : index
    %84 = vector.load %arg6[%c0_32, %c0_33] : memref<1x128xf32, #tpu.memory_space<vmem>>, vector<1x128xf32>
    %85 = vector.broadcast %84 : vector<1x128xf32> to vector<16x128xf32>
    %86 = arith.addf %83, %85 : vector<16x128xf32>
    %87 = arith.addf %1, %86 : vector<16x128xf32>
    %c0_34 = arith.constant 0 : index
    %c0_35 = arith.constant 0 : index
    %88 = vector.load %arg7[%c0_34, %c0_35] : memref<1x128xf32, #tpu.memory_space<vmem>>, vector<1x128xf32>
    %c0_36 = arith.constant 0 : index
    %c0_37 = arith.constant 0 : index
    %89 = vector.load %arg8[%c0_36, %c0_37] : memref<1x128xf32, #tpu.memory_space<vmem>>, vector<1x128xf32>
    %cst_38 = arith.constant dense<0.000000e+00> : vector<16xf32>
    %90 = vector.multi_reduction <add>, %87, %cst_38 [1] : vector<16x128xf32> to vector<16xf32>
    %91 = vector.shape_cast %90 : vector<16xf32> to vector<16x1xf32>
    %cst_39 = arith.constant 1.280000e+02 : f32
    %92 = vector.broadcast %cst_39 : f32 to vector<16x1xf32>
    %93 = arith.divf %91, %92 : vector<16x1xf32>
    %94 = vector.broadcast %93 : vector<16x1xf32> to vector<16x128xf32>
    %95 = arith.subf %87, %94 : vector<16x128xf32>
    %96 = arith.mulf %95, %95 : vector<16x128xf32>
    %cst_40 = arith.constant dense<0.000000e+00> : vector<16xf32>
    %97 = vector.multi_reduction <add>, %96, %cst_40 [1] : vector<16x128xf32> to vector<16xf32>
    %98 = vector.shape_cast %97 : vector<16xf32> to vector<16x1xf32>
    %cst_41 = arith.constant 1.280000e+02 : f32
    %99 = vector.broadcast %cst_41 : f32 to vector<16x1xf32>
    %100 = arith.divf %98, %99 : vector<16x1xf32>
    %cst_42 = arith.constant 9.99999974E-6 : f32
    %101 = vector.broadcast %cst_42 : f32 to vector<16x1xf32>
    %102 = arith.addf %100, %101 : vector<16x1xf32>
    %103 = math.rsqrt %102 : vector<16x1xf32>
    %104 = vector.broadcast %103 : vector<16x1xf32> to vector<16x128xf32>
    %105 = arith.mulf %95, %104 : vector<16x128xf32>
    %106 = vector.broadcast %88 : vector<1x128xf32> to vector<16x128xf32>
    %107 = arith.mulf %105, %106 : vector<16x128xf32>
    %108 = vector.broadcast %89 : vector<1x128xf32> to vector<16x128xf32>
    %109 = arith.addf %107, %108 : vector<16x128xf32>
    %110 = arith.truncf %109 : vector<16x128xf32> to vector<16x128xbf16>
    %c0_43 = arith.constant 0 : index
    %c0_44 = arith.constant 0 : index
    %111 = vector.load %arg9[%c0_43, %c0_44] : memref<128x256xbf16, #tpu.memory_space<vmem>>, vector<128x256xbf16>
    %cst_45 = arith.constant dense<0.000000e+00> : vector<16x256xf32>
    %112 = tpu.matmul %110, %111, %cst_45 {dimension_numbers = #tpu.dot_dimension_numbers<[1], [0], [0], [1], [0, 0, 1, 1], [], []>} : vector<16x128xbf16>, vector<128x256xbf16>, vector<16x256xf32> -> vector<16x256xf32>
    %c0_46 = arith.constant 0 : index
    %c0_47 = arith.constant 0 : index
    %113 = vector.load %arg10[%c0_46, %c0_47] : memref<1x256xf32, #tpu.memory_space<vmem>>, vector<1x256xf32>
    %114 = vector.broadcast %113 : vector<1x256xf32> to vector<16x256xf32>
    %115 = arith.addf %112, %114 : vector<16x256xf32>
    %cst_48 = arith.constant 0.000000e+00 : f32
    %116 = vector.broadcast %cst_48 : f32 to vector<16x256xf32>
    %117 = arith.maximumf %115, %116 : vector<16x256xf32>
    %118 = arith.truncf %117 : vector<16x256xf32> to vector<16x256xbf16>
    %c0_49 = arith.constant 0 : index
    %c0_50 = arith.constant 0 : index
    %119 = vector.load %arg11[%c0_49, %c0_50] : memref<256x128xbf16, #tpu.memory_space<vmem>>, vector<256x128xbf16>
    %cst_51 = arith.constant dense<0.000000e+00> : vector<16x128xf32>
    %120 = tpu.matmul %118, %119, %cst_51 {dimension_numbers = #tpu.dot_dimension_numbers<[1], [0], [0], [1], [0, 0, 1, 1], [], []>} : vector<16x256xbf16>, vector<256x128xbf16>, vector<16x128xf32> -> vector<16x128xf32>
    %c0_52 = arith.constant 0 : index
    %c0_53 = arith.constant 0 : index
    %121 = vector.load %arg12[%c0_52, %c0_53] : memref<1x128xf32, #tpu.memory_space<vmem>>, vector<1x128xf32>
    %122 = vector.broadcast %121 : vector<1x128xf32> to vector<16x128xf32>
    %123 = arith.addf %120, %122 : vector<16x128xf32>
    %124 = vector.shape_cast %123 : vector<16x128xf32> to vector<1x16x128xf32>
    %125 = arith.truncf %124 : vector<1x16x128xf32> to vector<1x16x128xbf16>
    %c0_54 = arith.constant 0 : index
    %c0_55 = arith.constant 0 : index
    %c0_56 = arith.constant 0 : index
    %126 = vector.load %arg22[%c0_54, %c0_55, %c0_56] : memref<1x16x128xbf16, #tpu.memory_space<vmem>>, vector<1x16x128xbf16>
    tpu.vector_store %arg22[%c0_54, %c0_55, %c0_56], %125 {strides = array<i32>} : memref<1x16x128xbf16, #tpu.memory_space<vmem>>, vector<1x16x128xbf16>,
    %127 = arith.addf %109, %123 : vector<16x128xf32>
    %c0_57 = arith.constant 0 : index
    %c0_58 = arith.constant 0 : index
    %128 = vector.load %arg13[%c0_57, %c0_58] : memref<1x128xf32, #tpu.memory_space<vmem>>, vector<1x128xf32>
    %c0_59 = arith.constant 0 : index
    %c0_60 = arith.constant 0 : index
    %129 = vector.load %arg14[%c0_59, %c0_60] : memref<1x128xf32, #tpu.memory_space<vmem>>, vector<1x128xf32>
    %cst_61 = arith.constant dense<0.000000e+00> : vector<16xf32>
    %130 = vector.multi_reduction <add>, %127, %cst_61 [1] : vector<16x128xf32> to vector<16xf32>
    %131 = vector.shape_cast %130 : vector<16xf32> to vector<16x1xf32>
    %cst_62 = arith.constant 1.280000e+02 : f32
    %132 = vector.broadcast %cst_62 : f32 to vector<16x1xf32>
    %133 = arith.divf %131, %132 : vector<16x1xf32>
    %134 = vector.broadcast %133 : vector<16x1xf32> to vector<16x128xf32>
    %135 = arith.subf %127, %134 : vector<16x128xf32>
    %136 = arith.mulf %135, %135 : vector<16x128xf32>
    %cst_63 = arith.constant dense<0.000000e+00> : vector<16xf32>
    %137 = vector.multi_reduction <add>, %136, %cst_63 [1] : vector<16x128xf32> to vector<16xf32>
    %138 = vector.shape_cast %137 : vector<16xf32> to vector<16x1xf32>
    %cst_64 = arith.constant 1.280000e+02 : f32
    %139 = vector.broadcast %cst_64 : f32 to vector<16x1xf32>
    %140 = arith.divf %138, %139 : vector<16x1xf32>
    %cst_65 = arith.constant 9.99999974E-6 : f32
    %141 = vector.broadcast %cst_65 : f32 to vector<16x1xf32>
    %142 = arith.addf %140, %141 : vector<16x1xf32>
    %143 = math.rsqrt %142 : vector<16x1xf32>
    %144 = vector.broadcast %143 : vector<16x1xf32> to vector<16x128xf32>
    %145 = arith.mulf %135, %144 : vector<16x128xf32>
    %146 = vector.broadcast %128 : vector<1x128xf32> to vector<16x128xf32>
    %147 = arith.mulf %145, %146 : vector<16x128xf32>
    %148 = vector.broadcast %129 : vector<1x128xf32> to vector<16x128xf32>
    %149 = arith.addf %147, %148 : vector<16x128xf32>
    %c0_66 = arith.constant 0 : index
    %c0_67 = arith.constant 0 : index
    %c0_68 = arith.constant 0 : index
    %150 = vector.load %arg19[%c0_66, %c0_67, %c0_68] : memref<1x1x128xf32, #tpu.memory_space<vmem>>, vector<1x1x128xf32>
    %151 = vector.shape_cast %150 : vector<1x1x128xf32> to vector<1x128xf32>
    %c0_69 = arith.constant 0 : index
    %c0_70 = arith.constant 0 : index
    %c0_71 = arith.constant 0 : index
    %152 = vector.load %arg20[%c0_69, %c0_70, %c0_71] : memref<1x1x128xf32, #tpu.memory_space<vmem>>, vector<1x1x128xf32>
    %153 = vector.shape_cast %152 : vector<1x1x128xf32> to vector<1x128xf32>
    %cst_72 = arith.constant dense<0.000000e+00> : vector<16xf32>
    %154 = vector.multi_reduction <add>, %149, %cst_72 [1] : vector<16x128xf32> to vector<16xf32>
    %155 = vector.shape_cast %154 : vector<16xf32> to vector<16x1xf32>
    %cst_73 = arith.constant 1.280000e+02 : f32
    %156 = vector.broadcast %cst_73 : f32 to vector<16x1xf32>
    %157 = arith.divf %155, %156 : vector<16x1xf32>
    %158 = vector.broadcast %157 : vector<16x1xf32> to vector<16x128xf32>
    %159 = arith.subf %149, %158 : vector<16x128xf32>
    %160 = arith.mulf %159, %159 : vector<16x128xf32>
    %cst_74 = arith.constant dense<0.000000e+00> : vector<16xf32>
    %161 = vector.multi_reduction <add>, %160, %cst_74 [1] : vector<16x128xf32> to vector<16xf32>
    %162 = vector.shape_cast %161 : vector<16xf32> to vector<16x1xf32>
    %cst_75 = arith.constant 1.280000e+02 : f32
    %163 = vector.broadcast %cst_75 : f32 to vector<16x1xf32>
    %164 = arith.divf %162, %163 : vector<16x1xf32>
    %cst_76 = arith.constant 9.99999974E-6 : f32
    %165 = vector.broadcast %cst_76 : f32 to vector<16x1xf32>
    %166 = arith.addf %164, %165 : vector<16x1xf32>
    %167 = math.rsqrt %166 : vector<16x1xf32>
    %168 = vector.broadcast %167 : vector<16x1xf32> to vector<16x128xf32>
    %169 = arith.mulf %159, %168 : vector<16x128xf32>
    %170 = vector.broadcast %151 : vector<1x128xf32> to vector<16x128xf32>
    %171 = arith.mulf %169, %170 : vector<16x128xf32>
    %172 = vector.broadcast %153 : vector<1x128xf32> to vector<16x128xf32>
    %173 = arith.addf %171, %172 : vector<16x128xf32>
    %174 = arith.truncf %173 : vector<16x128xf32> to vector<16x128xbf16>
    %c0_77 = arith.constant 0 : index
    %c0_78 = arith.constant 0 : index
    %c0_79 = arith.constant 0 : index
    %175 = vector.load %arg15[%c0_77, %c0_78, %c0_79] : memref<1x128x128xbf16, #tpu.memory_space<vmem>>, vector<1x128x128xbf16>
    %176 = vector.shape_cast %175 : vector<1x128x128xbf16> to vector<128x128xbf16>
    %cst_80 = arith.constant dense<0.000000e+00> : vector<16x128xf32>
    %177 = tpu.matmul %174, %176, %cst_80 {dimension_numbers = #tpu.dot_dimension_numbers<[1], [0], [0], [1], [0, 0, 1, 1], [], []>} : vector<16x128xbf16>, vector<128x128xbf16>, vector<16x128xf32> -> vector<16x128xf32>
    %c0_81 = arith.constant 0 : index
    %c0_82 = arith.constant 0 : index
    %c0_83 = arith.constant 0 : index
    %178 = vector.load %arg16[%c0_81, %c0_82, %c0_83] : memref<1x1x128xf32, #tpu.memory_space<vmem>>, vector<1x1x128xf32>
    %179 = vector.shape_cast %178 : vector<1x1x128xf32> to vector<1x128xf32>
    %180 = vector.broadcast %179 : vector<1x128xf32> to vector<16x128xf32>
    %181 = arith.addf %177, %180 : vector<16x128xf32>
    %cst_84 = arith.constant 0.000000e+00 : f32
    %182 = vector.broadcast %cst_84 : f32 to vector<16x128xf32>
    %183 = arith.maximumf %181, %182 : vector<16x128xf32>
    %184 = arith.truncf %183 : vector<16x128xf32> to vector<16x128xbf16>
    %c0_85 = arith.constant 0 : index
    %c0_86 = arith.constant 0 : index
    %c0_87 = arith.constant 0 : index
    %185 = vector.load %arg17[%c0_85, %c0_86, %c0_87] : memref<1x128x128xbf16, #tpu.memory_space<vmem>>, vector<1x128x128xbf16>
    %186 = vector.shape_cast %185 : vector<1x128x128xbf16> to vector<128x128xbf16>
    %cst_88 = arith.constant dense<0.000000e+00> : vector<16x128xf32>
    %187 = tpu.matmul %184, %186, %cst_88 {dimension_numbers = #tpu.dot_dimension_numbers<[1], [0], [0], [1], [0, 0, 1, 1], [], []>} : vector<16x128xbf16>, vector<128x128xbf16>, vector<16x128xf32> -> vector<16x128xf32>
    %c0_89 = arith.constant 0 : index
    %c0_90 = arith.constant 0 : index
    %c0_91 = arith.constant 0 : index
    %188 = vector.load %arg18[%c0_89, %c0_90, %c0_91] : memref<1x1x128xf32, #tpu.memory_space<vmem>>, vector<1x1x128xf32>
    %189 = vector.shape_cast %188 : vector<1x1x128xf32> to vector<1x128xf32>
    %190 = vector.broadcast %189 : vector<1x128xf32> to vector<16x128xf32>
    %191 = arith.addf %187, %190 : vector<16x128xf32>
    %192 = arith.addf %149, %191 : vector<16x128xf32>
    %193 = vector.shape_cast %192 : vector<16x128xf32> to vector<1x16x128xf32>
    %c0_92 = arith.constant 0 : index
    %c0_93 = arith.constant 0 : index
    %c0_94 = arith.constant 0 : index
    %194 = vector.load %arg21[%c0_92, %c0_93, %c0_94] : memref<1x16x128xf32, #tpu.memory_space<vmem>>, vector<1x16x128xf32>
    tpu.vector_store %arg21[%c0_92, %c0_93, %c0_94], %193 {strides = array<i32>} : memref<1x16x128xf32, #tpu.memory_space<vmem>>, vector<1x16x128xf32>,
    return
  }
  func.func @transform_0(%arg0: i32, %arg1: memref<1xi32, #tpu.memory_space<smem>>) -> (i32, i32, i32) {
    %c0_i32 = arith.constant 0 : i32
    %c0_i32_0 = arith.constant 0 : i32
    %c0_i32_1 = arith.constant 0 : i32
    return %arg0, %c0_i32, %c0_i32_0 : i32, i32, i32
  }
  func.func @transform_1(%arg0: i32, %arg1: memref<1xi32, #tpu.memory_space<smem>>) -> (i32, i32) {
    %c0_i32 = arith.constant 0 : i32
    %c0_i32_0 = arith.constant 0 : i32
    %c0_i32_1 = arith.constant 0 : i32
    return %c0_i32, %c0_i32_0 : i32, i32
  }
  func.func @transform_2(%arg0: i32, %arg1: memref<1xi32, #tpu.memory_space<smem>>) -> (i32, i32) {
    %c0_i32 = arith.constant 0 : i32
    %c0_i32_0 = arith.constant 0 : i32
    %c0_i32_1 = arith.constant 0 : i32
    return %c0_i32, %c0_i32_0 : i32, i32
  }
  func.func @transform_3(%arg0: i32, %arg1: memref<1xi32, #tpu.memory_space<smem>>) -> (i32, i32) {
    %c0_i32 = arith.constant 0 : i32
    %c0_i32_0 = arith.constant 0 : i32
    %c0_i32_1 = arith.constant 0 : i32
    return %c0_i32, %c0_i32_0 : i32, i32
  }
  func.func @transform_4(%arg0: i32, %arg1: memref<1xi32, #tpu.memory_space<smem>>) -> (i32, i32) {
    %c0_i32 = arith.constant 0 : i32
    %c0_i32_0 = arith.constant 0 : i32
    %c0_i32_1 = arith.constant 0 : i32
    return %c0_i32, %c0_i32_0 : i32, i32
  }
  func.func @transform_5(%arg0: i32, %arg1: memref<1xi32, #tpu.memory_space<smem>>) -> (i32, i32) {
    %c0_i32 = arith.constant 0 : i32
    %c0_i32_0 = arith.constant 0 : i32
    %c0_i32_1 = arith.constant 0 : i32
    return %c0_i32, %c0_i32_0 : i32, i32
  }
  func.func @transform_6(%arg0: i32, %arg1: memref<1xi32, #tpu.memory_space<smem>>) -> (i32, i32) {
    %c0_i32 = arith.constant 0 : i32
    %c0_i32_0 = arith.constant 0 : i32
    %c0_i32_1 = arith.constant 0 : i32
    return %c0_i32, %c0_i32_0 : i32, i32
  }
  func.func @transform_7(%arg0: i32, %arg1: memref<1xi32, #tpu.memory_space<smem>>) -> (i32, i32) {
    %c0_i32 = arith.constant 0 : i32
    %c0_i32_0 = arith.constant 0 : i32
    %c0_i32_1 = arith.constant 0 : i32
    return %c0_i32, %c0_i32_0 : i32, i32
  }
  func.func @transform_8(%arg0: i32, %arg1: memref<1xi32, #tpu.memory_space<smem>>) -> (i32, i32) {
    %c0_i32 = arith.constant 0 : i32
    %c0_i32_0 = arith.constant 0 : i32
    %c0_i32_1 = arith.constant 0 : i32
    return %c0_i32, %c0_i32_0 : i32, i32
  }
  func.func @transform_9(%arg0: i32, %arg1: memref<1xi32, #tpu.memory_space<smem>>) -> (i32, i32) {
    %c0_i32 = arith.constant 0 : i32
    %c0_i32_0 = arith.constant 0 : i32
    %c0_i32_1 = arith.constant 0 : i32
    return %c0_i32, %c0_i32_0 : i32, i32
  }
  func.func @transform_10(%arg0: i32, %arg1: memref<1xi32, #tpu.memory_space<smem>>) -> (i32, i32) {
    %c0_i32 = arith.constant 0 : i32
    %c0_i32_0 = arith.constant 0 : i32
    %c0_i32_1 = arith.constant 0 : i32
    return %c0_i32, %c0_i32_0 : i32, i32
  }
  func.func @transform_11(%arg0: i32, %arg1: memref<1xi32, #tpu.memory_space<smem>>) -> (i32, i32) {
    %c0_i32 = arith.constant 0 : i32
    %c0_i32_0 = arith.constant 0 : i32
    %c0_i32_1 = arith.constant 0 : i32
    return %c0_i32, %c0_i32_0 : i32, i32
  }
  func.func @transform_12(%arg0: i32, %arg1: memref<1xi32, #tpu.memory_space<smem>>) -> (i32, i32) {
    %c0_i32 = arith.constant 0 : i32
    %c0_i32_0 = arith.constant 0 : i32
    %c0_i32_1 = arith.constant 0 : i32
    return %c0_i32, %c0_i32_0 : i32, i32
  }
  func.func @transform_13(%arg0: i32, %arg1: memref<1xi32, #tpu.memory_space<smem>>) -> (i32, i32, i32) {
    %c0 = arith.constant 0 : index
    %0 = memref.load %arg1[%c0] : memref<1xi32, #tpu.memory_space<smem>>
    %c0_i32 = arith.constant 0 : i32
    %c0_i32_0 = arith.constant 0 : i32
    %c0_i32_1 = arith.constant 0 : i32
    return %0, %c0_i32, %c0_i32_0 : i32, i32, i32
  }
  func.func @transform_14(%arg0: i32, %arg1: memref<1xi32, #tpu.memory_space<smem>>) -> (i32, i32, i32) {
    %c0 = arith.constant 0 : index
    %0 = memref.load %arg1[%c0] : memref<1xi32, #tpu.memory_space<smem>>
    %c0_i32 = arith.constant 0 : i32
    %c0_i32_0 = arith.constant 0 : i32
    %c0_i32_1 = arith.constant 0 : i32
    return %0, %c0_i32, %c0_i32_0 : i32, i32, i32
  }
  func.func @transform_15(%arg0: i32, %arg1: memref<1xi32, #tpu.memory_space<smem>>) -> (i32, i32, i32) {
    %c0 = arith.constant 0 : index
    %0 = memref.load %arg1[%c0] : memref<1xi32, #tpu.memory_space<smem>>
    %c0_i32 = arith.constant 0 : i32
    %c0_i32_0 = arith.constant 0 : i32
    %c0_i32_1 = arith.constant 0 : i32
    return %0, %c0_i32, %c0_i32_0 : i32, i32, i32
  }
  func.func @transform_16(%arg0: i32, %arg1: memref<1xi32, #tpu.memory_space<smem>>) -> (i32, i32, i32) {
    %c0 = arith.constant 0 : index
    %0 = memref.load %arg1[%c0] : memref<1xi32, #tpu.memory_space<smem>>
    %c0_i32 = arith.constant 0 : i32
    %c0_i32_0 = arith.constant 0 : i32
    %c0_i32_1 = arith.constant 0 : i32
    return %0, %c0_i32, %c0_i32_0 : i32, i32, i32
  }
  func.func @transform_17(%arg0: i32, %arg1: memref<1xi32, #tpu.memory_space<smem>>) -> (i32, i32, i32) {
    %c0 = arith.constant 0 : index
    %0 = memref.load %arg1[%c0] : memref<1xi32, #tpu.memory_space<smem>>
    %c0_i32 = arith.constant 0 : i32
    %c0_i32_0 = arith.constant 0 : i32
    %c0_i32_1 = arith.constant 0 : i32
    return %0, %c0_i32, %c0_i32_0 : i32, i32, i32
  }
  func.func @transform_18(%arg0: i32, %arg1: memref<1xi32, #tpu.memory_space<smem>>) -> (i32, i32, i32) {
    %c0 = arith.constant 0 : index
    %0 = memref.load %arg1[%c0] : memref<1xi32, #tpu.memory_space<smem>>
    %c0_i32 = arith.constant 0 : i32
    %c0_i32_0 = arith.constant 0 : i32
    %c0_i32_1 = arith.constant 0 : i32
    return %0, %c0_i32, %c0_i32_0 : i32, i32, i32
  }
  func.func @transform_19(%arg0: i32, %arg1: memref<1xi32, #tpu.memory_space<smem>>) -> (i32, i32, i32) {
    %c0_i32 = arith.constant 0 : i32
    %c0_i32_0 = arith.constant 0 : i32
    %c0_i32_1 = arith.constant 0 : i32
    return %arg0, %c0_i32, %c0_i32_0 : i32, i32, i32
  }
  func.func @transform_20(%arg0: i32, %arg1: memref<1xi32, #tpu.memory_space<smem>>) -> (i32, i32, i32) {
    %c0_i32 = arith.constant 0 : i32
    %c0_i32_0 = arith.constant 0 : i32
    %c0_i32_1 = arith.constant 0 : i32
    return %arg0, %c0_i32, %c0_i32_0 : i32, i32, i32
  }
}

</mosaic_0001>

<bundles_post_ra>
// kernel: tpu_custom_call.1
= control target key start
LH: loop header
LB: loop body
LE: loop exit
PB: predicated region body
PF: predicated region fallthrough
CT: control target
= control target key end

     0   :  { %s5790_s0 = inlined_call_operand.<no memory space> [shape: s32[1], index: 0, kind: input, shape index: {}]   ;;  %s5791_s1 = inlined_call_operand.hbm [shape: f32[2,16,128], index: 1, kind: input, shape index: {}]   ;;  %s5792_s2 = inlined_call_operand.hbm [shape: bf16[128,384], index: 2, kind: input, shape index: {}]   ;;  %s5793_s3 = inlined_call_operand.hbm [shape: f32[1,384], index: 3, kind: input, shape index: {}]   ;;  %s5794_s4 = inlined_call_operand.hbm [shape: bf16[128,128], index: 4, kind: input, shape index: {}]   ;;  %s5795_s5 = inlined_call_operand.hbm [shape: f32[1,128], index: 5, kind: input, shape index: {}]   ;;  %s5796_s6 = inlined_call_operand.hbm [shape: f32[1,128], index: 6, kind: input, shape index: {}]   ;;  %s5797_s7 = inlined_call_operand.hbm [shape: f32[1,128], index: 7, kind: input, shape index: {}]   ;;  %s5798_s8 = inlined_call_operand.hbm [shape: bf16[128,256], index: 8, kind: input, shape index: {}]   ;;  %s5799_s9 = inlined_call_operand.hbm [shape: f32[1,256], index: 9, kind: input, shape index: {}]   ;;  %s5800_s10 = inlined_call_operand.hbm [shape: bf16[256,128], index: 10, kind: input, shape index: {}]   ;;  %s5801_s11 = inlined_call_operand.hbm [shape: f32[1,128], index: 11, kind: input, shape index: {}]   ;;  %s5802_s12 = inlined_call_operand.hbm [shape: f32[1,128], index: 12, kind: input, shape index: {}]   ;;  %s5803_s13 = inlined_call_operand.hbm [shape: f32[1,128], index: 13, kind: input, shape index: {}]   ;;  %s5804_s14 = inlined_call_operand.hbm [shape: bf16[3,128,128], index: 14, kind: input, shape index: {}]   ;;  %s5805_s15 = inlined_call_operand.hbm [shape: f32[3,1,128], index: 15, kind: input, shape index: {}]   ;;  %s5806_s16 = inlined_call_operand.hbm [shape: bf16[3,128,128], index: 16, kind: input, shape index: {}]   ;;  %s5807_s17 = inlined_call_operand.hbm [shape: f32[3,1,128], index: 17, kind: input, shape index: {}]   ;;  %s5808_s18 = inlined_call_operand.hbm [shape: f32[3,1,128], index: 18, kind: input, shape index: {}]   ;;  %s5809_s19 = inlined_call_operand.hbm [shape: f32[3,1,128], index: 19, kind: input, shape index: {}]   ;;  %s5810_s20 = inlined_call_operand.hbm [shape: f32[2,16,128], index: 20, kind: output, shape index: {0}]   ;;  %s5811_s21 = inlined_call_operand.hbm [shape: bf16[2,16,128], index: 21, kind: output, shape index: {1}]  }
   0x1   :  { %5885 = sst [smem:[#allocation66_spill]] %s5790_s0 }
   0x2   :  { %5886 = sst [smem:[#allocation67_spill]] %s5791_s1  ;;  %s5907_s26 = sld [smem:[#allocation66_spill]] }
   0x3   :  { %5887 = sst [smem:[#allocation68_spill]] %s5792_s2 }
   0x4   :  { %5888 = sst [smem:[#allocation69_spill]] %s5793_s3 }
   0x5   :  { %5889 = sst [smem:[#allocation70_spill]] %s5794_s4 }
   0x6   :  { %5890 = sst [smem:[#allocation71_spill]] %s5795_s5 }
   0x7   :  { %5891 = sst [smem:[#allocation72_spill]] %s5796_s6 }
   0x8   :  { %5892 = sst [smem:[#allocation73_spill]] %s5797_s7 }
   0x9   :  { %5893 = sst [smem:[#allocation74_spill]] %s5798_s8 }
   0xa   :  { %5894 = sst [smem:[#allocation75_spill]] %s5799_s9 }
   0xb   :  { %5895 = sst [smem:[#allocation76_spill]] %s5800_s10 }
   0xc   :  { %5896 = sst [smem:[#allocation77_spill]] %s5801_s11 }
   0xd   :  { %5897 = sst [smem:[#allocation78_spill]] %s5802_s12 }
   0xe   :  { %5898 = sst [smem:[#allocation79_spill]] %s5803_s13 }
   0xf   :  { %5899 = sst [smem:[#allocation80_spill]] %s5804_s14 }
  0x10   :  { %5900 = sst [smem:[#allocation81_spill]] %s5805_s15 }
  0x11   :  { %5901 = sst [smem:[#allocation82_spill]] %s5806_s16 }
  0x12   :  { %5902 = sst [smem:[#allocation83_spill]] %s5807_s17 }
  0x13   :  { %5903 = sst [smem:[#allocation84_spill]] %s5808_s18 }
  0x14   :  { %5904 = sst [smem:[#allocation85_spill]] %s5809_s19 }
  0x15   :  { %5905 = sst [smem:[#allocation86_spill]] %s5810_s20 }
  0x16   :  { %5906 = sst [smem:[#allocation87_spill]] %s5811_s21 }
  0x17   :  { %27 = sst [smem:[#allocation4]] %s5907_s26 }
  0x18   :  { %28 = vsyncpa [#allocation6], 0 }
  0x19   :  { %30 = vsyncpa [#allocation6 + $0x1], 0 }
  0x1a   :  { %31 = vsyncpa [#allocation9], 0 }
  0x1b   :  { %32 = vsyncpa [#allocation12], 0 }
  0x1c   :  { %33 = vsyncpa [#allocation15], 0 }
  0x1d   :  { %34 = vsyncpa [#allocation18], 0 }
  0x1e   :  { %35 = vsyncpa [#allocation21], 0 }
  0x1f   :  { %36 = vsyncpa [#allocation24], 0 }
  0x20   :  { %37 = vsyncpa [#allocation27], 0 }
  0x21   :  { %38 = vsyncpa [#allocation30], 0 }
  0x22   :  { %39 = vsyncpa [#allocation33], 0 }
  0x23   :  { %40 = vsyncpa [#allocation7], 0 }
  0x24   :  { %42 = vsyncpa [#allocation7 + $0x1], 0 }
  0x25   :  { %43 = vsyncpa [#allocation37], 0 }
  0x26   :  { %45 = vsyncpa [#allocation37 + $0x1], 0  ;;  %s4710_s27 = smov 0   ;;  %s4712_s3 = smov 0  }
  0x27   :  { %s4714_s28 = smov 0   ;;  %s4716_s29 = smov 0  }
  0x28   :  { %s4718_s0 = smov 0   ;;  %s4720_s4 = smov 0  }
  0x29   :  { %s4722_s30 = smov 0   ;;  %s4724_s5 = smov 0  }
  0x2a   :  { %s4726_s22 = smov 0   ;;  %s4728_s23 = smov 0  }
  0x2b   :  { %s4730_s1 = smov 0   ;;  %s4732_s24 = smov 0  }
  0x2c   :  { %s4734_s2 = smov 0   ;;  %s4736_s25 = smov 0  }
  0x2d   :  { %s4738_s26 = smov 0   ;;  %s4740_s20 = smov 0  }
  0x2e LB: > { %5908 = sst [smem:[#allocation53_spill]] %s4499_s27  ;;  %s4791_s21 = sadd.s32 4294967295, %s4559_s20   ;;  %s4559_s20 = sphi %s4740_s20, %s5375_s20   ;;  %s4555_s26 = sphi %s4738_s26, %s6057_s26   ;;  %s4551_s25 = sphi %s4736_s25, %s6052_s25   ;;  %s4547_s2 = sphi %s4734_s2, %s6051_s2   ;;  %s4543_s24 = sphi %s4732_s24, %s5774_s24   ;;  %s4539_s1 = sphi %s4730_s1, %s6056_s1   ;;  %s4535_s23 = sphi %s4728_s23, %s5769_s23   ;;  %s4531_s22 = sphi %s4726_s22, %s6050_s22   ;;  %s4527_s5 = sphi %s4724_s5, %s5764_s5   ;;  %s4523_s30 = sphi %s4722_s30, %s6055_s30   ;;  %s4519_s4 = sphi %s4720_s4, %s5759_s4   ;;  %s4515_s0 = sphi %s4718_s0, %s6049_s0   ;;  %s4511_s29 = sphi %s4716_s29, %s5754_s29   ;;  %s4507_s28 = sphi %s4714_s28, %s6048_s28   ;;  %s4503_s3 = sphi %s4712_s3, %s5749_s3   ;;  %s4499_s27 = sphi %s4710_s27, %s6047_s27  }
  0x2f   : > { %5909 = sst [smem:[#allocation54_spill]] %s4503_s3  ;;  %s4793_s19 = sld [smem:[#allocation4]] }
  0x30   : > { %5910 = sst [smem:[#allocation55_spill]] %s4507_s28  ;;  %p5833_p0 = scmp.eq.s32.totalorder %s4791_s21, 0 }
  0x31   : > { %5911 = sst [smem:[#allocation56_spill]] %s4511_s29  ;;  %p2877_p1 = scmp.ge.s32.totalorder %s4559_s20, 1 }
  0x32   : > { %5912 = sst [smem:[#allocation57_spill]] %s4515_s0  ;;  %p554_p2 = scmp.lt.s32.totalorder %s4559_s20, 3 }
  0x33   : > { %5913 = sst [smem:[#allocation58_spill]] %s4519_s4  ;;  %s4562_s17 = smov [#allocation11]  }
  0x34   : > { %5914 = sst [smem:[#allocation59_spill]] %s4531_s22  ;;  %p4798_p3 = pnand %p2877_p1, %p554_p2 }
  0x35   : > { %5915 = sst [smem:[#allocation60_spill]] %s4535_s23  ;;  %s590_s15 = sshll.u32 %s4562_s17, 4  ;;  %s4817_s15 = int_to_ptr.vmem [resolvable:$true] %s590_s15 }
  0x36   : > { %5916 = sst [smem:[#allocation61_spill]] %s4547_s2  ;;  %p4804_p4 = pneg %p4798_p3 }
  0x37   : > { %5917 = sst [smem:[#allocation62_spill]] %s4551_s25  ;;  %s4561_s25 = smov [#allocation8]  }
  0x38   : > { %5918 = sst [smem:[#allocation63_spill]] %s4555_s26  ;;  %s566_s26 = sshll.u32 %s4561_s25, 4  ;;  %s567_s26 = int_to_ptr.vmem [resolvable:$true] %s566_s26 }
  0x39   : > { %5919 = sst [smem:[#allocation64_spill]] %s4559_s20  ;;  %p4813_p6 = pnand %p4804_p4, %p5833_p0 }
  0x3a   : > { %s5920_s2 = scalar_select %p4798_p3, 1, 0 }
  0x3b   : > { %s5922_s3 = scalar_select %p4804_p4, 1, 0 }
  0x3c   : > { %5921 = sst [smem:[#allocation65_spill]] %s5920_s2  ;;  %p4827_p8 = pneg %p4813_p6 }
  0x3d   : > { %s5923_s27 = scalar_select %p4813_p6, 1, 0 }
  0x3e   : > { %s5924_s4 = sld [smem:[#allocation68_spill]] }
  0x3f   : > { %s5926_s20 = scalar_select %p4827_p8, 1, 0 }
  0x44   : > { %s5925_s13 = smov %s5924_s4  ;;  %s3747_s0 = scalar_lea.hbm %s5924_s4, 3072 }
  0x45   : > { %p3748_p7 = scmp.ne.s32.totalorder %s5925_s13, %s3747_s0  ;;  %p3754_p11 = scmp.lt.u32.totalorder %s3747_s0, %s5925_s13 }
  0x47   : > { %p3750_p9 = pnand %p4827_p8, %p3748_p7 }
  0x49   : > { %p3751_p10 = pneg %p3750_p9 }
  0x4b   : > { %p3756_p12 = pnand %p3754_p11, %p3751_p10 }
  0x4d   : > { %3759 = shalt.err (!%p3756_p12)
}
  0x4e   : > { %s3760_s4 = scalar_lea.vmem %s567_s26, 3072  ;;  %p3768_p5 = scmp.lt.s32.totalorder %s567_s26, %s567_s26 }
  0x4f   : > { %p3761_p13 = scmp.ne.s32.totalorder %s567_s26, %s3760_s4  ;;  %p3769_p0 = scmp.lt.s32.totalorder %s3760_s4, %s3760_s4 }
  0x51   : > { %p3763_p1 = pnand %p3761_p13, %p4827_p8  ;;  %p3770_p3 = por %p3769_p0, %p3768_p5 }
  0x53   : > { %p3764_p2 = pneg %p3763_p1 }
  0x55   : > { %p3771_p4 = pnand %p3770_p3, %p3764_p2 }
  0x57   : > { %3774 = shalt.err (!%p3771_p4)
}
  0x58   : > { %s4563_s22 = smov 192   ;;  %s4564_s23 = smov 12  }
  0x59   : > { %3309 = dma.hbm_to_vmem [thread:$0]  (!%p4813_p6), %s5925_s13, 3072, %s567_s26, [#allocation9], %s4563_s22, %s4563_s22, %s4564_s23  }
  0x5a   : > { %s5927_s17 = sld [smem:[#allocation70_spill]] }
  0x60   : > { %s3775_s9 = scalar_lea.hbm %s5927_s17, 1024 }
  0x61   : > { %p3776_p7 = scmp.ne.s32.totalorder %s5927_s17, %s3775_s9  ;;  %p3782_p4 = scmp.lt.u32.totalorder %s3775_s9, %s5927_s17 }
  0x63   : > { %p3778_p0 = pnand %p3776_p7, %p4827_p8 }
  0x65   : > { %p3779_p3 = pneg %p3778_p0 }
  0x67   : > { %p3784_p5 = pnand %p3782_p4, %p3779_p3 }
  0x69   : > { %3787 = shalt.err (!%p3784_p5)
}
  0x6a   : > { %s3788_s26 = scalar_lea.vmem %s4817_s15, 1024  ;;  %p3796_p12 = scmp.lt.s32.totalorder %s4817_s15, %s4817_s15 }
  0x6b   : > { %p3789_p9 = scmp.ne.s32.totalorder %s4817_s15, %s3788_s26  ;;  %p3797_p13 = scmp.lt.s32.totalorder %s3788_s26, %s3788_s26 }
  0x6d   : > { %p3791_p10 = pnand %p3789_p9, %p4827_p8  ;;  %p3798_p1 = por %p3797_p13, %p3796_p12 }
  0x6f   : > { %p3792_p11 = pneg %p3791_p10 }
  0x71   : > { %p3799_p2 = pnand %p3798_p1, %p3792_p11 }
  0x73   : > { %3802 = shalt.err (!%p3799_p2)
}
  0x74   : > { %s5842_s7 = smov 64   ;;  %s5844_s9 = smov 4  }
  0x75   : > { %3315 = dma.hbm_to_vmem [thread:$0]  (!%p4813_p6), %s5927_s17, 1024, %s4817_s15, [#allocation12], %s5842_s7, %s5842_s7, %s5844_s9  }
  0x76   : > { %s4567_s22 = smov [#allocation14]   ;;  %s4568_s11 = smov [#allocation17]  }
  0x77   : > { %s615_s23 = sshll.u32 %s4567_s22, 4  ;;  %s636_s0 = sshll.u32 %s4568_s11, 4  ;;  %s616_s23 = int_to_ptr.vmem [resolvable:$true] %s615_s23  ;;  %s637_s0 = int_to_ptr.vmem [resolvable:$true] %s636_s0 }
  0x78   : > { %s5928_s6 = sld [smem:[#allocation72_spill]] }
  0x7e   : > { %s3803_s4 = scalar_lea.hbm %s5928_s6, 16 }
  0x7f   : > { %p3804_p7 = scmp.ne.s32.totalorder %s5928_s6, %s3803_s4  ;;  %p3810_p4 = scmp.lt.u32.totalorder %s3803_s4, %s5928_s6 }
  0x81   : > { %p3806_p0 = pnand %p3804_p7, %p4827_p8 }
  0x83   : > { %p3807_p3 = pneg %p3806_p0 }
  0x85   : > { %p3812_p5 = pnand %p3810_p4, %p3807_p3 }
  0x87   : > { %3815 = shalt.err (!%p3812_p5)
}
  0x88   : > { %s3816_s15 = scalar_lea.vmem %s616_s23, 16  ;;  %s3823_s18 = scalar_lea.vmem %s616_s23, 32 }
  0x89   : > { %p3817_p9 = scmp.ne.s32.totalorder %s616_s23, %s3816_s15  ;;  %p3824_p12 = scmp.lt.s32.totalorder %s616_s23, %s616_s23 }
  0x8a   : > { %p3825_p13 = scmp.lt.s32.totalorder %s3823_s18, %s3816_s15 }
  0x8b   : > { %p3819_p10 = pnand %p3817_p9, %p4827_p8 }
  0x8c   : > { %p3826_p1 = por %p3825_p13, %p3824_p12 }
  0x8d   : > { %p3820_p11 = pneg %p3819_p10 }
  0x8f   : > { %p3827_p2 = pnand %p3826_p1, %p3820_p11 }
  0x91   : > { %3830 = shalt.err (!%p3827_p2)
}
  0x92   : > { %3321 = dma.hbm_to_vmem [thread:$0]  (!%p4813_p6), %s5928_s6, 16, %s616_s23, [#allocation15]  }
  0x93   : > { %s5929_s8 = sld [smem:[#allocation74_spill]] }
  0x99   : > { %s3831_s22 = scalar_lea.hbm %s5929_s8, 2048 }
  0x9a   : > { %p3832_p7 = scmp.ne.s32.totalorder %s5929_s8, %s3831_s22  ;;  %p3838_p4 = scmp.lt.u32.totalorder %s3831_s22, %s5929_s8 }
  0x9c   : > { %p3834_p0 = pnand %p3832_p7, %p4827_p8 }
  0x9e   : > { %p3835_p3 = pneg %p3834_p0 }
  0xa0   : > { %p3840_p5 = pnand %p3838_p4, %p3835_p3 }
  0xa2   : > { %3843 = shalt.err (!%p3840_p5)
}
  0xa3   : > { %s3844_s26 = scalar_lea.vmem %s637_s0, 2048  ;;  %p3852_p12 = scmp.lt.s32.totalorder %s637_s0, %s637_s0 }
  0xa4   : > { %p3845_p9 = scmp.ne.s32.totalorder %s637_s0, %s3844_s26  ;;  %p3853_p13 = scmp.lt.s32.totalorder %s3844_s26, %s3844_s26 }
  0xa6   : > { %p3847_p10 = pnand %p3845_p9, %p4827_p8  ;;  %p3854_p1 = por %p3853_p13, %p3852_p12 }
  0xa8   : > { %p3848_p11 = pneg %p3847_p10 }
  0xaa   : > { %p3855_p2 = pnand %p3854_p1, %p3848_p11 }
  0xac   : > { %3858 = shalt.err (!%p3855_p2)
}
  0xad   : > { %s5863_s23 = smov 128   ;;  %s5858_s15 = smov 8  }
  0xae   : > { %3327 = dma.hbm_to_vmem [thread:$0]  (!%p4813_p6), %s5929_s8, 2048, %s637_s0, [#allocation18], %s5863_s23, %s5863_s23, %s5858_s15  }
  0xaf   : > { %s4571_s29 = smov [#allocation20]   ;;  %s4572_s28 = smov [#allocation23]  }
  0xb0   : > { %s660_s16 = sshll.u32 %s4571_s29, 4  ;;  %s685_s22 = sshll.u32 %s4572_s28, 4  ;;  %s661_s16 = int_to_ptr.vmem [resolvable:$true] %s660_s16  ;;  %s686_s22 = int_to_ptr.vmem [resolvable:$true] %s685_s22 }
  0xb1   : > { %s5930_s10 = sld [smem:[#allocation76_spill]] }
  0xb7   : > { %s3859_s25 = scalar_lea.hbm %s5930_s10, 2048 }
  0xb8   : > { %p3860_p7 = scmp.ne.s32.totalorder %s5930_s10, %s3859_s25  ;;  %p3866_p4 = scmp.lt.u32.totalorder %s3859_s25, %s5930_s10 }
  0xba   : > { %p3862_p0 = pnand %p3860_p7, %p4827_p8 }
  0xbc   : > { %p3863_p3 = pneg %p3862_p0 }
  0xbe   : > { %p3868_p5 = pnand %p3866_p4, %p3863_p3 }
  0xc0   : > { %3871 = shalt.err (!%p3868_p5)
}
  0xc1   : > { %s3872_s0 = scalar_lea.vmem %s661_s16, 2048  ;;  %p3880_p12 = scmp.lt.s32.totalorder %s661_s16, %s661_s16 }
  0xc2   : > { %p3873_p9 = scmp.ne.s32.totalorder %s661_s16, %s3872_s0  ;;  %p3881_p13 = scmp.lt.s32.totalorder %s3872_s0, %s3872_s0 }
  0xc4   : > { %p3875_p10 = pnand %p3873_p9, %p4827_p8  ;;  %p3882_p1 = por %p3881_p13, %p3880_p12 }
  0xc6   : > { %p3876_p11 = pneg %p3875_p10 }
  0xc8   : > { %p3883_p2 = pnand %p3882_p1, %p3876_p11 }
  0xca   : > { %3886 = shalt.err (!%p3883_p2)
}
  0xcb   : > { %s5931_s18 = smov 4   ;;  %s5932_s13 = smov 64  }
  0xcc   : > { %3333 = dma.hbm_to_vmem [thread:$0]  (!%p4813_p6), %s5930_s10, 2048, %s661_s16, [#allocation21], %s5932_s13, %s5932_s13, %s5931_s18  }
  0xcd   : > { %s5933_s12 = sld [smem:[#allocation78_spill]] }
  0xd3   : > { %s3887_s11 = scalar_lea.hbm %s5933_s12, 16 }
  0xd4   : > { %p3888_p7 = scmp.ne.s32.totalorder %s5933_s12, %s3887_s11  ;;  %p3894_p4 = scmp.lt.u32.totalorder %s3887_s11, %s5933_s12 }
  0xd6   : > { %p3890_p0 = pnand %p3888_p7, %p4827_p8 }
  0xd8   : > { %p3891_p3 = pneg %p3890_p0 }
  0xda   : > { %p3896_p5 = pnand %p3894_p4, %p3891_p3 }
  0xdc   : > { %3899 = shalt.err (!%p3896_p5)
}
  0xdd   : > { %s3900_s0 = scalar_lea.vmem %s686_s22, 16  ;;  %s3907_s16 = scalar_lea.vmem %s686_s22, 32 }
  0xde   : > { %p3901_p9 = scmp.ne.s32.totalorder %s686_s22, %s3900_s0  ;;  %p3908_p12 = scmp.lt.s32.totalorder %s686_s22, %s686_s22 }
  0xdf   : > { %p3909_p13 = scmp.lt.s32.totalorder %s3907_s16, %s3900_s0 }
  0xe0   : > { %p3903_p10 = pnand %p3901_p9, %p4827_p8 }
  0xe1   : > { %p3910_p1 = por %p3909_p13, %p3908_p12 }
  0xe2   : > { %p3904_p11 = pneg %p3903_p10 }
  0xe4   : > { %p3911_p2 = pnand %p3910_p1, %p3904_p11 }
  0xe6   : > { %3914 = shalt.err (!%p3911_p2)
}
  0xe7   : > { %3339 = dma.hbm_to_vmem [thread:$0]  (!%p4813_p6), %s5933_s12, 16, %s686_s22, [#allocation24]  }
  0xe8   : > { %s3026_s29 = sshll.u32 %s4793_s19, 10  ;;  %p351_p7 = scmp.ne.s32.totalorder %s4543_s24, %s4539_s1 }
  0xe9   : > { %s5934_s14 = sld [smem:[#allocation80_spill]]  ;;  %p5935_p0 = scmp.eq.s32.totalorder %s4791_s21, 0 }
  0xea   : > { %s4573_s4 = smov [#allocation26]   ;;  %p5937_p4 = scmp.ne.s32.totalorder %s5922_s3, 0 }
  0xeb   : > { %p4957_p3 = por %p351_p7, %p5935_p0  ;;  %s710_s22 = sshll.u32 %s4573_s4, 4  ;;  %s4961_s22 = int_to_ptr.vmem [resolvable:$true] %s710_s22 }
  0xec   : > { %s5938_s0 = sld [smem:[#allocation82_spill]] }
  0xed   : > { %s5936_s25 = scalar_select %p4957_p3, 1, 0 }
  0xee   : > { %p5846_p5 = pnand %p5937_p4, %p4957_p3 }
  0xef   : > { %s4953_s2 = scalar_lea.hbm %s5934_s14, %s3026_s29  ;;  %s3920_s1 = scalar_lea.hbm %s5934_s14, 3072 }
  0xf0   : > { %s3915_s9 = scalar_lea.hbm %s4953_s2, 1024  ;;  %p4981_p11 = pneg %p5846_p5 }
  0xf1   : > { %p3916_p10 = scmp.ne.s32.totalorder %s4953_s2, %s3915_s9  ;;  %p3921_p1 = scmp.lt.u32.totalorder %s4953_s2, %s5934_s14 }
  0xf2   : > { %s5939_s16 = smov %s5938_s0  ;;  %s4970_s7 = scalar_lea.hbm %s5938_s0, %s3026_s29 }
  0xf3   : > { %p3918_p12 = pnand %p4981_p11, %p3916_p10  ;;  %p3922_p2 = scmp.lt.u32.totalorder %s3920_s1, %s3915_s9 }
  0xf4   : > { %p3924_p0 = scmp.lt.u32.totalorder %s3915_s9, %s4953_s2 }
  0xf5   : > { %p3919_p13 = pneg %p3918_p12  ;;  %p3923_p7 = por %p3922_p2, %p3921_p1 }
  0xf7   : > { %p3925_p9 = por %p3924_p0, %p3923_p7 }
  0xf9   : > { %p3926_p5 = pnand %p3925_p9, %p3919_p13 }
  0xfb   : > { %3929 = shalt.err (!%p3926_p5)
}
  0xfc   : > { %s3930_s0 = scalar_lea.vmem %s4961_s22, 1024  ;;  %p3938_p8 = scmp.lt.s32.totalorder %s4961_s22, %s4961_s22 }
  0xfd   : > { %p3931_p10 = scmp.ne.s32.totalorder %s4961_s22, %s3930_s0  ;;  %p3939_p3 = scmp.lt.s32.totalorder %s3930_s0, %s3930_s0 }
  0xff   : > { %p3933_p12 = pnand %p3931_p10, %p4981_p11  ;;  %p3940_p4 = por %p3939_p3, %p3938_p8 }
 0x101   : > { %p3934_p6 = pneg %p3933_p12 }
 0x103   : > { %p3941_p1 = pnand %p3940_p4, %p3934_p6 }
 0x105   : > { %3944 = shalt.err (!%p3941_p1)
}
 0x106   : > { %p5941_p2 = scmp.ne.s32.totalorder %s5922_s3, 0  ;;  %p5942_p9 = scmp.ne.s32.totalorder %s5936_s25, 0 }
 0x107   : > { %p5944_p6 = scmp.eq.s32.totalorder %s4791_s21, 0  ;;  %p5945_p8 = scmp.ne.s32.totalorder %s4527_s5, %s4523_s30 }
 0x108   : > { %p5943_p5 = pnand %p5941_p2, %p5942_p9  ;;  %s4574_s28 = smov [#allocation29]  }
 0x109   : > { %p5016_p3 = por %p5945_p8, %p5944_p6  ;;  %s741_s11 = sshll.u32 %s4574_s28, 4  ;;  %s742_s11 = int_to_ptr.vmem [resolvable:$true] %s741_s11 }
 0x10a   : > { %3345 = dma.hbm_to_vmem [thread:$0]  (!%p5943_p5), %s4953_s2, 1024, %s4961_s22, [#allocation27], %s5932_s13, %s5932_s13, %s5931_s18  }
 0x10b   : > { %s5946_s9 = scalar_select %p5016_p3, 1, 0 }
 0x10c   : > { %p5854_p4 = pnand %p5941_p2, %p5016_p3  ;;  %s3945_s4 = scalar_lea.hbm %s4970_s7, 1024 }
 0x10d   : > { %p3946_p11 = scmp.ne.s32.totalorder %s4970_s7, %s3945_s4  ;;  %s3950_s1 = scalar_lea.hbm %s5939_s16, 3072 }
 0x10e   : > { %p5031_p13 = pneg %p5854_p4  ;;  %p3951_p10 = scmp.lt.u32.totalorder %s4970_s7, %s5939_s16 }
 0x10f   : > { %p3952_p12 = scmp.lt.u32.totalorder %s3950_s1, %s3945_s4  ;;  %p3954_p9 = scmp.lt.u32.totalorder %s3945_s4, %s4970_s7 }
 0x110   : > { %p3948_p7 = pnand %p5031_p13, %p3946_p11 }
 0x111   : > { %p3953_p1 = por %p3952_p12, %p3951_p10 }
 0x112   : > { %p3949_p0 = pneg %p3948_p7 }
 0x113   : > { %p3955_p5 = por %p3954_p9, %p3953_p1 }
 0x115   : > { %p3956_p6 = pnand %p3955_p5, %p3949_p0 }
 0x117   : > { %3959 = shalt.err (!%p3956_p6)
}
 0x118   : > { %s3960_s0 = scalar_lea.vmem %s742_s11, 1024  ;;  %p3968_p4 = scmp.lt.s32.totalorder %s742_s11, %s742_s11 }
 0x119   : > { %p3961_p8 = scmp.ne.s32.totalorder %s742_s11, %s3960_s0  ;;  %p3969_p3 = scmp.lt.s32.totalorder %s3960_s0, %s3960_s0 }
 0x11b   : > { %p3963_p11 = pnand %p3961_p8, %p5031_p13  ;;  %p3970_p2 = por %p3969_p3, %p3968_p4 }
 0x11d   : > { %p3964_p7 = pneg %p3963_p11 }
 0x11f   : > { %p3971_p10 = pnand %p3970_p2, %p3964_p7 }
 0x121   : > { %3974 = shalt.err (!%p3971_p10)
}
 0x122   : > { %p5948_p12 = scmp.ne.s32.totalorder %s5922_s3, 0  ;;  %p5949_p1 = scmp.ne.s32.totalorder %s5946_s9, 0 }
 0x123   : > { %s5951_s28 = sld [smem:[#allocation55_spill]]  ;;  %s5952_s4 = sld [smem:[#allocation56_spill]] }
 0x124   : > { %p5950_p9 = pnand %p5948_p12, %p5949_p1  ;;  %s5059_s2 = sshll.u32 %s4793_s19, 4 }
 0x125   : > { %s5953_s1 = sld [smem:[#allocation84_spill]]  ;;  %p5955_p2 = scmp.eq.s32.totalorder %s4791_s21, 0 }
 0x126   : > { %3351 = dma.hbm_to_vmem [thread:$0]  (!%p5950_p9), %s4970_s7, 1024, %s742_s11, [#allocation30], %s5932_s13, %s5932_s13, %s5931_s18  }
 0x127   : > { %s4575_s18 = smov [#allocation32]   ;;  %s4576_s19 = smov [#allocation10]  }
 0x128   : > { %s772_s13 = sshll.u32 %s4575_s18, 4  ;;  %s580_s7 = sshll.u32 %s4576_s19, 4  ;;  %s5073_s13 = int_to_ptr.vmem [resolvable:$true] %s772_s13  ;;  %s5079_s7 = int_to_ptr.vmem [resolvable:$true] %s580_s7 }
 0x129   : > { %p463_p13 = scmp.ne.s32.totalorder %s5952_s4, %s5951_s28  ;;  %s4577_s11 = smov [#allocation13]  }
 0x12a   : > { %s5081_s0 = sshll.u32 %s4577_s11, 4  ;;  %s605_s0 = int_to_ptr.vmem [resolvable:$true] %s5081_s0 }
 0x12b   : > { %s5954_s15 = smov %s5953_s1  ;;  %s5065_s29 = scalar_lea.hbm %s5953_s1, %s5059_s2 }
 0x12c   : > { %p5069_p3 = por %p463_p13, %p5955_p2  ;;  %s3975_s28 = scalar_lea.hbm %s5065_s29, 16 }
 0x12d   : > { %p3976_p0 = scmp.ne.s32.totalorder %s5065_s29, %s3975_s28  ;;  %s3980_s1 = scalar_lea.hbm %s5954_s15, 48 }
 0x12e   : > { %s5956_s26 = scalar_select %p5069_p3, 1, 0 }
 0x12f   : > { %p5859_p4 = pnand %p5948_p12, %p5069_p3  ;;  %p3981_p11 = scmp.lt.u32.totalorder %s5065_s29, %s5954_s15 }
 0x130   : > { %p3982_p7 = scmp.lt.u32.totalorder %s3980_s1, %s3975_s28  ;;  %p3984_p1 = scmp.lt.u32.totalorder %s3975_s28, %s5065_s29 }
 0x131   : > { %p5090_p5 = pneg %p5859_p4 }
 0x132   : > { %p3983_p10 = por %p3982_p7, %p3981_p11 }
 0x133   : > { %p3978_p6 = pnand %p5090_p5, %p3976_p0 }
 0x134   : > { %p3985_p9 = por %p3984_p1, %p3983_p10 }
 0x135   : > { %p3979_p8 = pneg %p3978_p6 }
 0x137   : > { %p3986_p13 = pnand %p3985_p9, %p3979_p8 }
 0x139   : > { %3989 = shalt.err (!%p3986_p13)
}
 0x13a   : > { %s3990_s11 = scalar_lea.vmem %s5073_s13, 16  ;;  %s3997_s30 = scalar_lea.vmem %s5073_s13, 32 }
 0x13b   : > { %p3991_p2 = scmp.ne.s32.totalorder %s5073_s13, %s3990_s11  ;;  %p3998_p4 = scmp.lt.s32.totalorder %s5073_s13, %s5073_s13 }
 0x13c   : > { %p3999_p3 = scmp.lt.s32.totalorder %s3997_s30, %s3990_s11 }
 0x13d   : > { %p3993_p0 = pnand %p3991_p2, %p5090_p5 }
 0x13e   : > { %p4000_p12 = por %p3999_p3, %p3998_p4 }
 0x13f   : > { %p3994_p6 = pneg %p3993_p0 }
 0x141   : > { %p4001_p11 = pnand %p4000_p12, %p3994_p6 }
 0x143   : > { %4004 = shalt.err (!%p4001_p11)
}
 0x144   : > { %p5958_p8 = scmp.ne.s32.totalorder %s5922_s3, 0  ;;  %p5959_p7 = scmp.ne.s32.totalorder %s5956_s26, 0 }
 0x145   : > { %s5961_s22 = sld [smem:[#allocation69_spill]]  ;;  %p5963_p3 = scmp.ne.s32.totalorder %s5926_s20, 0 }
 0x146   : > { %p5960_p10 = pnand %p5958_p8, %p5959_p7 }
 0x148   : > { %3357 = dma.hbm_to_vmem [thread:$0]  (!%p5960_p10), %s5065_s29, 16, %s5073_s13, [#allocation33]  }
 0x14b   : > { %s5962_s18 = smov %s5961_s22  ;;  %s4005_s1 = scalar_lea.hbm %s5961_s22, 48 }
 0x14c   : > { %p4006_p5 = scmp.ne.s32.totalorder %s5962_s18, %s4005_s1  ;;  %p4012_p1 = scmp.lt.u32.totalorder %s4005_s1, %s5962_s18 }
 0x14e   : > { %p4008_p12 = pnand %p4006_p5, %p5963_p3 }
 0x150   : > { %p4009_p4 = pneg %p4008_p12 }
 0x152   : > { %p4014_p9 = pnand %p4012_p1, %p4009_p4 }
 0x154   : > { %4017 = shalt.err (!%p4014_p9)
}
 0x155   : > { %s4018_s29 = scalar_lea.vmem %s5079_s7, 48  ;;  %s4025_s23 = scalar_lea.vmem %s5079_s7, 64 }
 0x156   : > { %p4019_p13 = scmp.ne.s32.totalorder %s5079_s7, %s4018_s29  ;;  %p4026_p6 = scmp.lt.s32.totalorder %s5079_s7, %s5079_s7 }
 0x157   : > { %p4027_p11 = scmp.lt.s32.totalorder %s4025_s23, %s4018_s29 }
 0x158   : > { %p4021_p2 = pnand %p4019_p13, %p5963_p3 }
 0x159   : > { %p4028_p7 = por %p4027_p11, %p4026_p6 }
 0x15a   : > { %p4022_p0 = pneg %p4021_p2 }
 0x15c   : > { %p4029_p10 = pnand %p4028_p7, %p4022_p0 }
 0x15e   : > { %4032 = shalt.err (!%p4029_p10)
}
 0x15f   : > { %p5964_p5 = scmp.ne.s32.totalorder %s5923_s27, 0  ;;  %s5965_s1 = sld [smem:[#allocation71_spill]] }
 0x161   : > { %3312 = dma.hbm_to_vmem [thread:$0]  (!%p5964_p5), %s5962_s18, 48, %s5079_s7, [#allocation9]  }
 0x165   : > { %s5966_s19 = smov %s5965_s1  ;;  %s4033_s11 = scalar_lea.hbm %s5965_s1, 16 }
 0x166   : > { %p4034_p12 = scmp.ne.s32.totalorder %s5966_s19, %s4033_s11  ;;  %p4040_p9 = scmp.lt.u32.totalorder %s4033_s11, %s5966_s19 }
 0x168   : > { %p4036_p4 = pnand %p4034_p12, %p5963_p3 }
 0x16a   : > { %p4037_p1 = pneg %p4036_p4 }
 0x16c   : > { %p4042_p13 = pnand %p4040_p9, %p4037_p1 }
 0x16e   : > { %4045 = shalt.err (!%p4042_p13)
}
 0x16f   : > { %s4046_s13 = scalar_lea.vmem %s605_s0, 16  ;;  %s4053_s7 = scalar_lea.vmem %s605_s0, 32 }
 0x170   : > { %p4047_p2 = scmp.ne.s32.totalorder %s605_s0, %s4046_s13  ;;  %p4054_p11 = scmp.lt.s32.totalorder %s605_s0, %s605_s0 }
 0x171   : > { %p4055_p7 = scmp.lt.s32.totalorder %s4053_s7, %s4046_s13 }
 0x172   : > { %p4049_p0 = pnand %p4047_p2, %p5963_p3 }
 0x173   : > { %p4056_p10 = por %p4055_p7, %p4054_p11 }
 0x174   : > { %p4050_p6 = pneg %p4049_p0 }
 0x176   : > { %p4057_p8 = pnand %p4056_p10, %p4050_p6 }
 0x178   : > { %4060 = shalt.err (!%p4057_p8)
}
 0x179   : > { %3318 = dma.hbm_to_vmem [thread:$0]  (!%p5964_p5), %s5966_s19, 16, %s605_s0, [#allocation12]  }
 0x17a   : > { %s4578_s4 = smov [#allocation16]   ;;  %s4579_s1 = smov [#allocation19]  }
 0x17b   : > { %s626_s22 = sshll.u32 %s4578_s4, 4  ;;  %s650_s11 = sshll.u32 %s4579_s1, 4  ;;  %s627_s22 = int_to_ptr.vmem [resolvable:$true] %s626_s22  ;;  %s651_s11 = int_to_ptr.vmem [resolvable:$true] %s650_s11 }
 0x17c   : > { %s5967_s23 = sld [smem:[#allocation73_spill]] }
 0x182   : > { %s5968_s8 = smov %s5967_s23  ;;  %s4061_s10 = scalar_lea.hbm %s5967_s23, 16 }
 0x183   : > { %p4062_p8 = scmp.ne.s32.totalorder %s5968_s8, %s4061_s10  ;;  %p4068_p1 = scmp.lt.u32.totalorder %s4061_s10, %s5968_s8 }
 0x185   : > { %p4064_p12 = pnand %p4062_p8, %p5963_p3 }
 0x187   : > { %p4065_p4 = pneg %p4064_p12 }
 0x189   : > { %p4070_p9 = pnand %p4068_p1, %p4065_p4 }
 0x18b   : > { %4073 = shalt.err (!%p4070_p9)
}
 0x18c   : > { %s4074_s0 = scalar_lea.vmem %s627_s22, 16  ;;  %s4081_s28 = scalar_lea.vmem %s627_s22, 32 }
 0x18d   : > { %p4075_p13 = scmp.ne.s32.totalorder %s627_s22, %s4074_s0  ;;  %p4082_p6 = scmp.lt.s32.totalorder %s627_s22, %s627_s22 }
 0x18e   : > { %p4083_p11 = scmp.lt.s32.totalorder %s4081_s28, %s4074_s0 }
 0x18f   : > { %p4077_p2 = pnand %p4075_p13, %p5963_p3 }
 0x190   : > { %p4084_p7 = por %p4083_p11, %p4082_p6 }
 0x191   : > { %p4078_p0 = pneg %p4077_p2 }
 0x193   : > { %p4085_p10 = pnand %p4084_p7, %p4078_p0 }
 0x195   : > { %4088 = shalt.err (!%p4085_p10)
}
 0x196   : > { %3324 = dma.hbm_to_vmem [thread:$0]  (!%p5964_p5), %s5968_s8, 16, %s627_s22, [#allocation15]  }
 0x197   : > { %s5969_s30 = sld [smem:[#allocation75_spill]] }
 0x19d   : > { %s5970_s13 = smov %s5969_s30  ;;  %s4089_s29 = scalar_lea.hbm %s5969_s30, 32 }
 0x19e   : > { %p4090_p8 = scmp.ne.s32.totalorder %s5970_s13, %s4089_s29  ;;  %p4096_p1 = scmp.lt.u32.totalorder %s4089_s29, %s5970_s13 }
 0x1a0   : > { %p4092_p12 = pnand %p4090_p8, %p5963_p3 }
 0x1a2   : > { %p4093_p4 = pneg %p4092_p12 }
 0x1a4   : > { %p4098_p9 = pnand %p4096_p1, %p4093_p4 }
 0x1a6   : > { %4101 = shalt.err (!%p4098_p9)
}
 0x1a7   : > { %s4102_s28 = scalar_lea.vmem %s651_s11, 32  ;;  %p4110_p6 = scmp.lt.s32.totalorder %s651_s11, %s651_s11 }
 0x1a8   : > { %p4103_p13 = scmp.ne.s32.totalorder %s651_s11, %s4102_s28  ;;  %p4111_p11 = scmp.lt.s32.totalorder %s4102_s28, %s4102_s28 }
 0x1aa   : > { %p4105_p2 = pnand %p4103_p13, %p5963_p3  ;;  %p4112_p7 = por %p4111_p11, %p4110_p6 }
 0x1ac   : > { %p4106_p0 = pneg %p4105_p2 }
 0x1ae   : > { %p4113_p10 = pnand %p4112_p7, %p4106_p0 }
 0x1b0   : > { %4116 = shalt.err (!%p4113_p10)
}
 0x1b1   : > { %3330 = dma.hbm_to_vmem [thread:$0]  (!%p5964_p5), %s5970_s13, 32, %s651_s11, [#allocation18]  }
 0x1b2   : > { %s4580_s1 = smov [#allocation22]   ;;  %s4581_s12 = smov [#allocation25]  }
 0x1b3   : > { %s674_s10 = sshll.u32 %s4580_s1, 4  ;;  %s696_s30 = sshll.u32 %s4581_s12, 4  ;;  %s675_s10 = int_to_ptr.vmem [resolvable:$true] %s674_s10  ;;  %s697_s30 = int_to_ptr.vmem [resolvable:$true] %s696_s30 }
 0x1b4   : > { %s5971_s7 = sld [smem:[#allocation77_spill]] }
 0x1ba   : > { %s4117_s6 = scalar_lea.hbm %s5971_s7, 16 }
 0x1bb   : > { %p4118_p8 = scmp.ne.s32.totalorder %s5971_s7, %s4117_s6  ;;  %p4124_p1 = scmp.lt.u32.totalorder %s4117_s6, %s5971_s7 }
 0x1bd   : > { %p4120_p12 = pnand %p4118_p8, %p5963_p3 }
 0x1bf   : > { %p4121_p4 = pneg %p4120_p12 }
 0x1c1   : > { %p4126_p9 = pnand %p4124_p1, %p4121_p4 }
 0x1c3   : > { %4129 = shalt.err (!%p4126_p9)
}
 0x1c4   : > { %s4130_s11 = scalar_lea.vmem %s675_s10, 16  ;;  %s4137_s4 = scalar_lea.vmem %s675_s10, 32 }
 0x1c5   : > { %p4131_p13 = scmp.ne.s32.totalorder %s675_s10, %s4130_s11  ;;  %p4138_p6 = scmp.lt.s32.totalorder %s675_s10, %s675_s10 }
 0x1c6   : > { %p4139_p11 = scmp.lt.s32.totalorder %s4137_s4, %s4130_s11 }
 0x1c7   : > { %p4133_p2 = pnand %p4131_p13, %p5963_p3 }
 0x1c8   : > { %p4140_p7 = por %p4139_p11, %p4138_p6 }
 0x1c9   : > { %p4134_p0 = pneg %p4133_p2 }
 0x1cb   : > { %p4141_p10 = pnand %p4140_p7, %p4134_p0 }
 0x1cd   : > { %4144 = shalt.err (!%p4141_p10)
}
 0x1ce   : > { %3336 = dma.hbm_to_vmem [thread:$0]  (!%p5964_p5), %s5971_s7, 16, %s675_s10, [#allocation21]  }
 0x1cf   : > { %s5972_s23 = sld [smem:[#allocation79_spill]] }
 0x1d5   : > { %s5973_s6 = smov %s5972_s23  ;;  %s4145_s0 = scalar_lea.hbm %s5972_s23, 16 }
 0x1d6   : > { %p4146_p8 = scmp.ne.s32.totalorder %s5973_s6, %s4145_s0  ;;  %p4152_p1 = scmp.lt.u32.totalorder %s4145_s0, %s5973_s6 }
 0x1d8   : > { %p4148_p12 = pnand %p4146_p8, %p5963_p3 }
 0x1da   : > { %p4149_p4 = pneg %p4148_p12 }
 0x1dc   : > { %p4154_p9 = pnand %p4152_p1, %p4149_p4 }
 0x1de   : > { %4157 = shalt.err (!%p4154_p9)
}
 0x1df   : > { %s4158_s1 = scalar_lea.vmem %s697_s30, 16  ;;  %s4165_s10 = scalar_lea.vmem %s697_s30, 32 }
 0x1e0   : > { %p4159_p13 = scmp.ne.s32.totalorder %s697_s30, %s4158_s1  ;;  %p4166_p6 = scmp.lt.s32.totalorder %s697_s30, %s697_s30 }
 0x1e1   : > { %p4167_p11 = scmp.lt.s32.totalorder %s4165_s10, %s4158_s1 }
 0x1e2   : > { %p4161_p2 = pnand %p4159_p13, %p5963_p3 }
 0x1e3   : > { %p4168_p7 = por %p4167_p11, %p4166_p6 }
 0x1e4   : > { %p4162_p0 = pneg %p4161_p2 }
 0x1e6   : > { %p4169_p10 = pnand %p4168_p7, %p4162_p0 }
 0x1e8   : > { %4172 = shalt.err (!%p4169_p10)
}
 0x1e9   : > { %s5974_s29 = sld [smem:[#allocation59_spill]]  ;;  %s5975_s23 = sld [smem:[#allocation60_spill]] }
 0x1ea   : > { %s5976_s0 = sld [smem:[#allocation57_spill]]  ;;  %s5977_s20 = sld [smem:[#allocation58_spill]] }
 0x1eb   : > { %3342 = dma.hbm_to_vmem [thread:$0]  (!%p5964_p5), %s5973_s6, 16, %s697_s30, [#allocation24]  }
 0x1ec   : > { %s5978_s11 = sld [smem:[#allocation81_spill]]  ;;  %s4582_s27 = smov [#allocation28]  }
 0x1ed   : > { %s727_s1 = sshll.u32 %s4582_s27, 4  ;;  %p5979_p8 = scmp.eq.s32.totalorder %s4791_s21, 0  ;;  %s728_s1 = int_to_ptr.vmem [resolvable:$true] %s727_s1 }
 0x1ee   : > { %p5981_p5 = scmp.ne.s32.totalorder %s5922_s3, 0  ;;  %s5982_s8 = sld [smem:[#allocation83_spill]] }
 0x1ef   : > { %p379_p3 = scmp.ne.s32.totalorder %s5975_s23, %s5974_s29 }
 0x1f1   : > { %p5243_p12 = por %p379_p3, %p5979_p8 }
 0x1f2   : > { %s5237_s4 = scalar_lea.hbm %s5978_s11, %s5059_s2  ;;  %s4178_s6 = scalar_lea.hbm %s5978_s11, 48 }
 0x1f3   : > { %s5980_s10 = scalar_select %p5243_p12, 1, 0 }
 0x1f4   : > { %p5868_p4 = pnand %p5981_p5, %p5243_p12  ;;  %s5257_s28 = scalar_lea.hbm %s5982_s8, %s5059_s2 }
 0x1f5   : > { %s4173_s29 = scalar_lea.hbm %s5237_s4, 16  ;;  %p4179_p6 = scmp.lt.u32.totalorder %s5237_s4, %s5978_s11 }
 0x1f6   : > { %p4174_p9 = scmp.ne.s32.totalorder %s5237_s4, %s4173_s29  ;;  %p5266_p13 = pneg %p5868_p4 }
 0x1f7   : > { %p4180_p11 = scmp.lt.u32.totalorder %s4178_s6, %s4173_s29  ;;  %p4182_p10 = scmp.lt.u32.totalorder %s4173_s29, %s5237_s4 }
 0x1f8   : > { %p4176_p2 = pnand %p5266_p13, %p4174_p9 }
 0x1f9   : > { %p4181_p7 = por %p4180_p11, %p4179_p6 }
 0x1fa   : > { %p4177_p0 = pneg %p4176_p2 }
 0x1fb   : > { %p4183_p3 = por %p4182_p10, %p4181_p7 }
 0x1fd   : > { %p4184_p8 = pnand %p4183_p3, %p4177_p0 }
 0x1ff   : > { %4187 = shalt.err (!%p4184_p8)
}
 0x200   : > { %s4188_s7 = scalar_lea.vmem %s728_s1, 16  ;;  %s4195_s13 = scalar_lea.vmem %s728_s1, 32 }
 0x201   : > { %p4189_p1 = scmp.ne.s32.totalorder %s728_s1, %s4188_s7  ;;  %p4196_p4 = scmp.lt.s32.totalorder %s728_s1, %s728_s1 }
 0x202   : > { %p4197_p12 = scmp.lt.s32.totalorder %s4195_s13, %s4188_s7 }
 0x203   : > { %p4191_p9 = pnand %p4189_p1, %p5266_p13 }
 0x204   : > { %p4198_p5 = por %p4197_p12, %p4196_p4 }
 0x205   : > { %p4192_p2 = pneg %p4191_p9 }
 0x207   : > { %p4199_p6 = pnand %p4198_p5, %p4192_p2 }
 0x209   : > { %4202 = shalt.err (!%p4199_p6)
}
 0x20a   : > { %p5984_p11 = scmp.ne.s32.totalorder %s5922_s3, 0  ;;  %p5985_p7 = scmp.ne.s32.totalorder %s5980_s10, 0 }
 0x20b   : > { %s5987_s6 = sld [smem:[#allocation53_spill]]  ;;  %s5988_s29 = sld [smem:[#allocation54_spill]] }
 0x20c   : > { %p5986_p10 = pnand %p5984_p11, %p5985_p7  ;;  %p5989_p12 = scmp.eq.s32.totalorder %s4791_s21, 0 }
 0x20d   : > { %p5990_p5 = scmp.ne.s32.totalorder %s5977_s20, %s5976_s0  ;;  %s4583_s7 = smov [#allocation31]  }
 0x20e   : > { %3348 = dma.hbm_to_vmem [thread:$0]  (!%p5986_p10), %s5237_s4, 16, %s728_s1, [#allocation27]  }
 0x20f   : > { %p5293_p4 = por %p5990_p5, %p5989_p12  ;;  %s758_s23 = sshll.u32 %s4583_s7, 4  ;;  %s759_s23 = int_to_ptr.vmem [resolvable:$true] %s758_s23 }
 0x210   : > { %s4203_s22 = scalar_lea.hbm %s5257_s28, 16  ;;  %s4208_s1 = scalar_lea.hbm %s5982_s8, 48 }
 0x211   : > { %s5991_s13 = scalar_select %p5293_p4, 1, 0 }
 0x212   : > { %p5872_p1 = pnand %p5984_p11, %p5293_p4  ;;  %p4204_p0 = scmp.ne.s32.totalorder %s5257_s28, %s4203_s22 }
 0x213   : > { %p4209_p2 = scmp.lt.u32.totalorder %s5257_s28, %s5982_s8  ;;  %p4210_p6 = scmp.lt.u32.totalorder %s4208_s1, %s4203_s22 }
 0x214   : > { %p5310_p3 = pneg %p5872_p1  ;;  %p4212_p10 = scmp.lt.u32.totalorder %s4203_s22, %s5257_s28 }
 0x215   : > { %p4211_p7 = por %p4210_p6, %p4209_p2 }
 0x216   : > { %p4206_p8 = pnand %p5310_p3, %p4204_p0 }
 0x217   : > { %p4213_p12 = por %p4212_p10, %p4211_p7 }
 0x218   : > { %p4207_p9 = pneg %p4206_p8 }
 0x21a   : > { %p4214_p5 = pnand %p4213_p12, %p4207_p9 }
 0x21c   : > { %4217 = shalt.err (!%p4214_p5)
}
 0x21d   : > { %s4218_s12 = scalar_lea.vmem %s759_s23, 16  ;;  %s4225_s7 = scalar_lea.vmem %s759_s23, 32 }
 0x21e   : > { %p4219_p13 = scmp.ne.s32.totalorder %s759_s23, %s4218_s12  ;;  %p4226_p1 = scmp.lt.s32.totalorder %s759_s23, %s759_s23 }
 0x21f   : > { %p4227_p4 = scmp.lt.s32.totalorder %s4225_s7, %s4218_s12 }
 0x220   : > { %p4221_p0 = pnand %p4219_p13, %p5310_p3 }
 0x221   : > { %p4228_p11 = por %p4227_p4, %p4226_p1 }
 0x222   : > { %p4222_p8 = pneg %p4221_p0 }
 0x224   : > { %p4229_p2 = pnand %p4228_p11, %p4222_p8 }
 0x226   : > { %4232 = shalt.err (!%p4229_p2)
}
 0x227   : > { %p5993_p6 = scmp.ne.s32.totalorder %s5922_s3, 0  ;;  %p5994_p7 = scmp.ne.s32.totalorder %s5991_s13, 0 }
 0x228   : > { %p5996_p13 = scmp.eq.s32.totalorder %s4791_s21, 0  ;;  %p5997_p3 = scmp.ne.s32.totalorder %s5988_s29, %s5987_s6 }
 0x229   : > { %p5995_p10 = pnand %p5993_p6, %p5994_p7  ;;  %s5999_s4 = sld [smem:[#allocation85_spill]] }
 0x22a   : > { %p5337_p9 = por %p5997_p3, %p5996_p13  ;;  %s4584_s27 = smov [#allocation34]  }
 0x22b   : > { %3354 = dma.hbm_to_vmem [thread:$0]  (!%p5995_p10), %s5257_s28, 16, %s759_s23, [#allocation30]  }
 0x22c   : > { %s5998_s22 = scalar_select %p5337_p9, 1, 0 }
 0x22d   : > { %s786_s30 = sshll.u32 %s4584_s27, 4  ;;  %p5876_p11 = pnand %p5993_p6, %p5337_p9  ;;  %s787_s30 = int_to_ptr.vmem [resolvable:$true] %s786_s30 }
 0x22f   : > { %s6000_s12 = smov %s5999_s4  ;;  %s784_s1 = scalar_lea.hbm %s5999_s4, %s5059_s2 }
 0x230   : > { %s4233_s7 = scalar_lea.hbm %s784_s1, 16  ;;  %p5354_p1 = pneg %p5876_p11 }
 0x231   : > { %p4234_p4 = scmp.ne.s32.totalorder %s784_s1, %s4233_s7  ;;  %s4238_s29 = scalar_lea.hbm %s6000_s12, 48 }
 0x232   : > { %p4239_p0 = scmp.lt.u32.totalorder %s784_s1, %s6000_s12  ;;  %p4240_p8 = scmp.lt.u32.totalorder %s4238_s29, %s4233_s7 }
 0x233   : > { %p4236_p12 = pnand %p5354_p1, %p4234_p4  ;;  %p4242_p7 = scmp.lt.u32.totalorder %s4233_s7, %s784_s1 }
 0x234   : > { %p4241_p2 = por %p4240_p8, %p4239_p0 }
 0x235   : > { %p4237_p5 = pneg %p4236_p12 }
 0x236   : > { %p4243_p10 = por %p4242_p7, %p4241_p2 }
 0x238   : > { %p4244_p13 = pnand %p4243_p10, %p4237_p5 }
 0x23a   : > { %4247 = shalt.err (!%p4244_p13)
}
 0x23b   : > { %s4248_s20 = scalar_lea.vmem %s787_s30, 16  ;;  %s4255_s4 = scalar_lea.vmem %s787_s30, 32 }
 0x23c   : > { %p4249_p3 = scmp.ne.s32.totalorder %s787_s30, %s4248_s20  ;;  %p4256_p11 = scmp.lt.s32.totalorder %s787_s30, %s787_s30 }
 0x23d   : > { %p4257_p9 = scmp.lt.s32.totalorder %s4255_s4, %s4248_s20 }
 0x23e   : > { %p4251_p4 = pnand %p4249_p3, %p5354_p1 }
 0x23f   : > { %p4258_p6 = por %p4257_p9, %p4256_p11 }
 0x240   : > { %p4252_p12 = pneg %p4251_p4 }
 0x242   : > { %p4259_p0 = pnand %p4258_p6, %p4252_p12 }
 0x244   : > { %4262 = shalt.err (!%p4259_p0)
}
 0x245   : > { %p6002_p8 = scmp.ne.s32.totalorder %s5922_s3, 0  ;;  %p6003_p2 = scmp.ne.s32.totalorder %s5998_s22, 0 }
 0x246   : > { %s6005_s27 = sld [smem:[#allocation64_spill]]  ;;  %s6006_s7 = sld [smem:[#allocation63_spill]] }
 0x247   : > { %p6004_p7 = pnand %p6002_p8, %p6003_p2  ;;  %s6007_s2 = sld [smem:[#allocation62_spill]] }
 0x248   : > { %s6008_s28 = sld [smem:[#allocation61_spill]]  ;;  %p515_p5 = scmp.eq.s32.totalorder %s4791_s21, 1 }
 0x249   : > { %3360 = dma.hbm_to_vmem [thread:$0]  (!%p6004_p7), %s784_s1, 16, %s787_s30, [#allocation33]  }
 0x24a   : > { %p6009_p13 = scmp.eq.s32.totalorder %s4791_s21, 0  ;;  %s6013_s8 = sld [smem:[#allocation67_spill]] }
 0x24c   : > { %s2876_s6 = sadd.s32 4294967294, %s6005_s27   ;;  %s5375_s20 = sadd.s32 1, %s6005_s27  }
 0x24d   : > { %s58_s3 = sadd.s32 1, %s6006_s7  ;;  %s55_s29 = ssub.s32 %s6005_s27, %s5375_s20 }
 0x24e   : > { %p65_p6 = scmp.ne.s32.totalorder %s6006_s7, %s6007_s2  ;;  %p56_p9 = scmp.eq.s32.totalorder %s55_s29, 0 }
 0x24f   : > { %p66_p11 = scmp.eq.s32.totalorder %s6005_s27, 0  ;;  %p71_p1 = scmp.ne.s32.totalorder %s6007_s2, %s6008_s28 }
 0x250   : > { %s5387_s23 = scalar_select %p56_p9, %s6006_s7, %s58_s3  }
 0x251   : > { %p67_p10 = por %p66_p11, %p65_p6  ;;  %p5391_p3 = por %p6009_p13, %p71_p1 }
 0x252   : > { %p5395_p4 = por %p515_p5, %p65_p6  ;;  %p521_p12 = scmp.eq.s32.totalorder %s2876_s6, 1 }
 0x253   : > { %p3384_p0 = scmp.lt.s32.totalorder %s6005_s27, 2  ;;  %s797_s30 = sand.u32 1, %s6006_s7  }
 0x254   : > { %s6011_s1 = scalar_select %p5395_p4, 1, 0 }
 0x255   : > { %p5401_p8 = por %p521_p12, %p71_p1  ;;  %s2899_s2 = sshll.u32 %s797_s30, 4 }
 0x256   : > { %s3028_s28 = sshll.u32 %s6005_s27, 8  ;;  %s801_s12 = scalar_lea.vmem [#allocation5], %s2899_s2 }
 0x257   : > { %s6012_s4 = scalar_select %p5401_p8, 1, 0 }
 0x258   : > { %s5409_s11 = scalar_lea.hbm %s6013_s8, %s3028_s28  ;;  %s808_s14 = sshll.u32 %s801_s12, 4  ;;  %s5415_s14 = int_to_ptr.vmem [resolvable:$true] %s808_s14 }
 0x259   : > { %p5411_p2 = pnand %p3384_p0, %p67_p10  ;;  %s5417_s27 = scalar_lea.sflag [#allocation6], %s797_s30 }
 0x25a   : > { %s4263_s7 = scalar_lea.hbm %s5409_s11, 256  ;;  %s4268_s28 = scalar_lea.hbm %s6013_s8, 512 }
 0x25b   : > { %p4264_p7 = scmp.ne.s32.totalorder %s5409_s11, %s4263_s7  ;;  %p4265_p6 = pneg %p5411_p2 }
 0x25c   : > { %p4269_p1 = scmp.lt.u32.totalorder %s5409_s11, %s6013_s8  ;;  %p4270_p5 = scmp.lt.u32.totalorder %s4268_s28, %s4263_s7 }
 0x25d   : > { %p4266_p9 = pnand %p4265_p6, %p4264_p7  ;;  %p4272_p13 = scmp.lt.u32.totalorder %s4263_s7, %s5409_s11 }
 0x25e   : > { %p4271_p10 = por %p4270_p5, %p4269_p1 }
 0x25f   : > { %p4267_p11 = pneg %p4266_p9 }
 0x260   : > { %p4273_p12 = por %p4272_p13, %p4271_p10 }
 0x262   : > { %p4274_p0 = pnand %p4273_p12, %p4267_p11 }
 0x264   : > { %4277 = shalt.err (!%p4274_p0)
}
 0x265   : > { %s4278_s30 = scalar_lea.vmem %s5415_s14, 256  ;;  %s4585_s2 = smov [#allocation5]  }
 0x266   : > { %p4279_p7 = scmp.ne.s32.totalorder %s5415_s14, %s4278_s30  ;;  %s4283_s12 = sshll.u32 %s4585_s2, 4  ;;  %s4284_s12 = int_to_ptr.vmem [resolvable:$false] %s4283_s12 }
 0x267   : > { %s4285_s3 = scalar_lea.vmem %s4284_s12, 512  ;;  %p4286_p4 = scmp.lt.s32.totalorder %s5415_s14, %s4284_s12 }
 0x268   : > { %p4281_p9 = pnand %p4279_p7, %p4265_p6  ;;  %p4287_p1 = scmp.lt.s32.totalorder %s4285_s3, %s4278_s30 }
 0x26a   : > { %p4282_p8 = pneg %p4281_p9  ;;  %p4288_p5 = por %p4287_p1, %p4286_p4 }
 0x26c   : > { %p4289_p10 = pnand %p4288_p5, %p4282_p8 }
 0x26e   : > { %4292 = shalt.err (!%p4289_p10)
}
 0x26f   : > { %s6015_s7 = smov 8   ;;  %s6016_s28 = smov 128  }
 0x270   : > { %3364 = dma.hbm_to_vmem [thread:$0]  (!%p5411_p2), %s5409_s11, 256, %s5415_s14, %s5417_s27, %s6016_s28, %s6016_s28, %s6015_s7  }
 0x271   : > { %s6017_s29 = sld [smem:[#allocation65_spill]] }
 0x277   : > { %p6018_p6 = scmp.ne.s32.totalorder %s6017_s29, 0 }
 0x278   : > { %s6019_s2 = sld [smem:[#allocation62_spill]] (!%p6018_p6) }
 0x279   : > { %820 = sbr.rel (%p6018_p6) target bundleno = 4433 (0x1151), region = 96 }
 0x27e   : > { %s5451_s8 = sand.u32 (!%p6018_p6), 1, %s6019_s2  }
 0x27f   : > { %s2903_s30 = sshll.u32 (!%p6018_p6), %s5451_s8, 4  ;;  %s823_s12 = scalar_lea.sflag (!%p6018_p6), [#allocation6], %s5451_s8 }
 0x280   : > { %s5457_s6 = scalar_lea.vmem [#allocation5], %s2903_s30 }
 0x281   : > { %4438 = dma.done.wait (%p5391_p3), %s823_s12, 256  }
 0x282   : > { %4440 = vsyncadd (%p5391_p3), %s823_s12, 4294967040  ;;  %p6020_p4 = scmp.eq.s32.totalorder %s4791_s21, 0 }
 0x284   : > { %4442 = dma.done.wait (%p6020_p4), [#allocation9], 3120   ;;  %p6021_p8 = pmov %p6020_p4 }
 0x285   : > { %p6022_p2 = pmov %p6020_p4 }
 0x286   : > { %4444 = vsyncadd (%p6021_p8), [#allocation9], 4294964176 }
 0x287   : > { %4446 = dma.done.wait (%p6022_p2), [#allocation12], 1040   ;;  %p6023_p11 = pmov %p6022_p2 }
 0x288   : > { %p6024_p13 = pmov %p6022_p2 }
 0x289   : > { %4448 = vsyncadd (%p6023_p11), [#allocation12], 4294966256 }
 0x28a   : > { %4450 = dma.done.wait (%p6024_p13), [#allocation15], 32   ;;  %p6025_p12 = pmov %p6022_p2 }
 0x28b   : > { %p6026_p3 = pmov %p6022_p2 }
 0x28c   : > { %4452 = vsyncadd (%p6025_p12), [#allocation15], 4294967264 }
 0x28d   : > { %4454 = dma.done.wait (%p6026_p3), [#allocation18], 2080   ;;  %p6027_p0 = pmov %p6022_p2 }
 0x28f   : > { %4456 = vsyncadd (%p6027_p0), [#allocation18], 4294965216  ;;  %p6028_p7 = pmov %p6027_p0 }
 0x290   : > { %p6029_p9 = pmov %p6027_p0 }
 0x291   : > { %4458 = dma.done.wait (%p6028_p7), [#allocation21], 2064  }
 0x292   : > { %4460 = vsyncadd (%p6029_p9), [#allocation21], 4294965232  ;;  %p6030_p1 = pmov %p6027_p0 }
 0x293   : > { %p6031_p5 = pmov %p6027_p0 }
 0x294   : > { %4462 = dma.done.wait (%p6030_p1), [#allocation24], 32  }
 0x295   : > { %4464 = vsyncadd (%p6031_p5), [#allocation24], 4294967264  ;;  %p6032_p10 = scmp.ne.s32.totalorder %s5936_s25, 0 }
 0x297   : > { %4466 = dma.done.wait (%p6032_p10), [#allocation27], 1024  }
 0x298   : > { %4468 = vsyncadd (%p6032_p10), [#allocation27], 4294966272  ;;  %p6033_p6 = scmp.ne.s32.totalorder %s5980_s10, 0 }
 0x29a   : > { %4470 = dma.done.wait (%p6033_p6), [#allocation27], 16  }
 0x29b   : > { %4472 = vsyncadd (%p6033_p6), [#allocation27], 4294967280  ;;  %p6034_p4 = scmp.ne.s32.totalorder %s5946_s9, 0 }
 0x29d   : > { %4474 = dma.done.wait (%p6034_p4), [#allocation30], 1024  }
 0x29e   : > { %4476 = vsyncadd (%p6034_p4), [#allocation30], 4294966272  ;;  %p6035_p8 = scmp.ne.s32.totalorder %s5991_s13, 0 }
 0x2a0   : > { %4478 = dma.done.wait (%p6035_p8), [#allocation30], 16  }
 0x2a1   : > { %4480 = vsyncadd (%p6035_p8), [#allocation30], 4294967280  ;;  %p6036_p2 = scmp.ne.s32.totalorder %s5956_s26, 0 }
 0x2a3   : > { %4482 = dma.done.wait (%p6036_p2), [#allocation33], 16  }
 0x2a4   : > { %4484 = vsyncadd (%p6036_p2), [#allocation33], 4294967280  ;;  %p6037_p11 = scmp.ne.s32.totalorder %s5998_s22, 0 }
 0x2a6   : > { %4486 = dma.done.wait (%p6037_p11), [#allocation33], 16  }
 0x2a7   : > { %4488 = vsyncadd (%p6037_p11), [#allocation33], 4294967280  ;;  %v4586_v0 = vmov 0   ;;  %v4587_v1 = vmov 0.0   ;;  %v3607_v2 = vld [vmem:[#allocation8 + $0x4] ss:$12 sps:$4 sm:$0xff]   ;;  %v1004_v29 = vlaneseq }
 0x2a8   : > { %1179 = vmatprep.mubr.bf16.mxu0 %v4586_v0  ;;  %3112 = vmatprep.subr.bf16.mxu1 %v4587_v1  ;;  %v3609_v3 = vld [vmem:[#allocation8] ss:$12 sps:$4 sm:$0xff]   ;;  %v3610_v4 = vld [vmem:[#allocation8 + $0x1c] ss:$12 sps:$4 sm:$0xff]   ;;  %v3612_v5 = vld [vmem:[#allocation8 + $0x18] ss:$12 sps:$4 sm:$0xff]  }
 0x2a9   : > { %1147 = vmatprep.subr.bf16.mxu0 %v3607_v2  ;;  %v3613_v6 = vld [vmem:[#allocation8 + $0x34] ss:$12 sps:$4 sm:$0xff]   ;;  %v3615_v7 = vld [vmem:[#allocation8 + $0x30] ss:$12 sps:$4 sm:$0xff]   ;;  %v3616_v8 = vld [vmem:[#allocation8 + $0x4c] ss:$12 sps:$4 sm:$0xff]  }
 0x2aa   : > { %1148 = vmatpush1.bf16.msra.mxu0 %v3609_v3  ;;  %v3618_v9 = vld [vmem:[#allocation8 + $0x48] ss:$12 sps:$4 sm:$0xff]   ;;  %v3619_v10 = vld [vmem:[#allocation8 + $0x64] ss:$12 sps:$4 sm:$0xff]   ;;  %v3632_v12 = vld [vmem:[#allocation8 + $0x20] ss:$12 sps:$4 sm:$0xff]  }
 0x2ab   : > { %1149 = vmatprep.subr.bf16.mxu0 %v3610_v4  ;;  %v3631_v11 = vld [vmem:[#allocation8 + $0x8] ss:$12 sps:$4 sm:$0xff]   ;;  %v3621_v13 = vld [vmem:[#allocation8 + $0x60] ss:$12 sps:$4 sm:$0xff]   ;;  %v3624_v15 = vld [vmem:[#allocation8 + $0x78] ss:$12 sps:$4 sm:$0xff]  }
 0x2ac   : > { %3113 = vmatpush3.bf16.msra.mxu1 %v3631_v11  ;;  %v3622_v14 = vld [vmem:[#allocation8 + $0x7c] ss:$12 sps:$4 sm:$0xff]   ;;  %v3625_v16 = vld [vmem:[#allocation8 + $0x94] ss:$12 sps:$4 sm:$0xff]   ;;  %v3633_v17 = vld [vmem:[#allocation8 + $0x38] ss:$12 sps:$4 sm:$0xff]  }
 0x2ad   : > { %3114 = vmatprep.subr.bf16.mxu1 %v4587_v1  ;;  %v3634_v18 = vld [vmem:[#allocation8 + $0x50] ss:$12 sps:$4 sm:$0xff]   ;;  %v3628_v20 = vld [vmem:[#allocation8 + $0xac] ss:$12 sps:$4 sm:$0xff]   ;;  %v3635_v21 = vld [vmem:[#allocation8 + $0x68] ss:$12 sps:$4 sm:$0xff]  }
 0x2ae   : > { %1150 = vmatpush1.bf16.msra.mxu0 %v3612_v5  ;;  %v3627_v19 = vld [vmem:[#allocation8 + $0x90] ss:$12 sps:$4 sm:$0xff]   ;;  %v3630_v22 = vld [vmem:[#allocation8 + $0xa8] ss:$12 sps:$4 sm:$0xff]   ;;  %v3636_v25 = vld [vmem:[#allocation8 + $0x80] ss:$12 sps:$4 sm:$0xff]  }
 0x2af   : > { %1151 = vmatprep.subr.bf16.mxu0 %v3613_v6  ;;  %v5517_v23 = vld [vmem:[%s5457_s6] sm:$0xff]  ;;  %v5520_v24 = vld [vmem:[%s5457_s6 + $0x8] sm:$0xff]  ;;  %vm4588_vm0 = vmmov 0   ;;  %v5536_v30 = vshrl.u32 %v1004_v29, 7  ;;  %vm1234_vm1 = vcmask 261120   ;;  %vm1282_vm2 = vcmask 130048  }
 0x2b0   : > { %3115 = vmatpush3.bf16.msra.mxu1 %v3632_v12  ;;  %v969_v26 = vpack.c.bf16 %v5520_v24, %v5517_v23  ;;  %v3637_v27 = vld [vmem:[#allocation8 + $0x98] ss:$12 sps:$4 sm:$0xff]   ;;  %v3638_v28 = vld [vmem:[#allocation8 + $0xb0] ss:$12 sps:$4 sm:$0xff]   ;;  %3128 = vmatprep.mubr.msk.bf16.mxu1 %vm4588_vm0, %v4587_v1  ;;  %v1002_v32 = vld [vmem:[#allocation10] sm:$0x7] }
 0x2b1   : > { %3116 = vmatprep.subr.bf16.mxu1 %v4587_v1  ;;  %v1006_v31 = vsub.s32 0, %v5536_v30  ;;  %v1010_v33 = vsub.s32 1, %v5536_v30  ;;  %v1014_v47 = vsub.s32 2, %v5536_v30  ;;  %s4589_s14 = smov 96   ;;  %s4590_s25 = smov 32   ;;  %vm1481_vm3 = vcmask 523520  }
 0x2b2   : > { %1152 = vmatpush1.bf16.msra.mxu0 %v3615_v7  ;;  %s4591_s9 = smov 64   ;;  %vm1609_vm4 = vcmask 785920   ;;  %vm1737_vm5 = vcmask 1048320   ;;  %s2917_s26 = sshll.u32 %s5451_s8, 3 }
 0x2b3   : > { %1153 = vmatprep.subr.bf16.mxu0 %v3616_v8  ;;  %v1007_v34 = vrot.slane %v1002_v32, %v1006_v31  ;;  %v1011_v36 = vrot.slane %v1002_v32, %v1010_v33  ;;  %v1015_v48 = vrot.slane %v1002_v32, %v1014_v47  ;;  %s5644_s11 = scalar_lea.vmem [#allocation36], %s2917_s26  ;;  %s3032_s10 = sshll.u32 %s4791_s21, 7 }
 0x2b4   : > { %3117 = vmatpush3.bf16.msra.mxu1 %v3633_v17  ;;  %s2588_s13 = sshll.u32 %s5644_s11, 4  ;;  %s6038_s27 = sld [smem:[#allocation87_spill]]  ;;  %s5676_s13 = int_to_ptr.vmem [resolvable:$true] %s2588_s13 }
 0x2b5   : > { %3118 = vmatprep.subr.bf16.mxu1 %v4587_v1  ;;  %s2559_s28 = scalar_lea.sflag [#allocation37], %s5451_s8  ;;  %s4293_s29 = scalar_lea.vmem %s5676_s13, 128 }
 0x2b6   : > { %1154 = vmatpush1.bf16.msra.mxu0 %v3618_v9  ;;  %p4294_p13 = scmp.ne.s32.totalorder %s5676_s13, %s4293_s29  ;;  %p6040_p12 = scmp.ne.s32.totalorder %s6011_s1, 0 }
 0x2b7   : > { %1155 = vmatprep.subr.bf16.mxu0 %v3619_v10  ;;  %s4592_s2 = smov [#allocation36]  }
 0x2b8   : > { %3119 = vmatpush3.bf16.msra.mxu1 %v3634_v18  ;;  %p4295_p3 = pnand %p4294_p13, %p6040_p12  ;;  %s4297_s12 = sshll.u32 %s4592_s2, 4  ;;  %s4298_s12 = int_to_ptr.vmem [resolvable:$false] %s4297_s12 }
 0x2b9   : > { %3120 = vmatprep.subr.bf16.mxu1 %v4587_v1  ;;  %s4299_s6 = scalar_lea.vmem %s4298_s12, 256  ;;  %p4300_p7 = scmp.lt.s32.totalorder %s5676_s13, %s4298_s12 }
 0x2ba   : > { %1156 = vmatpush1.bf16.msra.mxu0 %v3621_v13  ;;  %s6039_s7 = smov %s6038_s27  ;;  %s5674_s3 = scalar_lea.hbm %s6038_s27, %s3032_s10 }
 0x2bb   : > { %1157 = vmatprep.subr.bf16.mxu0 %v3622_v14  ;;  %p4296_p0 = pneg %p4295_p3  ;;  %p4301_p9 = scmp.lt.s32.totalorder %s4299_s6, %s4293_s29 }
 0x2bc   : > { %3121 = vmatpush3.bf16.msra.mxu1 %v3635_v21 }
 0x2bd   : > { %3122 = vmatprep.subr.bf16.mxu1 %v4587_v1  ;;  %p4302_p1 = por %p4301_p9, %p4300_p7 }
 0x2be   : > { %1158 = vmatpush1.bf16.msra.mxu0 %v3624_v15 }
 0x2bf   : > { %1159 = vmatprep.subr.bf16.mxu0 %v3625_v16  ;;  %p4303_p5 = pnand %p4302_p1, %p4296_p0 }
 0x2c0   : > { %3123 = vmatpush3.bf16.msra.mxu1 %v3636_v25 }
 0x2c1   : > { %3124 = vmatprep.subr.bf16.mxu1 %v4587_v1 }
 0x2c2   : > { %1160 = vmatpush1.bf16.msra.mxu0 %v3627_v19 }
 0x2c3   : > { %1161 = vmatprep.subr.bf16.mxu0 %v3628_v20 }
 0x2c4   : > { %3125 = vmatpush3.bf16.msra.mxu1 %v3637_v27 }
 0x2c5   : > { %3126 = vmatprep.subr.bf16.mxu1 %v4587_v1 }
 0x2c6   : > { %1162 = vmatpush1.bf16.msra.mxu0 %v3630_v22 }
 0x2c7   : > { %3156 = vmatprep.subr.bf16.mxu0 %v4587_v1 }
 0x2c8   : > { %3127 = vmatpush3.bf16.msra.mxu1 %v3638_v28 }
 0x2c9   : > { %1180 = vmatmul.mubr.bf16.vlgmr.msra.gmra.mrb[0].mxu0 %v969_v26  ;;  %3132 = vmatprep.subr.bf16.mxu1 %v4587_v1 }
 0x2ca   : > { %3158 = vmatprep.mubr.msk.bf16.mxu0 %vm4588_vm0, %v4587_v1 }
 0x2cb   : > { %3129 = vmatmul.mubr.bf16.vlgmr.msra.gmra.mrb[0].mxu1 %v969_v26 }
 0x2cc   : > { %3134 = vmatprep.mubr.msk.bf16.mxu1 %vm4588_vm0, %v4587_v1 }
 0x39c   : > { %v1181_v35 = vpop.f32.mrb[0].mxu0 }
 0x39d   : > { %v1183_v37 = vpop.f32.mrb[1].mxu0  ;;  %v1182_v39 = vadd.f32 %v1181_v35, %v1007_v34 }
 0x39e   : > { %v1185_v38 = vpop.f32.mrb[2].mxu0  ;;  %v1184_v42 = vadd.f32 %v1183_v37, %v1011_v36  ;;  %v1224_v49 = vpop.f32.mrb[0].mxu1 }
 0x39f   : > { %v1186_v40 = vadd.f32 %v1185_v38, %v1007_v34  ;;  %v1187_v41 = vpop.f32.mrb[3].mxu0  ;;  %v1225_v50 = vadd.f32 %v1224_v49, %v1015_v48  ;;  %v3130_v51 = vpop.f32.mrb[1].mxu1 }
 0x3a0   : > { %v1188_v43 = vadd.f32 %v1187_v41, %v1011_v36  ;;  %v1227_v52 = vpop.f32.mrb[2].mxu1 }
 0x3a1   : > { %v1231_v44 = vpack.c.bf16 %v1186_v40, %v1182_v39  ;;  %v1228_v53 = vadd.f32 %v1227_v52, %v1015_v48  ;;  %v3131_v54 = vpop.f32.mrb[3].mxu1 }
 0x3a2   : > { %v1232_v45 = vpack.c.bf16 %v1188_v43, %v1184_v42 }
 0x3a3   : > { %v5550_v55 = vpack.c.bf16 %v1228_v53, %v1225_v50 }
 0x3a4   : > { %v1239_v46 = vsel %vm1234_vm1, %v1232_v45, 0 }
 0x3a5   : > { %3133 = vmatpush3.bf16.xpose.msra.mxu1 %v1239_v46 }
 0x3a6   : > { %3138 = vmatprep.subr.bf16.mxu1 %v4587_v1 }
 0x3ac   : > { %3135 = vmatmul.mubr.msk.bf16.vlgmr.msra.gmra.mrb[4].mxu1 %vm1234_vm1, %v1231_v44 }
 0x3ad   : > { %3140 = vmatprep.mubr.msk.bf16.mxu1 %vm4588_vm0, %v4587_v1  ;;  %3139 = vmatpush3.bf16.msra.mxu1 %v5550_v55 }
 0x3ae   : > { %3144 = vmatprep.subr.bf16.mxu1 %v4587_v1 }
 0x47f   : > { %v1275_v56 = vpop.f32.mrb[4].mxu1 }
 0x480   : > { %v3136_v57 = vpop.f32.mrb[5].mxu1  ;;  %v1283_v58 = vsel %vm1282_vm2, %v1275_v56, -inf }
 0x481   : > { %1284 = vmax.xlane.f32.xlu0 %v1283_v58  ;;  %v1278_v59 = vpop.f32.mrb[6].mxu1 }
 0x482   : > { %v3137_v60 = vpop.f32.mrb[7].mxu1  ;;  %v1286_v61 = vsel %vm1282_vm2, %v1278_v59, -inf }
 0x485   : > { %1287 = vmax.xlane.f32.xlu0 %v1286_v61 }
 0x49b   : > { %1356 = vrot.lane.b32.xlu0 %v1232_v45, %s4589_s14 }
 0x49f   : > { %1613 = vrot.lane.b32.xlu0 %v1232_v45, %s4590_s25 }
 0x50e   : > { %v1285_v62 = vpop.xlane.xlu0 %1284 }
 0x50f   : > { %v1289_v63 = vsub.f32 %v1275_v56, %v1285_v62 }
 0x511   : > { %v1291_v2 = vmul.f32 1.442695, %v1289_v63 }
 0x512   : > { %v1288_v3 = vpop.xlane.xlu0 %1287 }
 0x513   : > { %3703 = vpow2.f32 %v1291_v2  ;;  %v1290_v4 = vsub.f32 %v1278_v59, %v1288_v3 }
 0x515   : > { %v1293_v5 = vmul.f32 1.442695, %v1290_v4 }
 0x516   : > { %v1357_v13 = vpop.permute.xlu0 %1356 }
 0x517   : > { %3705 = vpow2.f32 %v1293_v5  ;;  %v1362_v22 = vsel %vm1234_vm1, %v1357_v13, 0 }
 0x51a   : > { %v1614_v20 = vpop.permute.xlu0 %1613 }
 0x51b   : > { %v1619_v26 = vsel %vm1234_vm1, %v1614_v20, 0 }
 0x51d   : > { %v3704_v6 = vpop.eup %3703 }
 0x51e   : > { %v1295_v7 = vsel %vm1282_vm2, %v3704_v6, 0.0 }
 0x51f   : > { %1296 = vadd.xlane.f32.xlu1 %v1295_v7 }
 0x521   : > { %v3706_v8 = vpop.eup %3705 }
 0x522   : > { %v1298_v9 = vsel %vm1282_vm2, %v3706_v8, 0.0 }
 0x523   : > { %1299 = vadd.xlane.f32.xlu1 %v1298_v9 }
 0x534   : > { %1353 = vrot.lane.b32.xlu1 %v1231_v44, %s4589_s14 }
 0x538   : > { %1485 = vrot.lane.b32.xlu1 %v1232_v45, %s4591_s9 }
 0x53c   : > { %1483 = vrot.lane.b32.xlu1 %v1231_v44, %s4591_s9 }
 0x540   : > { %1611 = vrot.lane.b32.xlu1 %v1231_v44, %s4590_s25 }
 0x5ac   : > { %v1297_v10 = vpop.xlane.xlu1 %1296 }
 0x5ad   : > { %3707 = vrcp.f32 %v1297_v10 }
 0x5b0   : > { %v1300_v11 = vpop.xlane.xlu1 %1299 }
 0x5b1   : > { %3709 = vrcp.f32 %v1300_v11 }
 0x5b4   : > { %v1354_v12 = vpop.permute.xlu1 %1353 }
 0x5b7   : > { %v3708_v15 = vpop.eup %3707 }
 0x5b8   : > { %v1486_v14 = vpop.permute.xlu1 %1485  ;;  %v1303_v18 = vmul.f32 %v3708_v15, %v3704_v6 }
 0x5b9   : > { %v1491_v16 = vsel %vm1234_vm1, %v1486_v14, 0 }
 0x5ba   : > { %3157 = vmatpush3.bf16.xpose.msra.mxu0 %v1491_v16 }
 0x5bb   : > { %v3710_v17 = vpop.eup %3709  ;;  %3168 = vmatprep.subr.bf16.mxu0 %v4587_v1 }
 0x5bc   : > { %v1304_v19 = vmul.f32 %v3710_v17, %v3706_v8  ;;  %v1484_v25 = vpop.permute.xlu1 %1483 }
 0x5be   : > { %v1305_v21 = vpack.c.bf16 %v1304_v19, %v1303_v18 }
 0x5c0   : > { %3141 = vmatmul.mubr.msk.bf16.vlgmr.msra.gmra.mrb[8].mxu1 %vm1282_vm2, %v1305_v21  ;;  %v1612_v27 = vpop.permute.xlu1 %1611 }
 0x5c1   : > { %3145 = vmatpush3.bf16.xpose.msra.mxu1 %v1362_v22  ;;  %3159 = vmatmul.mubr.msk.bf16.vlgmr.msra.gmra.mrb[4].mxu0 %vm1234_vm1, %v1484_v25 }
 0x5c2   : > { %3169 = vmatpush3.bf16.xpose.msra.mxu0 %v1619_v26  ;;  %3146 = vmatprep.mubr.msk.bf16.mxu1 %vm4588_vm0, %v4587_v1 }
 0x5c3   : > { %3170 = vmatprep.mubr.msk.bf16.mxu0 %vm4588_vm0, %v4587_v1  ;;  %3150 = vmatprep.subr.bf16.mxu1 %v4587_v1 }
 0x5c4   : > { %3180 = vmatprep.subr.bf16.mxu0 %v4587_v1 }
 0x5c8   : > { %3147 = vmatmul.mubr.msk.bf16.vlgmr.msra.gmra.mrb[12].mxu1 %vm1234_vm1, %v1354_v12 }
 0x5c9   : > { %3171 = vmatmul.mubr.msk.bf16.vlgmr.msra.gmra.mrb[8].mxu0 %vm1234_vm1, %v1612_v27  ;;  %3152 = vmatprep.mubr.msk.bf16.mxu1 %vm4588_vm0, %v4587_v1 }
 0x5ca   : > { %3196 = vmatprep.mubr.msk.bf16.mxu0 %vm4588_vm0, %v4587_v1 }
 0x693   : > { %v1343_v28 = vpop.f32.mrb[8].mxu1 }
 0x694   : > { %v3142_v29 = vpop.f32.mrb[9].mxu1  ;;  %v1527_v32 = vpop.f32.mrb[4].mxu0 }
 0x695   : > { %v1346_v34 = vpop.f32.mrb[10].mxu1  ;;  %v3160_v35 = vpop.f32.mrb[5].mxu0  ;;  %v1534_v50 = vsel %vm1282_vm2, %v1527_v32, -inf }
 0x696   : > { %v1350_v36 = vpack.c.bf16 %v1346_v34, %v1343_v28  ;;  %v3143_v37 = vpop.f32.mrb[11].mxu1  ;;  %v1530_v38 = vpop.f32.mrb[6].mxu0 }
 0x697   : > { %v3161_v39 = vpop.f32.mrb[7].mxu0  ;;  %v1537_v52 = vsel %vm1282_vm2, %v1530_v38, -inf }
 0x698   : > { %1351 = vst.msk [vmem:[#allocation2] sm:$0xff] %vm1234_vm1, %v1350_v36 }
 0x69b   : > { %v1398_v40 = vpop.f32.mrb[12].mxu1 }
 0x69c   : > { %v3148_v41 = vpop.f32.mrb[13].mxu1  ;;  %v1655_v42 = vpop.f32.mrb[8].mxu0  ;;  %v1405_v43 = vsel %vm1282_vm2, %v1398_v40, -inf }
 0x69d   : > { %v3172_v44 = vpop.f32.mrb[9].mxu0  ;;  %1406 = vmax.xlane.f32.xlu0 %v1405_v43  ;;  %v1401_v45 = vpop.f32.mrb[14].mxu1  ;;  %v1662_v53 = vsel %vm1282_vm2, %v1655_v42, -inf }
 0x69e   : > { %v3149_v46 = vpop.f32.mrb[15].mxu1  ;;  %v1658_v47 = vpop.f32.mrb[10].mxu0  ;;  %v1408_v48 = vsel %vm1282_vm2, %v1401_v45, -inf }
 0x69f   : > { %v3173_v49 = vpop.f32.mrb[11].mxu0  ;;  %1409 = vmax.xlane.f32.xlu1 %v1408_v48  ;;  %v1665_v51 = vsel %vm1282_vm2, %v1658_v47, -inf }
 0x6a1   : > { %1535 = vmax.xlane.f32.xlu0 %v1534_v50 }
 0x6a3   : > { %1666 = vmax.xlane.f32.xlu1 %v1665_v51  ;;  %v3639_v51 = vld [vmem:[#allocation11] sm:$0xff]  }
 0x6a4   : > { %3181 = vmatpush3.bf16.msra.mxu0 %v3639_v51  ;;  %v3671_v51 = vld [vmem:[#allocation20 + $0x40] sm:$0xff]  }
 0x6a5   : > { %1538 = vmax.xlane.f32.xlu0 %v1537_v52  ;;  %v3640_v52 = vld [vmem:[#allocation11 + $0x8] sm:$0xff]   ;;  %3182 = vmatprep.subr.bf16.mxu0 %v4587_v1 }
 0x6a8   : > { %3183 = vmatpush3.bf16.msra.mxu0 %v3640_v52  ;;  %v3672_v52 = vld [vmem:[#allocation20] sm:$0xff]  }
 0x6a9   : > { %1663 = vmax.xlane.f32.xlu0 %v1662_v53  ;;  %3184 = vmatprep.subr.bf16.mxu0 %v4587_v1  ;;  %v3641_v53 = vld [vmem:[#allocation11 + $0x10] sm:$0xff]  }
 0x6ac   : > { %3185 = vmatpush3.bf16.msra.mxu0 %v3641_v53  ;;  %v3673_v53 = vld [vmem:[#allocation20 + $0x48] sm:$0xff]  }
 0x6ad   : > { %3186 = vmatprep.subr.bf16.mxu0 %v4587_v1 }
 0x72a   : > { %v1407_v54 = vpop.xlane.xlu0 %1406 }
 0x72b   : > { %v1411_v2 = vsub.f32 %v1398_v40, %v1407_v54  ;;  %v3642_v54 = vld [vmem:[#allocation11 + $0x18] sm:$0xff]  }
 0x72c   : > { %v1410_v56 = vpop.xlane.xlu1 %1409  ;;  %3187 = vmatpush3.bf16.msra.mxu0 %v3642_v54  ;;  %v3674_v54 = vld [vmem:[#allocation20 + $0x8] sm:$0xff]  }
 0x72d   : > { %v1412_v3 = vsub.f32 %v1401_v45, %v1410_v56  ;;  %v1413_v8 = vmul.f32 1.442695, %v1411_v2  ;;  %3188 = vmatprep.subr.bf16.mxu0 %v4587_v1 }
 0x72e   : > { %v1536_v57 = vpop.xlane.xlu0 %1535 }
 0x72f   : > { %v1540_v58 = vsub.f32 %v1527_v32, %v1536_v57  ;;  %v1415_v9 = vmul.f32 1.442695, %v1412_v3  ;;  %v3643_v57 = vld [vmem:[#allocation11 + $0x20] sm:$0xff]  }
 0x730   : > { %v1667_v59 = vpop.xlane.xlu1 %1666  ;;  %3189 = vmatpush3.bf16.msra.mxu0 %v3643_v57  ;;  %v3676_v57 = vld [vmem:[#allocation20 + $0x10] sm:$0xff]  }
 0x731   : > { %v1542_v60 = vmul.f32 1.442695, %v1540_v58  ;;  %v1669_v61 = vsub.f32 %v1658_v47, %v1667_v59  ;;  %v3644_v59 = vld [vmem:[#allocation11 + $0x28] sm:$0xff]   ;;  %3190 = vmatprep.subr.bf16.mxu0 %v4587_v1 }
 0x732   : > { %v1539_v62 = vpop.xlane.xlu0 %1538 }
 0x733   : > { %3711 = vpow2.f32 %v1542_v60  ;;  %v1541_v63 = vsub.f32 %v1530_v38, %v1539_v62  ;;  %v1672_v4 = vmul.f32 1.442695, %v1669_v61 }
 0x734   : > { %3191 = vmatpush3.bf16.msra.mxu0 %v3644_v59  ;;  %v3679_v59 = vld [vmem:[#allocation20 + $0x60] sm:$0xff]  }
 0x735   : > { %v1544_v5 = vmul.f32 1.442695, %v1541_v63  ;;  %3192 = vmatprep.subr.bf16.mxu0 %v4587_v1  ;;  %v3645_v63 = vld [vmem:[#allocation11 + $0x30] sm:$0xff]  }
 0x736   : > { %v1664_v6 = vpop.xlane.xlu0 %1663 }
 0x737   : > { %3713 = vpow2.f32 %v1544_v5  ;;  %v1668_v7 = vsub.f32 %v1655_v42, %v1664_v6 }
 0x738   : > { %3715 = vpow2.f32 %v1672_v4  ;;  %3193 = vmatpush3.bf16.msra.mxu0 %v3645_v63  ;;  %v3646_v4 = vld [vmem:[#allocation11 + $0x38] sm:$0xff]  }
 0x739   : > { %v1670_v10 = vmul.f32 1.442695, %v1668_v7  ;;  %3194 = vmatprep.subr.bf16.mxu0 %v4587_v1 }
 0x73b   : > { %3717 = vpow2.f32 %v1670_v10 }
 0x73c   : > { %3719 = vpow2.f32 %v1413_v8  ;;  %3195 = vmatpush3.bf16.msra.mxu0 %v3646_v4 }
 0x73d   : > { %v3712_v11 = vpop.eup %3711  ;;  %3721 = vpow2.f32 %v1415_v9  ;;  %3072 = vmatprep.subr.bf16.mxu0 %v3671_v51 }
 0x73e   : > { %v1546_v12 = vsel %vm1282_vm2, %v3712_v11, 0.0 }
 0x73f   : > { %1547 = vadd.xlane.f32.xlu0 %v1546_v12 }
 0x741   : > { %v3714_v13 = vpop.eup %3713 }
 0x742   : > { %v1549_v14 = vsel %vm1282_vm2, %v3714_v13, 0.0  ;;  %v3716_v15 = vpop.eup %3715 }
 0x743   : > { %1550 = vadd.xlane.f32.xlu1 %v1549_v14  ;;  %v1677_v19 = vsel %vm1282_vm2, %v3716_v15, 0.0 }
 0x745   : > { %v3718_v16 = vpop.eup %3717 }
 0x746   : > { %v3720_v17 = vpop.eup %3719  ;;  %v1674_v18 = vsel %vm1282_vm2, %v3718_v16, 0.0 }
 0x747   : > { %v3722_v20 = vpop.eup %3721  ;;  %1675 = vadd.xlane.f32.xlu0 %v1674_v18  ;;  %1678 = vadd.xlane.f32.xlu1 %v1677_v19  ;;  %v1417_v21 = vsel %vm1282_vm2, %v3720_v17, 0.0 }
 0x748   : > { %v1420_v22 = vsel %vm1282_vm2, %v3722_v20, 0.0 }
 0x74b   : > { %1418 = vadd.xlane.f32.xlu0 %v1417_v21  ;;  %1421 = vadd.xlane.f32.xlu1 %v1420_v22 }
 0x75c   : > { %1557 = vrot.lane.b32.xlu1 %v5550_v55, %s4591_s9 }
 0x760   : > { %1685 = vrot.lane.b32.xlu1 %v5550_v55, %s4590_s25 }
 0x761   : > { %1429 = vrot.lane.b32.xlu0 %v5550_v55, %s4589_s14 }
 0x7cc   : > { %v1548_v25 = vpop.xlane.xlu0 %1547 }
 0x7d0   : > { %v1551_v26 = vpop.xlane.xlu1 %1550 }
 0x7d4   : > { %v1676_v27 = vpop.xlane.xlu0 %1675  ;;  %v1679_v28 = vpop.xlane.xlu1 %1678 }
 0x7d8   : > { %v1419_v29 = vpop.xlane.xlu0 %1418  ;;  %v1422_v32 = vpop.xlane.xlu1 %1421 }
 0x7d9   : > { %3723 = vrcp.f32 %v1419_v29  ;;  %v3652_v29 = vld [vmem:[#allocation17 + $0x14] ss:$8 sps:$4 sm:$0xff]  }
 0x7da   : > { %3725 = vrcp.f32 %v1422_v32  ;;  %v3650_v32 = vld [vmem:[#allocation17 + $0x10] ss:$8 sps:$4 sm:$0xff]  }
 0x7db   : > { %3727 = vrcp.f32 %v1551_v26 }
 0x7dc   : > { %v1430_v34 = vpop.permute.xlu0 %1429  ;;  %3729 = vrcp.f32 %v1548_v25  ;;  %v1558_v40 = vpop.permute.xlu1 %1557 }
 0x7dd   : > { %3151 = vmatpush3.bf16.msra.mxu1 %v1430_v34  ;;  %3731 = vrcp.f32 %v1676_v27  ;;  %v3647_v27 = vld [vmem:[#allocation17] ss:$8 sps:$4 sm:$0xff]  }
 0x7de   : > { %3162 = vmatprep.subr.bf16.mxu1 %v4587_v1  ;;  %3733 = vrcp.f32 %v1679_v28  ;;  %v3649_v28 = vld [vmem:[#allocation17 + $0x4] ss:$8 sps:$4 sm:$0xff]  }
 0x7e0   : > { %v1686_v47 = vpop.permute.xlu1 %1685 }
 0x7e3   : > { %v3724_v35 = vpop.eup %3723 }
 0x7e4   : > { %v3726_v36 = vpop.eup %3725  ;;  %v1425_v37 = vmul.f32 %v3724_v35, %v3720_v17 }
 0x7e5   : > { %v1426_v38 = vmul.f32 %v3726_v36, %v3722_v20  ;;  %v3728_v39 = vpop.eup %3727 }
 0x7e6   : > { %v3730_v41 = vpop.eup %3729  ;;  %v1555_v42 = vmul.f32 %v3728_v39, %v3714_v13  ;;  %v3655_v39 = vld [vmem:[#allocation17 + $0x24] ss:$8 sps:$4 sm:$0xff]  }
 0x7e7   : > { %v1427_v55 = vpack.c.bf16 %v1426_v38, %v1425_v37  ;;  %v1554_v43 = vmul.f32 %v3730_v41, %v3712_v11  ;;  %v3732_v44 = vpop.eup %3731  ;;  %v3658_v41 = vld [vmem:[#allocation17 + $0x34] ss:$8 sps:$4 sm:$0xff]  }
 0x7e8   : > { %v3734_v46 = vpop.eup %3733  ;;  %v1682_v48 = vmul.f32 %v3732_v44, %v3718_v16  ;;  %v2950_v16 = vld [vmem:[#allocation13] ss:$0 sm:$0xff]  ;;  %v3659_v44 = vld [vmem:[#allocation17 + $0x40] ss:$8 sps:$4 sm:$0xff]  }
 0x7e9   : > { %3153 = vmatmul.mubr.msk.bf16.vlgmr.msra.gmra.mrb[16].mxu1 %vm1282_vm2, %v1427_v55  ;;  %v1556_v45 = vpack.c.bf16 %v1555_v42, %v1554_v43  ;;  %v1683_v49 = vmul.f32 %v3734_v46, %v3716_v15  ;;  %v3656_v42 = vld [vmem:[#allocation17 + $0x30] ss:$8 sps:$4 sm:$0xff]   ;;  %v3661_v43 = vld [vmem:[#allocation17 + $0x44] ss:$8 sps:$4 sm:$0xff]  }
 0x7ea   : > { %3163 = vmatpush3.bf16.msra.mxu1 %v1558_v40  ;;  %3164 = vmatprep.mubr.msk.bf16.mxu1 %vm4588_vm0, %v4587_v1  ;;  %v3653_v40 = vld [vmem:[#allocation17 + $0x20] ss:$8 sps:$4 sm:$0xff]   ;;  %v3662_v46 = vld [vmem:[#allocation17 + $0x50] ss:$8 sps:$4 sm:$0xff]  }
 0x7eb   : > { %3174 = vmatprep.subr.bf16.mxu1 %v4587_v1  ;;  %v1684_v50 = vpack.c.bf16 %v1683_v49, %v1682_v48  ;;  %v3665_v48 = vld [vmem:[#allocation17 + $0x60] ss:$8 sps:$4 sm:$0xff]   ;;  %v3670_v49 = vld [vmem:[#allocation17 + $0x74] ss:$8 sps:$4 sm:$0xff]  }
 0x7f1   : > { %3165 = vmatmul.mubr.msk.bf16.vlgmr.msra.gmra.mrb[20].mxu1 %vm1282_vm2, %v1556_v45  ;;  %v3664_v45 = vld [vmem:[#allocation17 + $0x54] ss:$8 sps:$4 sm:$0xff]  }
 0x7f2   : > { %3175 = vmatpush3.bf16.msra.mxu1 %v1686_v47  ;;  %3176 = vmatprep.mubr.msk.bf16.mxu1 %vm4588_vm0, %v4587_v1  ;;  %v3667_v47 = vld [vmem:[#allocation17 + $0x64] ss:$8 sps:$4 sm:$0xff]  }
 0x7f3   : > { %2004 = vmatprep.subr.bf16.mxu1 %v3649_v28 }
 0x7f9   : > { %3177 = vmatmul.mubr.msk.bf16.vlgmr.msra.gmra.mrb[24].mxu1 %vm1282_vm2, %v1684_v50  ;;  %v3668_v50 = vld [vmem:[#allocation17 + $0x70] ss:$8 sps:$4 sm:$0xff]  }
 0x7fa   : > { %2036 = vmatprep.mubr.bf16.mxu1 %v4586_v0  ;;  %2005 = vmatpush1.bf16.msra.mxu1 %v3647_v27 }
 0x7fb   : > { %2006 = vmatprep.subr.bf16.mxu1 %v3652_v29 }
 0x7fe   : > { %2007 = vmatpush1.bf16.msra.mxu1 %v3650_v32 }
 0x7ff   : > { %2008 = vmatprep.subr.bf16.mxu1 %v3655_v39 }
 0x802   : > { %2009 = vmatpush1.bf16.msra.mxu1 %v3653_v40 }
 0x803   : > { %2010 = vmatprep.subr.bf16.mxu1 %v3658_v41 }
 0x806   : > { %2011 = vmatpush1.bf16.msra.mxu1 %v3656_v42 }
 0x807   : > { %2012 = vmatprep.subr.bf16.mxu1 %v3661_v43 }
 0x80a   : > { %2013 = vmatpush1.bf16.msra.mxu1 %v3659_v44 }
 0x80b   : > { %2014 = vmatprep.subr.bf16.mxu1 %v3664_v45 }
 0x80e   : > { %2015 = vmatpush1.bf16.msra.mxu1 %v3662_v46 }
 0x80f   : > { %2016 = vmatprep.subr.bf16.mxu1 %v3667_v47 }
 0x812   : > { %2017 = vmatpush1.bf16.msra.mxu1 %v3665_v48 }
 0x813   : > { %2018 = vmatprep.subr.bf16.mxu1 %v3670_v49 }
 0x816   : > { %2019 = vmatpush1.bf16.msra.mxu1 %v3668_v50 }
 0x817   : > { %3200 = vmatprep.subr.bf16.mxu1 %v4587_v1 }
 0x8bc   : > { %v1469_v56 = vpop.f32.mrb[16].mxu1 }
 0x8bd   : > { %v3154_v58 = vpop.f32.mrb[17].mxu1 }
 0x8be   : > { %v1472_v0 = vpop.f32.mrb[18].mxu1  ;;  %v3677_v58 = vld [vmem:[#allocation20 + $0x58] sm:$0xff]  }
 0x8bf   : > { %v1476_v60 = vpack.c.bf16 %v1472_v0, %v1469_v56  ;;  %v3155_v61 = vpop.f32.mrb[19].mxu1  ;;  %v3675_v56 = vld [vmem:[#allocation20 + $0x50] sm:$0xff]   ;;  %v3678_v0 = vld [vmem:[#allocation20 + $0x18] sm:$0xff]  }
 0x8c0   : > { %v3681_v61 = vld [vmem:[#allocation20 + $0x68] sm:$0xff]  }
 0x8c1   : > { %1478 = vrot.lane.b32.xlu1 %v1476_v60, %s4590_s25  ;;  %v3680_v60 = vld [vmem:[#allocation20 + $0x20] sm:$0xff]  }
 0x8c4   : > { %v1597_v62 = vpop.f32.mrb[20].mxu1 }
 0x8c5   : > { %v3166_v2 = vpop.f32.mrb[21].mxu1 }
 0x8c6   : > { %v1600_v3 = vpop.f32.mrb[22].mxu1 }
 0x8c7   : > { %v1604_v5 = vpack.c.bf16 %v1600_v3, %v1597_v62  ;;  %v3167_v6 = vpop.f32.mrb[23].mxu1 }
 0x8c9   : > { %1606 = vrot.lane.b32.xlu0 %v1604_v5, %s4591_s9 }
 0x8cc   : > { %v1725_v7 = vpop.f32.mrb[24].mxu1 }
 0x8cd   : > { %v3178_v8 = vpop.f32.mrb[25].mxu1 }
 0x8ce   : > { %v1728_v9 = vpop.f32.mrb[26].mxu1  ;;  %v2959_v8 = vld [vmem:[#allocation14] ss:$0 sm:$0xff] }
 0x8cf   : > { %v1732_v10 = vpack.c.bf16 %v1728_v9, %v1725_v7  ;;  %v3179_v11 = vpop.f32.mrb[27].mxu1 }
 0x8d1   : > { %1734 = vrot.lane.b32.xlu1 %v1732_v10, %s4589_s14 }
 0x933   : > { %v1479_v12 = vpop.permute.xlu1 %1478 }
 0x934   : > { %1482 = vst.msk [vmem:[#allocation2] sm:$0xff] %vm1481_vm3, %v1479_v12  ;;  %v2960_v12 = vld [vmem:[#allocation16] ss:$0 sm:$0xff] }
 0x93b   : > { %v1607_v13 = vpop.permute.xlu0 %1606 }
 0x93c   : > { %1610 = vst.msk [vmem:[#allocation2] sm:$0xff] %vm1609_vm4, %v1607_v13 }
 0x943   : > { %v1735_v14 = vpop.permute.xlu1 %1734 }
 0x944   : > { %1738 = vst.msk [vmem:[#allocation2] sm:$0xff] %vm1737_vm5, %v1735_v14 }
 0x94b   : > { %v1739_v15 = vld [vmem:[#allocation2] sm:$0xff] }
 0x94c   : > { %3197 = vmatmul.mubr.bf16.vlgmr.msra.gmra.mrb[12].mxu0 %v1739_v15 }
 0x94d   : > { %3073 = vmatpush3.bf16.msra.mxu0 %v3672_v52 }
 0x94e   : > { %3074 = vmatprep.subr.bf16.mxu0 %v3673_v53 }
 0x951   : > { %3075 = vmatpush3.bf16.msra.mxu0 %v3674_v54 }
 0x952   : > { %3076 = vmatprep.subr.bf16.mxu0 %v3675_v56 }
 0x955   : > { %3077 = vmatpush3.bf16.msra.mxu0 %v3676_v57 }
 0x956   : > { %3078 = vmatprep.subr.bf16.mxu0 %v3677_v58 }
 0x959   : > { %3079 = vmatpush3.bf16.msra.mxu0 %v3678_v0 }
 0x95a   : > { %3080 = vmatprep.subr.bf16.mxu0 %v3679_v59 }
 0x95d   : > { %3081 = vmatpush3.bf16.msra.mxu0 %v3680_v60 }
 0x95e   : > { %3082 = vmatprep.subr.bf16.mxu0 %v3681_v61 }
 0xa1f   : > { %v1845_v17 = vpop.f32.mrb[12].mxu0 }
 0xa20   : > { %v1846_v18 = vadd.f32 %v2950_v16, %v1845_v17  ;;  %v3198_v19 = vpop.f32.mrb[13].mxu0  ;;  %v3682_v17 = vld [vmem:[#allocation20 + $0x28] sm:$0xff]  }
 0xa21   : > { %v1848_v20 = vpop.f32.mrb[14].mxu0  ;;  %3083 = vmatpush3.bf16.msra.mxu0 %v3682_v17  ;;  %v3684_v19 = vld [vmem:[#allocation20 + $0x30] sm:$0xff]  }
 0xa22   : > { %v1849_v21 = vadd.f32 %v2950_v16, %v1848_v20  ;;  %v3199_v22 = vpop.f32.mrb[15].mxu0  ;;  %v1852_v25 = vadd.f32 %v1846_v18, %v5517_v23  ;;  %v3683_v18 = vld [vmem:[#allocation20 + $0x70] sm:$0xff]   ;;  %v3685_v20 = vld [vmem:[#allocation20 + $0x78] sm:$0xff]  }
 0xa23   : > { %3084 = vmatprep.subr.bf16.mxu0 %v3683_v18  ;;  %v1912_v22 = vld [vmem:[#allocation19] sm:$0x3] }
 0xa24   : > { %1856 = vadd.xlane.f32.xlu0 %v1852_v25  ;;  %v1853_v26 = vadd.f32 %v1849_v21, %v5520_v24  ;;  %v3686_v21 = vld [vmem:[#allocation20 + $0x38] sm:$0xff]  }
 0xa25   : > { %3085 = vmatpush3.bf16.msra.mxu0 %v3684_v19 }
 0xa26   : > { %1858 = vadd.xlane.f32.xlu1 %v1853_v26  ;;  %3086 = vmatprep.subr.bf16.mxu0 %v3685_v20 }
 0xa29   : > { %3087 = vmatpush3.bf16.msra.mxu0 %v3686_v21 }
 0xa2a   : > { %3220 = vmatprep.subr.bf16.mxu0 %v4587_v1 }
 0xab1   : > { %v1857_v34 = vpop.xlane.xlu0 %1856 }
 0xab2   : > { %v1861_v35 = vmul.f32 0.0078125, %v1857_v34 }
 0xab3   : > { %v1859_v36 = vpop.xlane.xlu1 %1858 }
 0xab4   : > { %v5623_v37 = vsub.f32 %v1852_v25, %v1861_v35  ;;  %v1862_v38 = vmul.f32 0.0078125, %v1859_v36  ;;  %v1917_v25 = vrot.slane %v1912_v22, %v1006_v31  ;;  %v2977_v31 = vld [vmem:[#allocation22] ss:$0 sm:$0xff] }
 0xab6   : > { %v5625_v55 = vsub.f32 %v1853_v26, %v1862_v38  ;;  %v1865_v23 = vmul.f32 %v5623_v37, %v5623_v37  ;;  %v1921_v26 = vrot.slane %v1912_v22, %v1010_v33  ;;  %v3689_v22 = vld [vmem:[#allocation26 + $0x10] sm:$0xff]  }
 0xab8   : > { %1867 = vadd.xlane.f32.xlu0 %v1865_v23  ;;  %v1866_v24 = vmul.f32 %v5625_v55, %v5625_v55 }
 0xabc   : > { %1869 = vadd.xlane.f32.xlu0 %v1866_v24 }
 0xb45   : > { %v1868_v62 = vpop.xlane.xlu0 %1867 }
 0xb46   : > { %v1871_v63 = vmul.f32 0.0078125, %v1868_v62 }
 0xb48   : > { %v1873_v2 = vadd.f32 1e-05, %v1871_v63 }
 0xb49   : > { %v1870_v3 = vpop.xlane.xlu0 %1869 }
 0xb4a   : > { %3735 = vrsqrt.f32 %v1873_v2  ;;  %v1872_v4 = vmul.f32 0.0078125, %v1870_v3  ;;  %v2996_v3 = vld [vmem:[#allocation23] ss:$0 sm:$0xff] }
 0xb4c   : > { %v1874_v5 = vadd.f32 1e-05, %v1872_v4 }
 0xb4e   : > { %3737 = vrsqrt.f32 %v1874_v5 }
 0xb54   : > { %v3736_v6 = vpop.eup %3735 }
 0xb55   : > { %v1877_v7 = vmul.f32 %v3736_v6, %v5623_v37  ;;  %v2997_v6 = vld [vmem:[#allocation25] ss:$0 sm:$0xff] }
 0xb57   : > { %v1885_v11 = vmul.f32 %v2959_v8, %v1877_v7 }
 0xb58   : > { %v3738_v9 = vpop.eup %3737 }
 0xb59   : > { %v1878_v10 = vmul.f32 %v3738_v9, %v5625_v55  ;;  %v1893_v14 = vadd.f32 %v2960_v12, %v1885_v11 }
 0xb5b   : > { %v1886_v13 = vmul.f32 %v2959_v8, %v1878_v10 }
 0xb5d   : > { %v1894_v15 = vadd.f32 %v2960_v12, %v1886_v13  ;;  %v3687_v12 = vld [vmem:[#allocation26] sm:$0xff]   ;;  %v3688_v13 = vld [vmem:[#allocation26 + $0x8] sm:$0xff]  }
 0xb5f   : > { %v1895_v16 = vpack.c.bf16 %v1894_v15, %v1893_v14 }
 0xb61   : > { %2037 = vmatmul.mubr.bf16.vlgmr.msra.gmra.mrb[28].mxu1 %v1895_v16 }
 0xb62   : > { %3216 = vmatprep.mubr.msk.bf16.mxu1 %vm4588_vm0, %v4587_v1  ;;  %3201 = vmatpush3.bf16.msra.mxu1 %v3687_v12 }
 0xb63   : > { %3202 = vmatprep.subr.bf16.mxu1 %v4587_v1 }
 0xb66   : > { %3203 = vmatpush3.bf16.msra.mxu1 %v3688_v13 }
 0xb67   : > { %3204 = vmatprep.subr.bf16.mxu1 %v4587_v1 }
 0xb6a   : > { %3205 = vmatpush3.bf16.msra.mxu1 %v3689_v22 }
 0xb6b   : > { %3206 = vmatprep.subr.bf16.mxu1 %v4587_v1 }
 0xc34   : > { %v2038_v27 = vpop.f32.mrb[28].mxu1 }
 0xc35   : > { %v2039_v28 = vadd.f32 %v2038_v27, %v1917_v25  ;;  %v2040_v29 = vpop.f32.mrb[29].mxu1  ;;  %v3692_v27 = vld [vmem:[#allocation26 + $0x28] sm:$0xff]  }
 0xc36   : > { %v2041_v32 = vadd.f32 %v2040_v29, %v1921_v26  ;;  %v2042_v34 = vpop.f32.mrb[30].mxu1  ;;  %v3694_v29 = vld [vmem:[#allocation26 + $0x38] sm:$0xff]  }
 0xc37   : > { %v2043_v35 = vadd.f32 %v2042_v34, %v1917_v25  ;;  %v2044_v36 = vpop.f32.mrb[31].mxu1  ;;  %v2047_v38 = vmax.f32 %v2039_v28, 0.0  ;;  %v3690_v25 = vld [vmem:[#allocation26 + $0x18] sm:$0xff]   ;;  %v3693_v28 = vld [vmem:[#allocation26 + $0x30] sm:$0xff]  }
 0xc38   : > { %v2045_v37 = vadd.f32 %v2044_v36, %v1921_v26  ;;  %v2048_v23 = vmax.f32 %v2041_v32, 0.0  ;;  %3207 = vmatpush3.bf16.msra.mxu1 %v3690_v25  ;;  %v3691_v26 = vld [vmem:[#allocation26 + $0x20] sm:$0xff]   ;;  %v3696_v34 = vld [vmem:[#allocation29 + $0x8] sm:$0xff]  }
 0xc39   : > { %v2049_v55 = vmax.f32 %v2043_v35, 0.0  ;;  %3208 = vmatprep.subr.bf16.mxu1 %v4587_v1  ;;  %v3695_v32 = vld [vmem:[#allocation29] sm:$0xff]   ;;  %v3697_v35 = vld [vmem:[#allocation29 + $0x10] sm:$0xff]   ;;  %v3698_v36 = vld [vmem:[#allocation29 + $0x18] sm:$0xff]  }
 0xc3a   : > { %v2050_v24 = vmax.f32 %v2045_v37, 0.0  ;;  %v3699_v37 = vld [vmem:[#allocation29 + $0x20] sm:$0xff]  }
 0xc3b   : > { %v2051_v39 = vpack.c.bf16 %v2049_v55, %v2047_v38  ;;  %v3700_v38 = vld [vmem:[#allocation29 + $0x28] sm:$0xff]  }
 0xc3c   : > { %v2052_v40 = vpack.c.bf16 %v2050_v24, %v2048_v23  ;;  %3209 = vmatpush3.bf16.msra.mxu1 %v3691_v26 }
 0xc3d   : > { %3210 = vmatprep.subr.bf16.mxu1 %v4587_v1 }
 0xc3e   : > { %2220 = vmatprep.mubr.bf16.mxu0 %v2052_v40 }
 0xc3f   : > { %2221 = vmatmul.mubr.bf16.vlgmr.msra.gmra.mrb[16].mxu0 %v2051_v39 }
 0xc40   : > { %3236 = vmatprep.mubr.msk.bf16.mxu0 %vm4588_vm0, %v4587_v1  ;;  %3211 = vmatpush3.bf16.msra.mxu1 %v3692_v27 }
 0xc41   : > { %3212 = vmatprep.subr.bf16.mxu1 %v4587_v1  ;;  %3221 = vmatpush3.bf16.msra.mxu0 %v3695_v32 }
 0xc42   : > { %3222 = vmatprep.subr.bf16.mxu0 %v4587_v1 }
 0xc44   : > { %3213 = vmatpush3.bf16.msra.mxu1 %v3693_v28 }
 0xc45   : > { %3214 = vmatprep.subr.bf16.mxu1 %v4587_v1  ;;  %3223 = vmatpush3.bf16.msra.mxu0 %v3696_v34 }
 0xc46   : > { %3224 = vmatprep.subr.bf16.mxu0 %v4587_v1 }
 0xc48   : > { %3215 = vmatpush3.bf16.msra.mxu1 %v3694_v29 }
 0xc49   : > { %3225 = vmatpush3.bf16.msra.mxu0 %v3697_v35 }
 0xc4a   : > { %3226 = vmatprep.subr.bf16.mxu0 %v4587_v1 }
 0xc4d   : > { %3227 = vmatpush3.bf16.msra.mxu0 %v3698_v36 }
 0xc4e   : > { %3228 = vmatprep.subr.bf16.mxu0 %v4587_v1 }
 0xc51   : > { %3229 = vmatpush3.bf16.msra.mxu0 %v3699_v37 }
 0xc52   : > { %3230 = vmatprep.subr.bf16.mxu0 %v4587_v1 }
 0xc55   : > { %3231 = vmatpush3.bf16.msra.mxu0 %v3700_v38 }
 0xc56   : > { %3232 = vmatprep.subr.bf16.mxu0 %v4587_v1 }
 0xd12   : > { %v3088_v30 = vpop.f32.mrb[16].mxu0 }
 0xd13   : > { %v3089_v33 = vpop.f32.mrb[17].mxu0 }
 0xd14   : > { %v3090_v41 = vadd.f32 %v3089_v33, %v3088_v30  ;;  %v3091_v42 = vpop.f32.mrb[18].mxu0  ;;  %v2998_v33 = vld [vmem:[#allocation32] ss:$0 sm:$0xff] }
 0xd15   : > { %v3092_v43 = vpop.f32.mrb[19].mxu0 }
 0xd16   : > { %v2223_v44 = vadd.f32 %v3090_v41, %v2977_v31  ;;  %v3093_v45 = vadd.f32 %v3092_v43, %v3091_v42 }
 0xd18   : > { %v2226_v46 = vadd.f32 %v3093_v45, %v2977_v31  ;;  %v2239_v47 = vadd.f32 %v2223_v44, %v1893_v14  ;;  %v2999_v45 = vld [vmem:[#allocation34] ss:$0 sm:$0xff] }
 0xd1a   : > { %v3036_v48 = vpack.c.bf16 %v2226_v46, %v2223_v44  ;;  %2243 = vadd.xlane.f32.xlu0 %v2239_v47  ;;  %v2240_v49 = vadd.f32 %v2226_v46, %v1894_v15 }
 0xd1c   : > { %3037 = vst [vmem:[%s5644_s11] sm:$0xff] %v3036_v48   ;;  %2245 = vadd.xlane.f32.xlu1 %v2240_v49 }
 0xda7   : > { %v2244_v50 = vpop.xlane.xlu0 %2243 }
 0xda8   : > { %v2247_v51 = vmul.f32 0.0078125, %v2244_v50  ;;  %v3701_v50 = vld [vmem:[#allocation29 + $0x30] sm:$0xff]  }
 0xda9   : > { %v2246_v52 = vpop.xlane.xlu1 %2245  ;;  %3233 = vmatpush3.bf16.msra.mxu0 %v3701_v50 }
 0xdaa   : > { %v2249_v53 = vsub.f32 %v2239_v47, %v2247_v51  ;;  %v2248_v54 = vmul.f32 0.0078125, %v2246_v52  ;;  %3234 = vmatprep.subr.bf16.mxu0 %v4587_v1  ;;  %v3702_v51 = vld [vmem:[#allocation29 + $0x38] sm:$0xff]  }
 0xdab   : > { %v3000_v52 = vld [vmem:[#allocation28] ss:$0 sm:$0xff] }
 0xdac   : > { %v2250_v56 = vsub.f32 %v2240_v49, %v2248_v54  ;;  %v2251_v57 = vmul.f32 %v2249_v53, %v2249_v53 }
 0xdad   : > { %3235 = vmatpush3.bf16.msra.mxu0 %v3702_v51 }
 0xdae   : > { %2253 = vadd.xlane.f32.xlu0 %v2251_v57  ;;  %v2252_v58 = vmul.f32 %v2250_v56, %v2250_v56 }
 0xdb0   : > { %2255 = vadd.xlane.f32.xlu1 %v2252_v58 }
 0xe3b   : > { %v2254_v0 = vpop.xlane.xlu0 %2253 }
 0xe3c   : > { %v2257_v59 = vmul.f32 0.0078125, %v2254_v0 }
 0xe3d   : > { %v2256_v60 = vpop.xlane.xlu1 %2255 }
 0xe3e   : > { %v2259_v61 = vadd.f32 1e-05, %v2257_v59  ;;  %v2258_v62 = vmul.f32 0.0078125, %v2256_v60 }
 0xe40   : > { %3739 = vrsqrt.f32 %v2259_v61  ;;  %v2260_v63 = vadd.f32 1e-05, %v2258_v62 }
 0xe42   : > { %3741 = vrsqrt.f32 %v2260_v63 }
 0xe4a   : > { %v3740_v2 = vpop.eup %3739 }
 0xe4b   : > { %v2263_v4 = vmul.f32 %v3740_v2, %v2249_v53 }
 0xe4c   : > { %v3742_v5 = vpop.eup %3741 }
 0xe4d   : > { %v2271_v7 = vmul.f32 %v2996_v3, %v2263_v4  ;;  %v2264_v8 = vmul.f32 %v3742_v5, %v2250_v56 }
 0xe4f   : > { %v5647_v9 = vadd.f32 %v2997_v6, %v2271_v7  ;;  %v2272_v10 = vmul.f32 %v2996_v3, %v2264_v8 }
 0xe51   : > { %2283 = vadd.xlane.f32.xlu0 %v5647_v9  ;;  %v5650_v11 = vadd.f32 %v2997_v6, %v2272_v10 }
 0xe53   : > { %2285 = vadd.xlane.f32.xlu1 %v5650_v11 }
 0xede   : > { %v2284_v14 = vpop.xlane.xlu0 %2283 }
 0xedf   : > { %v2287_v15 = vmul.f32 0.0078125, %v2284_v14 }
 0xee0   : > { %v2286_v16 = vpop.xlane.xlu1 %2285 }
 0xee1   : > { %v2289_v17 = vsub.f32 %v5647_v9, %v2287_v15  ;;  %v2288_v18 = vmul.f32 0.0078125, %v2286_v16 }
 0xee3   : > { %v2290_v19 = vsub.f32 %v5650_v11, %v2288_v18  ;;  %v2291_v20 = vmul.f32 %v2289_v17, %v2289_v17 }
 0xee5   : > { %2293 = vadd.xlane.f32.xlu0 %v2291_v20  ;;  %v2292_v21 = vmul.f32 %v2290_v19, %v2290_v19 }
 0xee7   : > { %2295 = vadd.xlane.f32.xlu1 %v2292_v21 }
 0xf72   : > { %v2294_v55 = vpop.xlane.xlu0 %2293 }
 0xf73   : > { %v2297_v23 = vmul.f32 0.0078125, %v2294_v55 }
 0xf74   : > { %v2296_v24 = vpop.xlane.xlu1 %2295 }
 0xf75   : > { %v2299_v39 = vadd.f32 1e-05, %v2297_v23  ;;  %v2298_v40 = vmul.f32 0.0078125, %v2296_v24 }
 0xf77   : > { %3743 = vrsqrt.f32 %v2299_v39  ;;  %v2300_v30 = vadd.f32 1e-05, %v2298_v40 }
 0xf79   : > { %3745 = vrsqrt.f32 %v2300_v30 }
 0xf81   : > { %v3744_v31 = vpop.eup %3743 }
 0xf82   : > { %v2303_v41 = vmul.f32 %v3744_v31, %v2289_v17 }
 0xf83   : > { %v3746_v42 = vpop.eup %3745 }
 0xf84   : > { %v2304_v43 = vmul.f32 %v3746_v42, %v2290_v19  ;;  %v2311_v44 = vmul.f32 %v2998_v33, %v2303_v41 }
 0xf86   : > { %v2312_v46 = vmul.f32 %v2998_v33, %v2304_v43  ;;  %v2319_v47 = vadd.f32 %v2999_v45, %v2311_v44 }
 0xf88   : > { %v2320_v48 = vadd.f32 %v2999_v45, %v2312_v46 }
 0xf8a   : > { %v2321_v49 = vpack.c.bf16 %v2320_v48, %v2319_v47 }
 0xf8c   : > { %3217 = vmatmul.mubr.bf16.vlgmr.msra.gmra.mrb[32].mxu1 %v2321_v49 }
0x105f   : > { %v2427_v53 = vpop.f32.mrb[32].mxu1 }
0x1060   : > { %v2428_v54 = vadd.f32 %v3000_v52, %v2427_v53  ;;  %v3218_v56 = vpop.f32.mrb[33].mxu1 }
0x1061   : > { %v2430_v57 = vpop.f32.mrb[34].mxu1 }
0x1062   : > { %v2431_v58 = vadd.f32 %v3000_v52, %v2430_v57  ;;  %v3219_v0 = vpop.f32.mrb[35].mxu1  ;;  %v2434_v59 = vmax.f32 %v2428_v54, 0.0 }
0x1064   : > { %v2435_v60 = vmax.f32 %v2431_v58, 0.0 }
0x1066   : > { %v2436_v61 = vpack.c.bf16 %v2435_v60, %v2434_v59 }
0x1068   : > { %3237 = vmatmul.mubr.bf16.vlgmr.msra.gmra.mrb[20].mxu0 %v2436_v61 }
0x1069   : > { %4306 = shalt.err (!%p4303_p5)
}
0x106a   : > { %s4307_s14 = scalar_lea.hbm %s5674_s3, 128  ;;  %s4311_s11 = scalar_lea.hbm %s6039_s7, 256 }
0x106b   : > { %p4308_p10 = scmp.ne.s32.totalorder %s5674_s3, %s4307_s14  ;;  %p4312_p8 = scmp.lt.u32.totalorder %s5674_s3, %s6039_s7 }
0x106c   : > { %p4313_p2 = scmp.lt.u32.totalorder %s4311_s11, %s4307_s14  ;;  %p4315_p13 = scmp.lt.u32.totalorder %s4307_s14, %s5674_s3 }
0x106d   : > { %p4309_p6 = pnand %p4308_p10, %p6040_p12 }
0x106e   : > { %p4314_p11 = por %p4313_p2, %p4312_p8 }
0x106f   : > { %p4310_p4 = pneg %p4309_p6 }
0x1070   : > { %p4316_p3 = por %p4315_p13, %p4314_p11 }
0x1072   : > { %p4317_p0 = pnand %p4316_p3, %p4310_p4 }
0x1074   : > { %4320 = shalt.err (!%p4317_p0)
}
0x1075   : > { %s4593_s0 = smov 4   ;;  %v3009_v1 = vld [vmem:[#allocation31] ss:$0 sm:$0xff]  ;;  %s952_s27 = scalar_lea.vmem [#allocation35], %s2903_s30 }
0x1076   : > { %3303 = dma.vmem_to_hbm [thread:$0]  (%p6040_p12), %s5676_s13, 128, %s5674_s3, %s2559_s28, %s4591_s9, %s4591_s9, %s4593_s0  }
0x1077   : > { %s2572_s29 = sshll.u32 %s952_s27, 4  ;;  %s3031_s2 = sshll.u32 %s4791_s21, 8  ;;  %s5708_s29 = int_to_ptr.vmem [resolvable:$true] %s2572_s29 }
0x1078   : > { %s6041_s3 = sld [smem:[#allocation86_spill]]  ;;  %s2554_s21 = scalar_lea.sflag [#allocation7], %s5451_s8 }
0x1079   : > { %s4321_s30 = scalar_lea.vmem %s5708_s29, 256  ;;  %s4594_s6 = smov [#allocation35]  }
0x107a   : > { %p4322_p7 = scmp.ne.s32.totalorder %s5708_s29, %s4321_s30  ;;  %s4325_s14 = sshll.u32 %s4594_s6, 4  ;;  %s4326_s14 = int_to_ptr.vmem [resolvable:$false] %s4325_s14 }
0x107b   : > { %s4327_s25 = scalar_lea.vmem %s4326_s14, 512  ;;  %p4328_p5 = scmp.lt.s32.totalorder %s5708_s29, %s4326_s14 }
0x107c   : > { %p4323_p9 = pnand %p4322_p7, %p6040_p12  ;;  %p4329_p10 = scmp.lt.s32.totalorder %s4327_s25, %s4321_s30 }
0x107e   : > { %s6042_s12 = smov %s6041_s3  ;;  %s5713_s28 = scalar_lea.hbm %s6041_s3, %s3031_s2 }
0x107f   : > { %p4324_p1 = pneg %p4323_p9  ;;  %p4330_p6 = por %p4329_p10, %p4328_p5 }
0x1081   : > { %p4331_p4 = pnand %p4330_p6, %p4324_p1 }
0x113b   : > { %v2542_v62 = vpop.f32.mrb[20].mxu0 }
0x113c   : > { %v2543_v63 = vadd.f32 %v3009_v1, %v2542_v62  ;;  %v3238_v2 = vpop.f32.mrb[21].mxu0 }
0x113d   : > { %v2545_v3 = vpop.f32.mrb[22].mxu0 }
0x113e   : > { %v2549_v4 = vadd.f32 %v2543_v63, %v5647_v9  ;;  %v2546_v5 = vadd.f32 %v3009_v1, %v2545_v3  ;;  %v3239_v6 = vpop.f32.mrb[23].mxu0 }
0x1140   : > { %2551 = vst [vmem:[%s952_s27] sm:$0xff] %v2549_v4  ;;  %v2550_v7 = vadd.f32 %v2546_v5, %v5650_v11 }
0x1142   : > { %2552 = vst [vmem:[%s952_s27 + $0x8] sm:$0xff] %v2550_v7 }
0x1143   : > { %4334 = shalt.err (!%p4331_p4)
}
0x1144   : > { %s4335_s26 = scalar_lea.hbm %s5713_s28, 256  ;;  %s4339_s22 = scalar_lea.hbm %s6042_s12, 512 }
0x1145   : > { %p4336_p8 = scmp.ne.s32.totalorder %s5713_s28, %s4335_s26  ;;  %p4340_p13 = scmp.lt.u32.totalorder %s5713_s28, %s6042_s12 }
0x1146   : > { %p4341_p3 = scmp.lt.u32.totalorder %s4339_s22, %s4335_s26  ;;  %p4343_p7 = scmp.lt.u32.totalorder %s4335_s26, %s5713_s28 }
0x1147   : > { %p4337_p2 = pnand %p4336_p8, %p6040_p12 }
0x1148   : > { %p4342_p0 = por %p4341_p3, %p4340_p13 }
0x1149   : > { %p4338_p11 = pneg %p4337_p2 }
0x114a   : > { %p4344_p9 = por %p4343_p7, %p4342_p0 }
0x114c   : > { %p4345_p1 = pnand %p4344_p9, %p4338_p11 }
0x114e   : > { %4348 = shalt.err (!%p4345_p1)
}
0x114f   : > { %s4595_s2 = smov 128   ;;  %s4596_s9 = smov 8  }
0x1150   : > { %3302 = dma.vmem_to_hbm [thread:$0]  (%p6040_p12), %s5708_s29, 256, %s5713_s28, %s2554_s21, %s4595_s2, %s4595_s2, %s4596_s9  }
0x1151 PF: > { %s6043_s13 = sld [smem:[#allocation61_spill]]  ;;  %s6044_s3 = sld [smem:[#allocation64_spill]] }
0x1152   : > { %p6045_p5 = scmp.ne.s32.totalorder %s6012_s4, 0 }
0x1157   : > { %s2603_s30 = sand.u32 1, %s6043_s13   ;;  %p6046_p10 = scmp.ge.s32.totalorder %s6044_s3, 2 }
0x1158   : > { %s2604_s6 = scalar_lea.sflag [#allocation7], %s2603_s30 }
0x1159   : > { %p3366_p6 = pnand %p6046_p10, %p6045_p5 }
0x115b   : > { %4490 = dma.done.wait (!%p3366_p6), %s2604_s6, 256  }
0x115c   : > { %4492 = vsyncadd (!%p3366_p6), %s2604_s6, 4294967040  ;;  %s2613_s14 = scalar_lea.sflag [#allocation37], %s2603_s30 }
0x115d   : > { %4494 = dma.done.wait (!%p3366_p6), %s2613_s14, 128  }
0x115e   : > { %4496 = vsyncadd (!%p3366_p6), %s2613_s14, 4294967168  ;;  %s6047_s27 = sld [smem:[#allocation54_spill]]  ;;  %s6048_s28 = sld [smem:[#allocation56_spill]] }
0x115f   : > { %s6049_s0 = sld [smem:[#allocation58_spill]]  ;;  %s6050_s22 = sld [smem:[#allocation60_spill]] }
0x1160   : > { %s6051_s2 = sld [smem:[#allocation62_spill]]  ;;  %s6052_s25 = sld [smem:[#allocation63_spill]] }
0x1161   : > { %s6053_s8 = smov %s5387_s23  ;;  %p48_p12 = scmp.ge.s32.totalorder %s5375_s20, 4  }
0x1162   : > { %s5749_s3 = smov 0   ;;  %s5754_s29 = smov 0  }
0x1163   : > { %s5759_s4 = smov 0   ;;  %s6055_s30 = smov %s4527_s5 }
0x1164   : > { %s5764_s5 = smov 0   ;;  %s5769_s23 = smov 0  }
0x1165   : > { %s6056_s1 = smov %s4543_s24  ;;  %s5774_s24 = smov 0  }
0x1166   : > { %s6057_s26 = smov %s6053_s8  ;;  %50 = sbr.rel (!%p48_p12) target bundleno = 46 (0x2e), region = 236 }
0x116d   :  { %2618 = vsyncpa [#allocation6], 1 }
0x116e   :  { %2620 = vsyncpa [#allocation6 + $0x1], 1 }
0x116f   :  { %2621 = vsyncpa [#allocation9], 1 }
0x1170   :  { %2622 = vsyncpa [#allocation12], 1 }
0x1171   :  { %2623 = vsyncpa [#allocation15], 1 }
0x1172   :  { %2624 = vsyncpa [#allocation18], 1 }
0x1173   :  { %2625 = vsyncpa [#allocation21], 1 }
0x1174   :  { %2626 = vsyncpa [#allocation24], 1 }
0x1175   :  { %2627 = vsyncpa [#allocation27], 1 }
0x1176   :  { %2628 = vsyncpa [#allocation30], 1 }
0x1177   :  { %2629 = vsyncpa [#allocation33], 1 }
0x1178   :  { %2630 = vsyncpa [#allocation7], 1 }
0x1179   :  { %2632 = vsyncpa [#allocation7 + $0x1], 1 }
0x117a   :  { %2633 = vsyncpa [#allocation37], 1 }
0x117b   :  { %2635 = vsyncpa [#allocation37 + $0x1], 1 }

// kernel: tpu_custom_call.1
= control target key start
LH: loop header
LB: loop body
LE: loop exit
PB: predicated region body
PF: predicated region fallthrough
CT: control target
= control target key end

     0   :  { %s5790_s0 = inlined_call_operand.<no memory space> [shape: s32[1], index: 0, kind: input, shape index: {}]   ;;  %s5791_s1 = inlined_call_operand.hbm [shape: f32[2,16,128], index: 1, kind: input, shape index: {}]   ;;  %s5792_s2 = inlined_call_operand.hbm [shape: bf16[128,384], index: 2, kind: input, shape index: {}]   ;;  %s5793_s3 = inlined_call_operand.hbm [shape: f32[1,384], index: 3, kind: input, shape index: {}]   ;;  %s5794_s4 = inlined_call_operand.hbm [shape: bf16[128,128], index: 4, kind: input, shape index: {}]   ;;  %s5795_s5 = inlined_call_operand.hbm [shape: f32[1,128], index: 5, kind: input, shape index: {}]   ;;  %s5796_s6 = inlined_call_operand.hbm [shape: f32[1,128], index: 6, kind: input, shape index: {}]   ;;  %s5797_s7 = inlined_call_operand.hbm [shape: f32[1,128], index: 7, kind: input, shape index: {}]   ;;  %s5798_s8 = inlined_call_operand.hbm [shape: bf16[128,256], index: 8, kind: input, shape index: {}]   ;;  %s5799_s9 = inlined_call_operand.hbm [shape: f32[1,256], index: 9, kind: input, shape index: {}]   ;;  %s5800_s10 = inlined_call_operand.hbm [shape: bf16[256,128], index: 10, kind: input, shape index: {}]   ;;  %s5801_s11 = inlined_call_operand.hbm [shape: f32[1,128], index: 11, kind: input, shape index: {}]   ;;  %s5802_s12 = inlined_call_operand.hbm [shape: f32[1,128], index: 12, kind: input, shape index: {}]   ;;  %s5803_s13 = inlined_call_operand.hbm [shape: f32[1,128], index: 13, kind: input, shape index: {}]   ;;  %s5804_s14 = inlined_call_operand.hbm [shape: bf16[3,128,128], index: 14, kind: input, shape index: {}]   ;;  %s5805_s15 = inlined_call_operand.hbm [shape: f32[3,1,128], index: 15, kind: input, shape index: {}]   ;;  %s5806_s16 = inlined_call_operand.hbm [shape: bf16[3,128,128], index: 16, kind: input, shape index: {}]   ;;  %s5807_s17 = inlined_call_operand.hbm [shape: f32[3,1,128], index: 17, kind: input, shape index: {}]   ;;  %s5808_s18 = inlined_call_operand.hbm [shape: f32[3,1,128], index: 18, kind: input, shape index: {}]   ;;  %s5809_s19 = inlined_call_operand.hbm [shape: f32[3,1,128], index: 19, kind: input, shape index: {}]   ;;  %s5810_s20 = inlined_call_operand.hbm [shape: f32[2,16,128], index: 20, kind: output, shape index: {0}]   ;;  %s5811_s21 = inlined_call_operand.hbm [shape: bf16[2,16,128], index: 21, kind: output, shape index: {1}]  }
   0x1   :  { %5885 = sst [smem:[#allocation66_spill]] %s5790_s0 }
   0x2   :  { %5886 = sst [smem:[#allocation67_spill]] %s5791_s1  ;;  %s5907_s26 = sld [smem:[#allocation66_spill]] }
   0x3   :  { %5887 = sst [smem:[#allocation68_spill]] %s5792_s2 }
   0x4   :  { %5888 = sst [smem:[#allocation69_spill]] %s5793_s3 }
   0x5   :  { %5889 = sst [smem:[#allocation70_spill]] %s5794_s4 }
   0x6   :  { %5890 = sst [smem:[#allocation71_spill]] %s5795_s5 }
   0x7   :  { %5891 = sst [smem:[#allocation72_spill]] %s5796_s6 }
   0x8   :  { %5892 = sst [smem:[#allocation73_spill]] %s5797_s7 }
   0x9   :  { %5893 = sst [smem:[#allocation74_spill]] %s5798_s8 }
   0xa   :  { %5894 = sst [smem:[#allocation75_spill]] %s5799_s9 }
   0xb   :  { %5895 = sst [smem:[#allocation76_spill]] %s5800_s10 }
   0xc   :  { %5896 = sst [smem:[#allocation77_spill]] %s5801_s11 }
   0xd   :  { %5897 = sst [smem:[#allocation78_spill]] %s5802_s12 }
   0xe   :  { %5898 = sst [smem:[#allocation79_spill]] %s5803_s13 }
   0xf   :  { %5899 = sst [smem:[#allocation80_spill]] %s5804_s14 }
  0x10   :  { %5900 = sst [smem:[#allocation81_spill]] %s5805_s15 }
  0x11   :  { %5901 = sst [smem:[#allocation82_spill]] %s5806_s16 }
  0x12   :  { %5902 = sst [smem:[#allocation83_spill]] %s5807_s17 }
  0x13   :  { %5903 = sst [smem:[#allocation84_spill]] %s5808_s18 }
  0x14   :  { %5904 = sst [smem:[#allocation85_spill]] %s5809_s19 }
  0x15   :  { %5905 = sst [smem:[#allocation86_spill]] %s5810_s20 }
  0x16   :  { %5906 = sst [smem:[#allocation87_spill]] %s5811_s21 }
  0x17   :  { %27 = sst [smem:[#allocation4]] %s5907_s26 }
  0x18   :  { %28 = vsyncpa [#allocation6], 0 }
  0x19   :  { %30 = vsyncpa [#allocation6 + $0x1], 0 }
  0x1a   :  { %31 = vsyncpa [#allocation9], 0 }
  0x1b   :  { %32 = vsyncpa [#allocation12], 0 }
  0x1c   :  { %33 = vsyncpa [#allocation15], 0 }
  0x1d   :  { %34 = vsyncpa [#allocation18], 0 }
  0x1e   :  { %35 = vsyncpa [#allocation21], 0 }
  0x1f   :  { %36 = vsyncpa [#allocation24], 0 }
  0x20   :  { %37 = vsyncpa [#allocation27], 0 }
  0x21   :  { %38 = vsyncpa [#allocation30], 0 }
  0x22   :  { %39 = vsyncpa [#allocation33], 0 }
  0x23   :  { %40 = vsyncpa [#allocation7], 0 }
  0x24   :  { %42 = vsyncpa [#allocation7 + $0x1], 0 }
  0x25   :  { %43 = vsyncpa [#allocation37], 0 }
  0x26   :  { %45 = vsyncpa [#allocation37 + $0x1], 0  ;;  %s4710_s27 = smov 0   ;;  %s4712_s3 = smov 0  }
  0x27   :  { %s4714_s28 = smov 0   ;;  %s4716_s29 = smov 0  }
  0x28   :  { %s4718_s0 = smov 0   ;;  %s4720_s4 = smov 0  }
  0x29   :  { %s4722_s30 = smov 0   ;;  %s4724_s5 = smov 0  }
  0x2a   :  { %s4726_s22 = smov 0   ;;  %s4728_s23 = smov 0  }
  0x2b   :  { %s4730_s1 = smov 0   ;;  %s4732_s24 = smov 0  }
  0x2c   :  { %s4734_s2 = smov 0   ;;  %s4736_s25 = smov 0  }
  0x2d   :  { %s4738_s26 = smov 0   ;;  %s4740_s20 = smov 0  }
  0x2e LB: > { %5908 = sst [smem:[#allocation53_spill]] %s4499_s27  ;;  %s4791_s21 = sadd.s32 4294967295, %s4559_s20   ;;  %s4559_s20 = sphi %s4740_s20, %s5375_s20   ;;  %s4555_s26 = sphi %s4738_s26, %s6057_s26   ;;  %s4551_s25 = sphi %s4736_s25, %s6052_s25   ;;  %s4547_s2 = sphi %s4734_s2, %s6051_s2   ;;  %s4543_s24 = sphi %s4732_s24, %s5774_s24   ;;  %s4539_s1 = sphi %s4730_s1, %s6056_s1   ;;  %s4535_s23 = sphi %s4728_s23, %s5769_s23   ;;  %s4531_s22 = sphi %s4726_s22, %s6050_s22   ;;  %s4527_s5 = sphi %s4724_s5, %s5764_s5   ;;  %s4523_s30 = sphi %s4722_s30, %s6055_s30   ;;  %s4519_s4 = sphi %s4720_s4, %s5759_s4   ;;  %s4515_s0 = sphi %s4718_s0, %s6049_s0   ;;  %s4511_s29 = sphi %s4716_s29, %s5754_s29   ;;  %s4507_s28 = sphi %s4714_s28, %s6048_s28   ;;  %s4503_s3 = sphi %s4712_s3, %s5749_s3   ;;  %s4499_s27 = sphi %s4710_s27, %s6047_s27  }
  0x2f   : > { %5909 = sst [smem:[#allocation54_spill]] %s4503_s3  ;;  %s4793_s19 = sld [smem:[#allocation4]] }
  0x30   : > { %5910 = sst [smem:[#allocation55_spill]] %s4507_s28  ;;  %p5833_p0 = scmp.eq.s32.totalorder %s4791_s21, 0 }
  0x31   : > { %5911 = sst [smem:[#allocation56_spill]] %s4511_s29  ;;  %p2877_p1 = scmp.ge.s32.totalorder %s4559_s20, 1 }
  0x32   : > { %5912 = sst [smem:[#allocation57_spill]] %s4515_s0  ;;  %p554_p2 = scmp.lt.s32.totalorder %s4559_s20, 3 }
  0x33   : > { %5913 = sst [smem:[#allocation58_spill]] %s4519_s4  ;;  %s4562_s17 = smov [#allocation11]  }
  0x34   : > { %5914 = sst [smem:[#allocation59_spill]] %s4531_s22  ;;  %p4798_p3 = pnand %p2877_p1, %p554_p2 }
  0x35   : > { %5915 = sst [smem:[#allocation60_spill]] %s4535_s23  ;;  %s590_s15 = sshll.u32 %s4562_s17, 4  ;;  %s4817_s15 = int_to_ptr.vmem [resolvable:$true] %s590_s15 }
  0x36   : > { %5916 = sst [smem:[#allocation61_spill]] %s4547_s2  ;;  %p4804_p4 = pneg %p4798_p3 }
  0x37   : > { %5917 = sst [smem:[#allocation62_spill]] %s4551_s25  ;;  %s4561_s25 = smov [#allocation8]  }
  0x38   : > { %5918 = sst [smem:[#allocation63_spill]] %s4555_s26  ;;  %s566_s26 = sshll.u32 %s4561_s25, 4  ;;  %s567_s26 = int_to_ptr.vmem [resolvable:$true] %s566_s26 }
  0x39   : > { %5919 = sst [smem:[#allocation64_spill]] %s4559_s20  ;;  %p4813_p6 = pnand %p4804_p4, %p5833_p0 }
  0x3a   : > { %s5920_s2 = scalar_select %p4798_p3, 1, 0 }
  0x3b   : > { %s5922_s3 = scalar_select %p4804_p4, 1, 0 }
  0x3c   : > { %5921 = sst [smem:[#allocation65_spill]] %s5920_s2  ;;  %p4827_p8 = pneg %p4813_p6 }
  0x3d   : > { %s5923_s27 = scalar_select %p4813_p6, 1, 0 }
  0x3e   : > { %s5924_s4 = sld [smem:[#allocation68_spill]] }
  0x3f   : > { %s5926_s20 = scalar_select %p4827_p8, 1, 0 }
  0x44   : > { %s5925_s13 = smov %s5924_s4  ;;  %s3747_s0 = scalar_lea.hbm %s5924_s4, 3072 }
  0x45   : > { %p3748_p7 = scmp.ne.s32.totalorder %s5925_s13, %s3747_s0  ;;  %p3754_p11 = scmp.lt.u32.totalorder %s3747_s0, %s5925_s13 }
  0x47   : > { %p3750_p9 = pnand %p4827_p8, %p3748_p7 }
  0x49   : > { %p3751_p10 = pneg %p3750_p9 }
  0x4b   : > { %p3756_p12 = pnand %p3754_p11, %p3751_p10 }
  0x4d   : > { %3759 = shalt.err (!%p3756_p12)
}
  0x4e   : > { %s3760_s4 = scalar_lea.vmem %s567_s26, 3072  ;;  %p3768_p5 = scmp.lt.s32.totalorder %s567_s26, %s567_s26 }
  0x4f   : > { %p3761_p13 = scmp.ne.s32.totalorder %s567_s26, %s3760_s4  ;;  %p3769_p0 = scmp.lt.s32.totalorder %s3760_s4, %s3760_s4 }
  0x51   : > { %p3763_p1 = pnand %p3761_p13, %p4827_p8  ;;  %p3770_p3 = por %p3769_p0, %p3768_p5 }
  0x53   : > { %p3764_p2 = pneg %p3763_p1 }
  0x55   : > { %p3771_p4 = pnand %p3770_p3, %p3764_p2 }
  0x57   : > { %3774 = shalt.err (!%p3771_p4)
}
  0x58   : > { %s4563_s22 = smov 192   ;;  %s4564_s23 = smov 12  }
  0x59   : > { %3309 = dma.hbm_to_vmem [thread:$0]  (!%p4813_p6), %s5925_s13, 3072, %s567_s26, [#allocation9], %s4563_s22, %s4563_s22, %s4564_s23  }
  0x5a   : > { %s5927_s17 = sld [smem:[#allocation70_spill]] }
  0x60   : > { %s3775_s9 = scalar_lea.hbm %s5927_s17, 1024 }
  0x61   : > { %p3776_p7 = scmp.ne.s32.totalorder %s5927_s17, %s3775_s9  ;;  %p3782_p4 = scmp.lt.u32.totalorder %s3775_s9, %s5927_s17 }
  0x63   : > { %p3778_p0 = pnand %p3776_p7, %p4827_p8 }
  0x65   : > { %p3779_p3 = pneg %p3778_p0 }
  0x67   : > { %p3784_p5 = pnand %p3782_p4, %p3779_p3 }
  0x69   : > { %3787 = shalt.err (!%p3784_p5)
}
  0x6a   : > { %s3788_s26 = scalar_lea.vmem %s4817_s15, 1024  ;;  %p3796_p12 = scmp.lt.s32.totalorder %s4817_s15, %s4817_s15 }
  0x6b   : > { %p3789_p9 = scmp.ne.s32.totalorder %s4817_s15, %s3788_s26  ;;  %p3797_p13 = scmp.lt.s32.totalorder %s3788_s26, %s3788_s26 }
  0x6d   : > { %p3791_p10 = pnand %p3789_p9, %p4827_p8  ;;  %p3798_p1 = por %p3797_p13, %p3796_p12 }
  0x6f   : > { %p3792_p11 = pneg %p3791_p10 }
  0x71   : > { %p3799_p2 = pnand %p3798_p1, %p3792_p11 }
  0x73   : > { %3802 = shalt.err (!%p3799_p2)
}
  0x74   : > { %s5842_s7 = smov 64   ;;  %s5844_s9 = smov 4  }
  0x75   : > { %3315 = dma.hbm_to_vmem [thread:$0]  (!%p4813_p6), %s5927_s17, 1024, %s4817_s15, [#allocation12], %s5842_s7, %s5842_s7, %s5844_s9  }
  0x76   : > { %s4567_s22 = smov [#allocation14]   ;;  %s4568_s11 = smov [#allocation17]  }
  0x77   : > { %s615_s23 = sshll.u32 %s4567_s22, 4  ;;  %s636_s0 = sshll.u32 %s4568_s11, 4  ;;  %s616_s23 = int_to_ptr.vmem [resolvable:$true] %s615_s23  ;;  %s637_s0 = int_to_ptr.vmem [resolvable:$true] %s636_s0 }
  0x78   : > { %s5928_s6 = sld [smem:[#allocation72_spill]] }
  0x7e   : > { %s3803_s4 = scalar_lea.hbm %s5928_s6, 16 }
  0x7f   : > { %p3804_p7 = scmp.ne.s32.totalorder %s5928_s6, %s3803_s4  ;;  %p3810_p4 = scmp.lt.u32.totalorder %s3803_s4, %s5928_s6 }
  0x81   : > { %p3806_p0 = pnand %p3804_p7, %p4827_p8 }
  0x83   : > { %p3807_p3 = pneg %p3806_p0 }
  0x85   : > { %p3812_p5 = pnand %p3810_p4, %p3807_p3 }
  0x87   : > { %3815 = shalt.err (!%p3812_p5)
}
  0x88   : > { %s3816_s15 = scalar_lea.vmem %s616_s23, 16  ;;  %s3823_s18 = scalar_lea.vmem %s616_s23, 32 }
  0x89   : > { %p3817_p9 = scmp.ne.s32.totalorder %s616_s23, %s3816_s15  ;;  %p3824_p12 = scmp.lt.s32.totalorder %s616_s23, %s616_s23 }
  0x8a   : > { %p3825_p13 = scmp.lt.s32.totalorder %s3823_s18, %s3816_s15 }
  0x8b   : > { %p3819_p10 = pnand %p3817_p9, %p4827_p8 }
  0x8c   : > { %p3826_p1 = por %p3825_p13, %p3824_p12 }
  0x8d   : > { %p3820_p11 = pneg %p3819_p10 }
  0x8f   : > { %p3827_p2 = pnand %p3826_p1, %p3820_p11 }
  0x91   : > { %3830 = shalt.err (!%p3827_p2)
}
  0x92   : > { %3321 = dma.hbm_to_vmem [thread:$0]  (!%p4813_p6), %s5928_s6, 16, %s616_s23, [#allocation15]  }
  0x93   : > { %s5929_s8 = sld [smem:[#allocation74_spill]] }
  0x99   : > { %s3831_s22 = scalar_lea.hbm %s5929_s8, 2048 }
  0x9a   : > { %p3832_p7 = scmp.ne.s32.totalorder %s5929_s8, %s3831_s22  ;;  %p3838_p4 = scmp.lt.u32.totalorder %s3831_s22, %s5929_s8 }
  0x9c   : > { %p3834_p0 = pnand %p3832_p7, %p4827_p8 }
  0x9e   : > { %p3835_p3 = pneg %p3834_p0 }
  0xa0   : > { %p3840_p5 = pnand %p3838_p4, %p3835_p3 }
  0xa2   : > { %3843 = shalt.err (!%p3840_p5)
}
  0xa3   : > { %s3844_s26 = scalar_lea.vmem %s637_s0, 2048  ;;  %p3852_p12 = scmp.lt.s32.totalorder %s637_s0, %s637_s0 }
  0xa4   : > { %p3845_p9 = scmp.ne.s32.totalorder %s637_s0, %s3844_s26  ;;  %p3853_p13 = scmp.lt.s32.totalorder %s3844_s26, %s3844_s26 }
  0xa6   : > { %p3847_p10 = pnand %p3845_p9, %p4827_p8  ;;  %p3854_p1 = por %p3853_p13, %p3852_p12 }
  0xa8   : > { %p3848_p11 = pneg %p3847_p10 }
  0xaa   : > { %p3855_p2 = pnand %p3854_p1, %p3848_p11 }
  0xac   : > { %3858 = shalt.err (!%p3855_p2)
}
  0xad   : > { %s5863_s23 = smov 128   ;;  %s5858_s15 = smov 8  }
  0xae   : > { %3327 = dma.hbm_to_vmem [thread:$0]  (!%p4813_p6), %s5929_s8, 2048, %s637_s0, [#allocation18], %s5863_s23, %s5863_s23, %s5858_s15  }
  0xaf   : > { %s4571_s29 = smov [#allocation20]   ;;  %s4572_s28 = smov [#allocation23]  }
  0xb0   : > { %s660_s16 = sshll.u32 %s4571_s29, 4  ;;  %s685_s22 = sshll.u32 %s4572_s28, 4  ;;  %s661_s16 = int_to_ptr.vmem [resolvable:$true] %s660_s16  ;;  %s686_s22 = int_to_ptr.vmem [resolvable:$true] %s685_s22 }
  0xb1   : > { %s5930_s10 = sld [smem:[#allocation76_spill]] }
  0xb7   : > { %s3859_s25 = scalar_lea.hbm %s5930_s10, 2048 }
  0xb8   : > { %p3860_p7 = scmp.ne.s32.totalorder %s5930_s10, %s3859_s25  ;;  %p3866_p4 = scmp.lt.u32.totalorder %s3859_s25, %s5930_s10 }
  0xba   : > { %p3862_p0 = pnand %p3860_p7, %p4827_p8 }
  0xbc   : > { %p3863_p3 = pneg %p3862_p0 }
  0xbe   : > { %p3868_p5 = pnand %p3866_p4, %p3863_p3 }
  0xc0   : > { %3871 = shalt.err (!%p3868_p5)
}
  0xc1   : > { %s3872_s0 = scalar_lea.vmem %s661_s16, 2048  ;;  %p3880_p12 = scmp.lt.s32.totalorder %s661_s16, %s661_s16 }
  0xc2   : > { %p3873_p9 = scmp.ne.s32.totalorder %s661_s16, %s3872_s0  ;;  %p3881_p13 = scmp.lt.s32.totalorder %s3872_s0, %s3872_s0 }
  0xc4   : > { %p3875_p10 = pnand %p3873_p9, %p4827_p8  ;;  %p3882_p1 = por %p3881_p13, %p3880_p12 }
  0xc6   : > { %p3876_p11 = pneg %p3875_p10 }
  0xc8   : > { %p3883_p2 = pnand %p3882_p1, %p3876_p11 }
  0xca   : > { %3886 = shalt.err (!%p3883_p2)
}
  0xcb   : > { %s5931_s18 = smov 4   ;;  %s5932_s13 = smov 64  }
  0xcc   : > { %3333 = dma.hbm_to_vmem [thread:$0]  (!%p4813_p6), %s5930_s10, 2048, %s661_s16, [#allocation21], %s5932_s13, %s5932_s13, %s5931_s18  }
  0xcd   : > { %s5933_s12 = sld [smem:[#allocation78_spill]] }
  0xd3   : > { %s3887_s11 = scalar_lea.hbm %s5933_s12, 16 }
  0xd4   : > { %p3888_p7 = scmp.ne.s32.totalorder %s5933_s12, %s3887_s11  ;;  %p3894_p4 = scmp.lt.u32.totalorder %s3887_s11, %s5933_s12 }
  0xd6   : > { %p3890_p0 = pnand %p3888_p7, %p4827_p8 }
  0xd8   : > { %p3891_p3 = pneg %p3890_p0 }
  0xda   : > { %p3896_p5 = pnand %p3894_p4, %p3891_p3 }
  0xdc   : > { %3899 = shalt.err (!%p3896_p5)
}
  0xdd   : > { %s3900_s0 = scalar_lea.vmem %s686_s22, 16  ;;  %s3907_s16 = scalar_lea.vmem %s686_s22, 32 }
  0xde   : > { %p3901_p9 = scmp.ne.s32.totalorder %s686_s22, %s3900_s0  ;;  %p3908_p12 = scmp.lt.s32.totalorder %s686_s22, %s686_s22 }
  0xdf   : > { %p3909_p13 = scmp.lt.s32.totalorder %s3907_s16, %s3900_s0 }
  0xe0   : > { %p3903_p10 = pnand %p3901_p9, %p4827_p8 }
  0xe1   : > { %p3910_p1 = por %p3909_p13, %p3908_p12 }
  0xe2   : > { %p3904_p11 = pneg %p3903_p10 }
  0xe4   : > { %p3911_p2 = pnand %p3910_p1, %p3904_p11 }
  0xe6   : > { %3914 = shalt.err (!%p3911_p2)
}
  0xe7   : > { %3339 = dma.hbm_to_vmem [thread:$0]  (!%p4813_p6), %s5933_s12, 16, %s686_s22, [#allocation24]  }
  0xe8   : > { %s3026_s29 = sshll.u32 %s4793_s19, 10  ;;  %p351_p7 = scmp.ne.s32.totalorder %s4543_s24, %s4539_s1 }
  0xe9   : > { %s5934_s14 = sld [smem:[#allocation80_spill]]  ;;  %p5935_p0 = scmp.eq.s32.totalorder %s4791_s21, 0 }
  0xea   : > { %s4573_s4 = smov [#allocation26]   ;;  %p5937_p4 = scmp.ne.s32.totalorder %s5922_s3, 0 }
  0xeb   : > { %p4957_p3 = por %p351_p7, %p5935_p0  ;;  %s710_s22 = sshll.u32 %s4573_s4, 4  ;;  %s4961_s22 = int_to_ptr.vmem [resolvable:$true] %s710_s22 }
  0xec   : > { %s5938_s0 = sld [smem:[#allocation82_spill]] }
  0xed   : > { %s5936_s25 = scalar_select %p4957_p3, 1, 0 }
  0xee   : > { %p5846_p5 = pnand %p5937_p4, %p4957_p3 }
  0xef   : > { %s4953_s2 = scalar_lea.hbm %s5934_s14, %s3026_s29  ;;  %s3920_s1 = scalar_lea.hbm %s5934_s14, 3072 }
  0xf0   : > { %s3915_s9 = scalar_lea.hbm %s4953_s2, 1024  ;;  %p4981_p11 = pneg %p5846_p5 }
  0xf1   : > { %p3916_p10 = scmp.ne.s32.totalorder %s4953_s2, %s3915_s9  ;;  %p3921_p1 = scmp.lt.u32.totalorder %s4953_s2, %s5934_s14 }
  0xf2   : > { %s5939_s16 = smov %s5938_s0  ;;  %s4970_s7 = scalar_lea.hbm %s5938_s0, %s3026_s29 }
  0xf3   : > { %p3918_p12 = pnand %p4981_p11, %p3916_p10  ;;  %p3922_p2 = scmp.lt.u32.totalorder %s3920_s1, %s3915_s9 }
  0xf4   : > { %p3924_p0 = scmp.lt.u32.totalorder %s3915_s9, %s4953_s2 }
  0xf5   : > { %p3919_p13 = pneg %p3918_p12  ;;  %p3923_p7 = por %p3922_p2, %p3921_p1 }
  0xf7   : > { %p3925_p9 = por %p3924_p0, %p3923_p7 }
  0xf9   : > { %p3926_p5 = pnand %p3925_p9, %p3919_p13 }
  0xfb   : > { %3929 = shalt.err (!%p3926_p5)
}
  0xfc   : > { %s3930_s0 = scalar_lea.vmem %s4961_s22, 1024  ;;  %p3938_p8 = scmp.lt.s32.totalorder %s4961_s22, %s4961_s22 }
  0xfd   : > { %p3931_p10 = scmp.ne.s32.totalorder %s4961_s22, %s3930_s0  ;;  %p3939_p3 = scmp.lt.s32.totalorder %s3930_s0, %s3930_s0 }
  0xff   : > { %p3933_p12 = pnand %p3931_p10, %p4981_p11  ;;  %p3940_p4 = por %p3939_p3, %p3938_p8 }
 0x101   : > { %p3934_p6 = pneg %p3933_p12 }
 0x103   : > { %p3941_p1 = pnand %p3940_p4, %p3934_p6 }
 0x105   : > { %3944 = shalt.err (!%p3941_p1)
}
 0x106   : > { %p5941_p2 = scmp.ne.s32.totalorder %s5922_s3, 0  ;;  %p5942_p9 = scmp.ne.s32.totalorder %s5936_s25, 0 }
 0x107   : > { %p5944_p6 = scmp.eq.s32.totalorder %s4791_s21, 0  ;;  %p5945_p8 = scmp.ne.s32.totalorder %s4527_s5, %s4523_s30 }
 0x108   : > { %p5943_p5 = pnand %p5941_p2, %p5942_p9  ;;  %s4574_s28 = smov [#allocation29]  }
 0x109   : > { %p5016_p3 = por %p5945_p8, %p5944_p6  ;;  %s741_s11 = sshll.u32 %s4574_s28, 4  ;;  %s742_s11 = int_to_ptr.vmem [resolvable:$true] %s741_s11 }
 0x10a   : > { %3345 = dma.hbm_to_vmem [thread:$0]  (!%p5943_p5), %s4953_s2, 1024, %s4961_s22, [#allocation27], %s5932_s13, %s5932_s13, %s5931_s18  }
 0x10b   : > { %s5946_s9 = scalar_select %p5016_p3, 1, 0 }
 0x10c   : > { %p5854_p4 = pnand %p5941_p2, %p5016_p3  ;;  %s3945_s4 = scalar_lea.hbm %s4970_s7, 1024 }
 0x10d   : > { %p3946_p11 = scmp.ne.s32.totalorder %s4970_s7, %s3945_s4  ;;  %s3950_s1 = scalar_lea.hbm %s5939_s16, 3072 }
 0x10e   : > { %p5031_p13 = pneg %p5854_p4  ;;  %p3951_p10 = scmp.lt.u32.totalorder %s4970_s7, %s5939_s16 }
 0x10f   : > { %p3952_p12 = scmp.lt.u32.totalorder %s3950_s1, %s3945_s4  ;;  %p3954_p9 = scmp.lt.u32.totalorder %s3945_s4, %s4970_s7 }
 0x110   : > { %p3948_p7 = pnand %p5031_p13, %p3946_p11 }
 0x111   : > { %p3953_p1 = por %p3952_p12, %p3951_p10 }
 0x112   : > { %p3949_p0 = pneg %p3948_p7 }
 0x113   : > { %p3955_p5 = por %p3954_p9, %p3953_p1 }
 0x115   : > { %p3956_p6 = pnand %p3955_p5, %p3949_p0 }
 0x117   : > { %3959 = shalt.err (!%p3956_p6)
}
 0x118   : > { %s3960_s0 = scalar_lea.vmem %s742_s11, 1024  ;;  %p3968_p4 = scmp.lt.s32.totalorder %s742_s11, %s742_s11 }
 0x119   : > { %p3961_p8 = scmp.ne.s32.totalorder %s742_s11, %s3960_s0  ;;  %p3969_p3 = scmp.lt.s32.totalorder %s3960_s0, %s3960_s0 }
 0x11b   : > { %p3963_p11 = pnand %p3961_p8, %p5031_p13  ;;  %p3970_p2 = por %p3969_p3, %p3968_p4 }
 0x11d   : > { %p3964_p7 = pneg %p3963_p11 }
 0x11f   : > { %p3971_p10 = pnand %p3970_p2, %p3964_p7 }
 0x121   : > { %3974 = shalt.err (!%p3971_p10)
}
 0x122   : > { %p5948_p12 = scmp.ne.s32.totalorder %s5922_s3, 0  ;;  %p5949_p1 = scmp.ne.s32.totalorder %s5946_s9, 0 }
 0x123   : > { %s5951_s28 = sld [smem:[#allocation55_spill]]  ;;  %s5952_s4 = sld [smem:[#allocation56_spill]] }
 0x124   : > { %p5950_p9 = pnand %p5948_p12, %p5949_p1  ;;  %s5059_s2 = sshll.u32 %s4793_s19, 4 }
 0x125   : > { %s5953_s1 = sld [smem:[#allocation84_spill]]  ;;  %p5955_p2 = scmp.eq.s32.totalorder %s4791_s21, 0 }
 0x126   : > { %3351 = dma.hbm_to_vmem [thread:$0]  (!%p5950_p9), %s4970_s7, 1024, %s742_s11, [#allocation30], %s5932_s13, %s5932_s13, %s5931_s18  }
 0x127   : > { %s4575_s18 = smov [#allocation32]   ;;  %s4576_s19 = smov [#allocation10]  }
 0x128   : > { %s772_s13 = sshll.u32 %s4575_s18, 4  ;;  %s580_s7 = sshll.u32 %s4576_s19, 4  ;;  %s5073_s13 = int_to_ptr.vmem [resolvable:$true] %s772_s13  ;;  %s5079_s7 = int_to_ptr.vmem [resolvable:$true] %s580_s7 }
 0x129   : > { %p463_p13 = scmp.ne.s32.totalorder %s5952_s4, %s5951_s28  ;;  %s4577_s11 = smov [#allocation13]  }
 0x12a   : > { %s5081_s0 = sshll.u32 %s4577_s11, 4  ;;  %s605_s0 = int_to_ptr.vmem [resolvable:$true] %s5081_s0 }
 0x12b   : > { %s5954_s15 = smov %s5953_s1  ;;  %s5065_s29 = scalar_lea.hbm %s5953_s1, %s5059_s2 }
 0x12c   : > { %p5069_p3 = por %p463_p13, %p5955_p2  ;;  %s3975_s28 = scalar_lea.hbm %s5065_s29, 16 }
 0x12d   : > { %p3976_p0 = scmp.ne.s32.totalorder %s5065_s29, %s3975_s28  ;;  %s3980_s1 = scalar_lea.hbm %s5954_s15, 48 }
 0x12e   : > { %s5956_s26 = scalar_select %p5069_p3, 1, 0 }
 0x12f   : > { %p5859_p4 = pnand %p5948_p12, %p5069_p3  ;;  %p3981_p11 = scmp.lt.u32.totalorder %s5065_s29, %s5954_s15 }
 0x130   : > { %p3982_p7 = scmp.lt.u32.totalorder %s3980_s1, %s3975_s28  ;;  %p3984_p1 = scmp.lt.u32.totalorder %s3975_s28, %s5065_s29 }
 0x131   : > { %p5090_p5 = pneg %p5859_p4 }
 0x132   : > { %p3983_p10 = por %p3982_p7, %p3981_p11 }
 0x133   : > { %p3978_p6 = pnand %p5090_p5, %p3976_p0 }
 0x134   : > { %p3985_p9 = por %p3984_p1, %p3983_p10 }
 0x135   : > { %p3979_p8 = pneg %p3978_p6 }
 0x137   : > { %p3986_p13 = pnand %p3985_p9, %p3979_p8 }
 0x139   : > { %3989 = shalt.err (!%p3986_p13)
}
 0x13a   : > { %s3990_s11 = scalar_lea.vmem %s5073_s13, 16  ;;  %s3997_s30 = scalar_lea.vmem %s5073_s13, 32 }
 0x13b   : > { %p3991_p2 = scmp.ne.s32.totalorder %s5073_s13, %s3990_s11  ;;  %p3998_p4 = scmp.lt.s32.totalorder %s5073_s13, %s5073_s13 }
 0x13c   : > { %p3999_p3 = scmp.lt.s32.totalorder %s3997_s30, %s3990_s11 }
 0x13d   : > { %p3993_p0 = pnand %p3991_p2, %p5090_p5 }
 0x13e   : > { %p4000_p12 = por %p3999_p3, %p3998_p4 }
 0x13f   : > { %p3994_p6 = pneg %p3993_p0 }
 0x141   : > { %p4001_p11 = pnand %p4000_p12, %p3994_p6 }
 0x143   : > { %4004 = shalt.err (!%p4001_p11)
}
 0x144   : > { %p5958_p8 = scmp.ne.s32.totalorder %s5922_s3, 0  ;;  %p5959_p7 = scmp.ne.s32.totalorder %s5956_s26, 0 }
 0x145   : > { %s5961_s22 = sld [smem:[#allocation69_spill]]  ;;  %p5963_p3 = scmp.ne.s32.totalorder %s5926_s20, 0 }
 0x146   : > { %p5960_p10 = pnand %p5958_p8, %p5959_p7 }
 0x148   : > { %3357 = dma.hbm_to_vmem [thread:$0]  (!%p5960_p10), %s5065_s29, 16, %s5073_s13, [#allocation33]  }
 0x14b   : > { %s5962_s18 = smov %s5961_s22  ;;  %s4005_s1 = scalar_lea.hbm %s5961_s22, 48 }
 0x14c   : > { %p4006_p5 = scmp.ne.s32.totalorder %s5962_s18, %s4005_s1  ;;  %p4012_p1 = scmp.lt.u32.totalorder %s4005_s1, %s5962_s18 }
 0x14e   : > { %p4008_p12 = pnand %p4006_p5, %p5963_p3 }
 0x150   : > { %p4009_p4 = pneg %p4008_p12 }
 0x152   : > { %p4014_p9 = pnand %p4012_p1, %p4009_p4 }
 0x154   : > { %4017 = shalt.err (!%p4014_p9)
}
 0x155   : > { %s4018_s29 = scalar_lea.vmem %s5079_s7, 48  ;;  %s4025_s23 = scalar_lea.vmem %s5079_s7, 64 }
 0x156   : > { %p4019_p13 = scmp.ne.s32.totalorder %s5079_s7, %s4018_s29  ;;  %p4026_p6 = scmp.lt.s32.totalorder %s5079_s7, %s5079_s7 }
 0x157   : > { %p4027_p11 = scmp.lt.s32.totalorder %s4025_s23, %s4018_s29 }
 0x158   : > { %p4021_p2 = pnand %p4019_p13, %p5963_p3 }
 0x159   : > { %p4028_p7 = por %p4027_p11, %p4026_p6 }
 0x15a   : > { %p4022_p0 = pneg %p4021_p2 }
 0x15c   : > { %p4029_p10 = pnand %p4028_p7, %p4022_p0 }
 0x15e   : > { %4032 = shalt.err (!%p4029_p10)
}
 0x15f   : > { %p5964_p5 = scmp.ne.s32.totalorder %s5923_s27, 0  ;;  %s5965_s1 = sld [smem:[#allocation71_spill]] }
 0x161   : > { %3312 = dma.hbm_to_vmem [thread:$0]  (!%p5964_p5), %s5962_s18, 48, %s5079_s7, [#allocation9]  }
 0x165   : > { %s5966_s19 = smov %s5965_s1  ;;  %s4033_s11 = scalar_lea.hbm %s5965_s1, 16 }
 0x166   : > { %p4034_p12 = scmp.ne.s32.totalorder %s5966_s19, %s4033_s11  ;;  %p4040_p9 = scmp.lt.u32.totalorder %s4033_s11, %s5966_s19 }
 0x168   : > { %p4036_p4 = pnand %p4034_p12, %p5963_p3 }
 0x16a   : > { %p4037_p1 = pneg %p4036_p4 }
 0x16c   : > { %p4042_p13 = pnand %p4040_p9, %p4037_p1 }
 0x16e   : > { %4045 = shalt.err (!%p4042_p13)
}
 0x16f   : > { %s4046_s13 = scalar_lea.vmem %s605_s0, 16  ;;  %s4053_s7 = scalar_lea.vmem %s605_s0, 32 }
 0x170   : > { %p4047_p2 = scmp.ne.s32.totalorder %s605_s0, %s4046_s13  ;;  %p4054_p11 = scmp.lt.s32.totalorder %s605_s0, %s605_s0 }
 0x171   : > { %p4055_p7 = scmp.lt.s32.totalorder %s4053_s7, %s4046_s13 }
 0x172   : > { %p4049_p0 = pnand %p4047_p2, %p5963_p3 }
 0x173   : > { %p4056_p10 = por %p4055_p7, %p4054_p11 }
 0x174   : > { %p4050_p6 = pneg %p4049_p0 }
 0x176   : > { %p4057_p8 = pnand %p4056_p10, %p4050_p6 }
 0x178   : > { %4060 = shalt.err (!%p4057_p8)
}
 0x179   : > { %3318 = dma.hbm_to_vmem [thread:$0]  (!%p5964_p5), %s5966_s19, 16, %s605_s0, [#allocation12]  }
 0x17a   : > { %s4578_s4 = smov [#allocation16]   ;;  %s4579_s1 = smov [#allocation19]  }
 0x17b   : > { %s626_s22 = sshll.u32 %s4578_s4, 4  ;;  %s650_s11 = sshll.u32 %s4579_s1, 4  ;;  %s627_s22 = int_to_ptr.vmem [resolvable:$true] %s626_s22  ;;  %s651_s11 = int_to_ptr.vmem [resolvable:$true] %s650_s11 }
 0x17c   : > { %s5967_s23 = sld [smem:[#allocation73_spill]] }
 0x182   : > { %s5968_s8 = smov %s5967_s23  ;;  %s4061_s10 = scalar_lea.hbm %s5967_s23, 16 }
 0x183   : > { %p4062_p8 = scmp.ne.s32.totalorder %s5968_s8, %s4061_s10  ;;  %p4068_p1 = scmp.lt.u32.totalorder %s4061_s10, %s5968_s8 }
 0x185   : > { %p4064_p12 = pnand %p4062_p8, %p5963_p3 }
 0x187   : > { %p4065_p4 = pneg %p4064_p12 }
 0x189   : > { %p4070_p9 = pnand %p4068_p1, %p4065_p4 }
 0x18b   : > { %4073 = shalt.err (!%p4070_p9)
}
 0x18c   : > { %s4074_s0 = scalar_lea.vmem %s627_s22, 16  ;;  %s4081_s28 = scalar_lea.vmem %s627_s22, 32 }
 0x18d   : > { %p4075_p13 = scmp.ne.s32.totalorder %s627_s22, %s4074_s0  ;;  %p4082_p6 = scmp.lt.s32.totalorder %s627_s22, %s627_s22 }
 0x18e   : > { %p4083_p11 = scmp.lt.s32.totalorder %s4081_s28, %s4074_s0 }
 0x18f   : > { %p4077_p2 = pnand %p4075_p13, %p5963_p3 }
 0x190   : > { %p4084_p7 = por %p4083_p11, %p4082_p6 }
 0x191   : > { %p4078_p0 = pneg %p4077_p2 }
 0x193   : > { %p4085_p10 = pnand %p4084_p7, %p4078_p0 }
 0x195   : > { %4088 = shalt.err (!%p4085_p10)
}
 0x196   : > { %3324 = dma.hbm_to_vmem [thread:$0]  (!%p5964_p5), %s5968_s8, 16, %s627_s22, [#allocation15]  }
 0x197   : > { %s5969_s30 = sld [smem:[#allocation75_spill]] }
 0x19d   : > { %s5970_s13 = smov %s5969_s30  ;;  %s4089_s29 = scalar_lea.hbm %s5969_s30, 32 }
 0x19e   : > { %p4090_p8 = scmp.ne.s32.totalorder %s5970_s13, %s4089_s29  ;;  %p4096_p1 = scmp.lt.u32.totalorder %s4089_s29, %s5970_s13 }
 0x1a0   : > { %p4092_p12 = pnand %p4090_p8, %p5963_p3 }
 0x1a2   : > { %p4093_p4 = pneg %p4092_p12 }
 0x1a4   : > { %p4098_p9 = pnand %p4096_p1, %p4093_p4 }
 0x1a6   : > { %4101 = shalt.err (!%p4098_p9)
}
 0x1a7   : > { %s4102_s28 = scalar_lea.vmem %s651_s11, 32  ;;  %p4110_p6 = scmp.lt.s32.totalorder %s651_s11, %s651_s11 }
 0x1a8   : > { %p4103_p13 = scmp.ne.s32.totalorder %s651_s11, %s4102_s28  ;;  %p4111_p11 = scmp.lt.s32.totalorder %s4102_s28, %s4102_s28 }
 0x1aa   : > { %p4105_p2 = pnand %p4103_p13, %p5963_p3  ;;  %p4112_p7 = por %p4111_p11, %p4110_p6 }
 0x1ac   : > { %p4106_p0 = pneg %p4105_p2 }
 0x1ae   : > { %p4113_p10 = pnand %p4112_p7, %p4106_p0 }
 0x1b0   : > { %4116 = shalt.err (!%p4113_p10)
}
 0x1b1   : > { %3330 = dma.hbm_to_vmem [thread:$0]  (!%p5964_p5), %s5970_s13, 32, %s651_s11, [#allocation18]  }
 0x1b2   : > { %s4580_s1 = smov [#allocation22]   ;;  %s4581_s12 = smov [#allocation25]  }
 0x1b3   : > { %s674_s10 = sshll.u32 %s4580_s1, 4  ;;  %s696_s30 = sshll.u32 %s4581_s12, 4  ;;  %s675_s10 = int_to_ptr.vmem [resolvable:$true] %s674_s10  ;;  %s697_s30 = int_to_ptr.vmem [resolvable:$true] %s696_s30 }
 0x1b4   : > { %s5971_s7 = sld [smem:[#allocation77_spill]] }
 0x1ba   : > { %s4117_s6 = scalar_lea.hbm %s5971_s7, 16 }
 0x1bb   : > { %p4118_p8 = scmp.ne.s32.totalorder %s5971_s7, %s4117_s6  ;;  %p4124_p1 = scmp.lt.u32.totalorder %s4117_s6, %s5971_s7 }
 0x1bd   : > { %p4120_p12 = pnand %p4118_p8, %p5963_p3 }
 0x1bf   : > { %p4121_p4 = pneg %p4120_p12 }
 0x1c1   : > { %p4126_p9 = pnand %p4124_p1, %p4121_p4 }
 0x1c3   : > { %4129 = shalt.err (!%p4126_p9)
}
 0x1c4   : > { %s4130_s11 = scalar_lea.vmem %s675_s10, 16  ;;  %s4137_s4 = scalar_lea.vmem %s675_s10, 32 }
 0x1c5   : > { %p4131_p13 = scmp.ne.s32.totalorder %s675_s10, %s4130_s11  ;;  %p4138_p6 = scmp.lt.s32.totalorder %s675_s10, %s675_s10 }
 0x1c6   : > { %p4139_p11 = scmp.lt.s32.totalorder %s4137_s4, %s4130_s11 }
 0x1c7   : > { %p4133_p2 = pnand %p4131_p13, %p5963_p3 }
 0x1c8   : > { %p4140_p7 = por %p4139_p11, %p4138_p6 }
 0x1c9   : > { %p4134_p0 = pneg %p4133_p2 }
 0x1cb   : > { %p4141_p10 = pnand %p4140_p7, %p4134_p0 }
 0x1cd   : > { %4144 = shalt.err (!%p4141_p10)
}
 0x1ce   : > { %3336 = dma.hbm_to_vmem [thread:$0]  (!%p5964_p5), %s5971_s7, 16, %s675_s10, [#allocation21]  }
 0x1cf   : > { %s5972_s23 = sld [smem:[#allocation79_spill]] }
 0x1d5   : > { %s5973_s6 = smov %s5972_s23  ;;  %s4145_s0 = scalar_lea.hbm %s5972_s23, 16 }
 0x1d6   : > { %p4146_p8 = scmp.ne.s32.totalorder %s5973_s6, %s4145_s0  ;;  %p4152_p1 = scmp.lt.u32.totalorder %s4145_s0, %s5973_s6 }
 0x1d8   : > { %p4148_p12 = pnand %p4146_p8, %p5963_p3 }
 0x1da   : > { %p4149_p4 = pneg %p4148_p12 }
 0x1dc   : > { %p4154_p9 = pnand %p4152_p1, %p4149_p4 }
 0x1de   : > { %4157 = shalt.err (!%p4154_p9)
}
 0x1df   : > { %s4158_s1 = scalar_lea.vmem %s697_s30, 16  ;;  %s4165_s10 = scalar_lea.vmem %s697_s30, 32 }
 0x1e0   : > { %p4159_p13 = scmp.ne.s32.totalorder %s697_s30, %s4158_s1  ;;  %p4166_p6 = scmp.lt.s32.totalorder %s697_s30, %s697_s30 }
 0x1e1   : > { %p4167_p11 = scmp.lt.s32.totalorder %s4165_s10, %s4158_s1 }
 0x1e2   : > { %p4161_p2 = pnand %p4159_p13, %p5963_p3 }
 0x1e3   : > { %p4168_p7 = por %p4167_p11, %p4166_p6 }
 0x1e4   : > { %p4162_p0 = pneg %p4161_p2 }
 0x1e6   : > { %p4169_p10 = pnand %p4168_p7, %p4162_p0 }
 0x1e8   : > { %4172 = shalt.err (!%p4169_p10)
}
 0x1e9   : > { %s5974_s29 = sld [smem:[#allocation59_spill]]  ;;  %s5975_s23 = sld [smem:[#allocation60_spill]] }
 0x1ea   : > { %s5976_s0 = sld [smem:[#allocation57_spill]]  ;;  %s5977_s20 = sld [smem:[#allocation58_spill]] }
 0x1eb   : > { %3342 = dma.hbm_to_vmem [thread:$0]  (!%p5964_p5), %s5973_s6, 16, %s697_s30, [#allocation24]  }
 0x1ec   : > { %s5978_s11 = sld [smem:[#allocation81_spill]]  ;;  %s4582_s27 = smov [#allocation28]  }
 0x1ed   : > { %s727_s1 = sshll.u32 %s4582_s27, 4  ;;  %p5979_p8 = scmp.eq.s32.totalorder %s4791_s21, 0  ;;  %s728_s1 = int_to_ptr.vmem [resolvable:$true] %s727_s1 }
 0x1ee   : > { %p5981_p5 = scmp.ne.s32.totalorder %s5922_s3, 0  ;;  %s5982_s8 = sld [smem:[#allocation83_spill]] }
 0x1ef   : > { %p379_p3 = scmp.ne.s32.totalorder %s5975_s23, %s5974_s29 }
 0x1f1   : > { %p5243_p12 = por %p379_p3, %p5979_p8 }
 0x1f2   : > { %s5237_s4 = scalar_lea.hbm %s5978_s11, %s5059_s2  ;;  %s4178_s6 = scalar_lea.hbm %s5978_s11, 48 }
 0x1f3   : > { %s5980_s10 = scalar_select %p5243_p12, 1, 0 }
 0x1f4   : > { %p5868_p4 = pnand %p5981_p5, %p5243_p12  ;;  %s5257_s28 = scalar_lea.hbm %s5982_s8, %s5059_s2 }
 0x1f5   : > { %s4173_s29 = scalar_lea.hbm %s5237_s4, 16  ;;  %p4179_p6 = scmp.lt.u32.totalorder %s5237_s4, %s5978_s11 }
 0x1f6   : > { %p4174_p9 = scmp.ne.s32.totalorder %s5237_s4, %s4173_s29  ;;  %p5266_p13 = pneg %p5868_p4 }
 0x1f7   : > { %p4180_p11 = scmp.lt.u32.totalorder %s4178_s6, %s4173_s29  ;;  %p4182_p10 = scmp.lt.u32.totalorder %s4173_s29, %s5237_s4 }
 0x1f8   : > { %p4176_p2 = pnand %p5266_p13, %p4174_p9 }
 0x1f9   : > { %p4181_p7 = por %p4180_p11, %p4179_p6 }
 0x1fa   : > { %p4177_p0 = pneg %p4176_p2 }
 0x1fb   : > { %p4183_p3 = por %p4182_p10, %p4181_p7 }
 0x1fd   : > { %p4184_p8 = pnand %p4183_p3, %p4177_p0 }
 0x1ff   : > { %4187 = shalt.err (!%p4184_p8)
}
 0x200   : > { %s4188_s7 = scalar_lea.vmem %s728_s1, 16  ;;  %s4195_s13 = scalar_lea.vmem %s728_s1, 32 }
 0x201   : > { %p4189_p1 = scmp.ne.s32.totalorder %s728_s1, %s4188_s7  ;;  %p4196_p4 = scmp.lt.s32.totalorder %s728_s1, %s728_s1 }
 0x202   : > { %p4197_p12 = scmp.lt.s32.totalorder %s4195_s13, %s4188_s7 }
 0x203   : > { %p4191_p9 = pnand %p4189_p1, %p5266_p13 }
 0x204   : > { %p4198_p5 = por %p4197_p12, %p4196_p4 }
 0x205   : > { %p4192_p2 = pneg %p4191_p9 }
 0x207   : > { %p4199_p6 = pnand %p4198_p5, %p4192_p2 }
 0x209   : > { %4202 = shalt.err (!%p4199_p6)
}
 0x20a   : > { %p5984_p11 = scmp.ne.s32.totalorder %s5922_s3, 0  ;;  %p5985_p7 = scmp.ne.s32.totalorder %s5980_s10, 0 }
 0x20b   : > { %s5987_s6 = sld [smem:[#allocation53_spill]]  ;;  %s5988_s29 = sld [smem:[#allocation54_spill]] }
 0x20c   : > { %p5986_p10 = pnand %p5984_p11, %p5985_p7  ;;  %p5989_p12 = scmp.eq.s32.totalorder %s4791_s21, 0 }
 0x20d   : > { %p5990_p5 = scmp.ne.s32.totalorder %s5977_s20, %s5976_s0  ;;  %s4583_s7 = smov [#allocation31]  }
 0x20e   : > { %3348 = dma.hbm_to_vmem [thread:$0]  (!%p5986_p10), %s5237_s4, 16, %s728_s1, [#allocation27]  }
 0x20f   : > { %p5293_p4 = por %p5990_p5, %p5989_p12  ;;  %s758_s23 = sshll.u32 %s4583_s7, 4  ;;  %s759_s23 = int_to_ptr.vmem [resolvable:$true] %s758_s23 }
 0x210   : > { %s4203_s22 = scalar_lea.hbm %s5257_s28, 16  ;;  %s4208_s1 = scalar_lea.hbm %s5982_s8, 48 }
 0x211   : > { %s5991_s13 = scalar_select %p5293_p4, 1, 0 }
 0x212   : > { %p5872_p1 = pnand %p5984_p11, %p5293_p4  ;;  %p4204_p0 = scmp.ne.s32.totalorder %s5257_s28, %s4203_s22 }
 0x213   : > { %p4209_p2 = scmp.lt.u32.totalorder %s5257_s28, %s5982_s8  ;;  %p4210_p6 = scmp.lt.u32.totalorder %s4208_s1, %s4203_s22 }
 0x214   : > { %p5310_p3 = pneg %p5872_p1  ;;  %p4212_p10 = scmp.lt.u32.totalorder %s4203_s22, %s5257_s28 }
 0x215   : > { %p4211_p7 = por %p4210_p6, %p4209_p2 }
 0x216   : > { %p4206_p8 = pnand %p5310_p3, %p4204_p0 }
 0x217   : > { %p4213_p12 = por %p4212_p10, %p4211_p7 }
 0x218   : > { %p4207_p9 = pneg %p4206_p8 }
 0x21a   : > { %p4214_p5 = pnand %p4213_p12, %p4207_p9 }
 0x21c   : > { %4217 = shalt.err (!%p4214_p5)
}
 0x21d   : > { %s4218_s12 = scalar_lea.vmem %s759_s23, 16  ;;  %s4225_s7 = scalar_lea.vmem %s759_s23, 32 }
 0x21e   : > { %p4219_p13 = scmp.ne.s32.totalorder %s759_s23, %s4218_s12  ;;  %p4226_p1 = scmp.lt.s32.totalorder %s759_s23, %s759_s23 }
 0x21f   : > { %p4227_p4 = scmp.lt.s32.totalorder %s4225_s7, %s4218_s12 }
 0x220   : > { %p4221_p0 = pnand %p4219_p13, %p5310_p3 }
 0x221   : > { %p4228_p11 = por %p4227_p4, %p4226_p1 }
 0x222   : > { %p4222_p8 = pneg %p4221_p0 }
 0x224   : > { %p4229_p2 = pnand %p4228_p11, %p4222_p8 }
 0x226   : > { %4232 = shalt.err (!%p4229_p2)
}
 0x227   : > { %p5993_p6 = scmp.ne.s32.totalorder %s5922_s3, 0  ;;  %p5994_p7 = scmp.ne.s32.totalorder %s5991_s13, 0 }
 0x228   : > { %p5996_p13 = scmp.eq.s32.totalorder %s4791_s21, 0  ;;  %p5997_p3 = scmp.ne.s32.totalorder %s5988_s29, %s5987_s6 }
 0x229   : > { %p5995_p10 = pnand %p5993_p6, %p5994_p7  ;;  %s5999_s4 = sld [smem:[#allocation85_spill]] }
 0x22a   : > { %p5337_p9 = por %p5997_p3, %p5996_p13  ;;  %s4584_s27 = smov [#allocation34]  }
 0x22b   : > { %3354 = dma.hbm_to_vmem [thread:$0]  (!%p5995_p10), %s5257_s28, 16, %s759_s23, [#allocation30]  }
 0x22c   : > { %s5998_s22 = scalar_select %p5337_p9, 1, 0 }
 0x22d   : > { %s786_s30 = sshll.u32 %s4584_s27, 4  ;;  %p5876_p11 = pnand %p5993_p6, %p5337_p9  ;;  %s787_s30 = int_to_ptr.vmem [resolvable:$true] %s786_s30 }
 0x22f   : > { %s6000_s12 = smov %s5999_s4  ;;  %s784_s1 = scalar_lea.hbm %s5999_s4, %s5059_s2 }
 0x230   : > { %s4233_s7 = scalar_lea.hbm %s784_s1, 16  ;;  %p5354_p1 = pneg %p5876_p11 }
 0x231   : > { %p4234_p4 = scmp.ne.s32.totalorder %s784_s1, %s4233_s7  ;;  %s4238_s29 = scalar_lea.hbm %s6000_s12, 48 }
 0x232   : > { %p4239_p0 = scmp.lt.u32.totalorder %s784_s1, %s6000_s12  ;;  %p4240_p8 = scmp.lt.u32.totalorder %s4238_s29, %s4233_s7 }
 0x233   : > { %p4236_p12 = pnand %p5354_p1, %p4234_p4  ;;  %p4242_p7 = scmp.lt.u32.totalorder %s4233_s7, %s784_s1 }
 0x234   : > { %p4241_p2 = por %p4240_p8, %p4239_p0 }
 0x235   : > { %p4237_p5 = pneg %p4236_p12 }
 0x236   : > { %p4243_p10 = por %p4242_p7, %p4241_p2 }
 0x238   : > { %p4244_p13 = pnand %p4243_p10, %p4237_p5 }
 0x23a   : > { %4247 = shalt.err (!%p4244_p13)
}
 0x23b   : > { %s4248_s20 = scalar_lea.vmem %s787_s30, 16  ;;  %s4255_s4 = scalar_lea.vmem %s787_s30, 32 }
 0x23c   : > { %p4249_p3 = scmp.ne.s32.totalorder %s787_s30, %s4248_s20  ;;  %p4256_p11 = scmp.lt.s32.totalorder %s787_s30, %s787_s30 }
 0x23d   : > { %p4257_p9 = scmp.lt.s32.totalorder %s4255_s4, %s4248_s20 }
 0x23e   : > { %p4251_p4 = pnand %p4249_p3, %p5354_p1 }
 0x23f   : > { %p4258_p6 = por %p4257_p9, %p4256_p11 }
 0x240   : > { %p4252_p12 = pneg %p4251_p4 }
 0x242   : > { %p4259_p0 = pnand %p4258_p6, %p4252_p12 }
 0x244   : > { %4262 = shalt.err (!%p4259_p0)
}
 0x245   : > { %p6002_p8 = scmp.ne.s32.totalorder %s5922_s3, 0  ;;  %p6003_p2 = scmp.ne.s32.totalorder %s5998_s22, 0 }
 0x246   : > { %s6005_s27 = sld [smem:[#allocation64_spill]]  ;;  %s6006_s7 = sld [smem:[#allocation63_spill]] }
 0x247   : > { %p6004_p7 = pnand %p6002_p8, %p6003_p2  ;;  %s6007_s2 = sld [smem:[#allocation62_spill]] }
 0x248   : > { %s6008_s28 = sld [smem:[#allocation61_spill]]  ;;  %p515_p5 = scmp.eq.s32.totalorder %s4791_s21, 1 }
 0x249   : > { %3360 = dma.hbm_to_vmem [thread:$0]  (!%p6004_p7), %s784_s1, 16, %s787_s30, [#allocation33]  }
 0x24a   : > { %p6009_p13 = scmp.eq.s32.totalorder %s4791_s21, 0  ;;  %s6013_s8 = sld [smem:[#allocation67_spill]] }
 0x24c   : > { %s2876_s6 = sadd.s32 4294967294, %s6005_s27   ;;  %s5375_s20 = sadd.s32 1, %s6005_s27  }
 0x24d   : > { %s58_s3 = sadd.s32 1, %s6006_s7  ;;  %s55_s29 = ssub.s32 %s6005_s27, %s5375_s20 }
 0x24e   : > { %p65_p6 = scmp.ne.s32.totalorder %s6006_s7, %s6007_s2  ;;  %p56_p9 = scmp.eq.s32.totalorder %s55_s29, 0 }
 0x24f   : > { %p66_p11 = scmp.eq.s32.totalorder %s6005_s27, 0  ;;  %p71_p1 = scmp.ne.s32.totalorder %s6007_s2, %s6008_s28 }
 0x250   : > { %s5387_s23 = scalar_select %p56_p9, %s6006_s7, %s58_s3  }
 0x251   : > { %p67_p10 = por %p66_p11, %p65_p6  ;;  %p5391_p3 = por %p6009_p13, %p71_p1 }
 0x252   : > { %p5395_p4 = por %p515_p5, %p65_p6  ;;  %p521_p12 = scmp.eq.s32.totalorder %s2876_s6, 1 }
 0x253   : > { %p3384_p0 = scmp.lt.s32.totalorder %s6005_s27, 2  ;;  %s797_s30 = sand.u32 1, %s6006_s7  }
 0x254   : > { %s6011_s1 = scalar_select %p5395_p4, 1, 0 }
 0x255   : > { %p5401_p8 = por %p521_p12, %p71_p1  ;;  %s2899_s2 = sshll.u32 %s797_s30, 4 }
 0x256   : > { %s3028_s28 = sshll.u32 %s6005_s27, 8  ;;  %s801_s12 = scalar_lea.vmem [#allocation5], %s2899_s2 }
 0x257   : > { %s6012_s4 = scalar_select %p5401_p8, 1, 0 }
 0x258   : > { %s5409_s11 = scalar_lea.hbm %s6013_s8, %s3028_s28  ;;  %s808_s14 = sshll.u32 %s801_s12, 4  ;;  %s5415_s14 = int_to_ptr.vmem [resolvable:$true] %s808_s14 }
 0x259   : > { %p5411_p2 = pnand %p3384_p0, %p67_p10  ;;  %s5417_s27 = scalar_lea.sflag [#allocation6], %s797_s30 }
 0x25a   : > { %s4263_s7 = scalar_lea.hbm %s5409_s11, 256  ;;  %s4268_s28 = scalar_lea.hbm %s6013_s8, 512 }
 0x25b   : > { %p4264_p7 = scmp.ne.s32.totalorder %s5409_s11, %s4263_s7  ;;  %p4265_p6 = pneg %p5411_p2 }
 0x25c   : > { %p4269_p1 = scmp.lt.u32.totalorder %s5409_s11, %s6013_s8  ;;  %p4270_p5 = scmp.lt.u32.totalorder %s4268_s28, %s4263_s7 }
 0x25d   : > { %p4266_p9 = pnand %p4265_p6, %p4264_p7  ;;  %p4272_p13 = scmp.lt.u32.totalorder %s4263_s7, %s5409_s11 }
 0x25e   : > { %p4271_p10 = por %p4270_p5, %p4269_p1 }
 0x25f   : > { %p4267_p11 = pneg %p4266_p9 }
 0x260   : > { %p4273_p12 = por %p4272_p13, %p4271_p10 }
 0x262   : > { %p4274_p0 = pnand %p4273_p12, %p4267_p11 }
 0x264   : > { %4277 = shalt.err (!%p4274_p0)
}
 0x265   : > { %s4278_s30 = scalar_lea.vmem %s5415_s14, 256  ;;  %s4585_s2 = smov [#allocation5]  }
 0x266   : > { %p4279_p7 = scmp.ne.s32.totalorder %s5415_s14, %s4278_s30  ;;  %s4283_s12 = sshll.u32 %s4585_s2, 4  ;;  %s4284_s12 = int_to_ptr.vmem [resolvable:$false] %s4283_s12 }
 0x267   : > { %s4285_s3 = scalar_lea.vmem %s4284_s12, 512  ;;  %p4286_p4 = scmp.lt.s32.totalorder %s5415_s14, %s4284_s12 }
 0x268   : > { %p4281_p9 = pnand %p4279_p7, %p4265_p6  ;;  %p4287_p1 = scmp.lt.s32.totalorder %s4285_s3, %s4278_s30 }
 0x26a   : > { %p4282_p8 = pneg %p4281_p9  ;;  %p4288_p5 = por %p4287_p1, %p4286_p4 }
 0x26c   : > { %p4289_p10 = pnand %p4288_p5, %p4282_p8 }
 0x26e   : > { %4292 = shalt.err (!%p4289_p10)
}
 0x26f   : > { %s6015_s7 = smov 8   ;;  %s6016_s28 = smov 128  }
 0x270   : > { %3364 = dma.hbm_to_vmem [thread:$0]  (!%p5411_p2), %s5409_s11, 256, %s5415_s14, %s5417_s27, %s6016_s28, %s6016_s28, %s6015_s7  }
 0x271   : > { %s6017_s29 = sld [smem:[#allocation65_spill]] }
 0x277   : > { %p6018_p6 = scmp.ne.s32.totalorder %s6017_s29, 0 }
 0x278   : > { %s6019_s2 = sld [smem:[#allocation62_spill]] (!%p6018_p6) }
 0x279   : > { %820 = sbr.rel (%p6018_p6) target bundleno = 4433 (0x1151), region = 96 }
 0x27e   : > { %s5451_s8 = sand.u32 (!%p6018_p6), 1, %s6019_s2  }
 0x27f   : > { %s2903_s30 = sshll.u32 (!%p6018_p6), %s5451_s8, 4  ;;  %s823_s12 = scalar_lea.sflag (!%p6018_p6), [#allocation6], %s5451_s8 }
 0x280   : > { %s5457_s6 = scalar_lea.vmem [#allocation5], %s2903_s30 }
 0x281   : > { %4438 = dma.done.wait (%p5391_p3), %s823_s12, 256  }
 0x282   : > { %4440 = vsyncadd (%p5391_p3), %s823_s12, 4294967040  ;;  %p6020_p4 = scmp.eq.s32.totalorder %s4791_s21, 0 }
 0x284   : > { %4442 = dma.done.wait (%p6020_p4), [#allocation9], 3120   ;;  %p6021_p8 = pmov %p6020_p4 }
 0x285   : > { %p6022_p2 = pmov %p6020_p4 }
 0x286   : > { %4444 = vsyncadd (%p6021_p8), [#allocation9], 4294964176 }
 0x287   : > { %4446 = dma.done.wait (%p6022_p2), [#allocation12], 1040   ;;  %p6023_p11 = pmov %p6022_p2 }
 0x288   : > { %p6024_p13 = pmov %p6022_p2 }
 0x289   : > { %4448 = vsyncadd (%p6023_p11), [#allocation12], 4294966256 }
 0x28a   : > { %4450 = dma.done.wait (%p6024_p13), [#allocation15], 32   ;;  %p6025_p12 = pmov %p6022_p2 }
 0x28b   : > { %p6026_p3 = pmov %p6022_p2 }
 0x28c   : > { %4452 = vsyncadd (%p6025_p12), [#allocation15], 4294967264 }
 0x28d   : > { %4454 = dma.done.wait (%p6026_p3), [#allocation18], 2080   ;;  %p6027_p0 = pmov %p6022_p2 }
 0x28f   : > { %4456 = vsyncadd (%p6027_p0), [#allocation18], 4294965216  ;;  %p6028_p7 = pmov %p6027_p0 }
 0x290   : > { %p6029_p9 = pmov %p6027_p0 }
 0x291   : > { %4458 = dma.done.wait (%p6028_p7), [#allocation21], 2064  }
 0x292   : > { %4460 = vsyncadd (%p6029_p9), [#allocation21], 4294965232  ;;  %p6030_p1 = pmov %p6027_p0 }
 0x293   : > { %p6031_p5 = pmov %p6027_p0 }
 0x294   : > { %4462 = dma.done.wait (%p6030_p1), [#allocation24], 32  }
 0x295   : > { %4464 = vsyncadd (%p6031_p5), [#allocation24], 4294967264  ;;  %p6032_p10 = scmp.ne.s32.totalorder %s5936_s25, 0 }
 0x297   : > { %4466 = dma.done.wait (%p6032_p10), [#allocation27], 1024  }
 0x298   : > { %4468 = vsyncadd (%p6032_p10), [#allocation27], 4294966272  ;;  %p6033_p6 = scmp.ne.s32.totalorder %s5980_s10, 0 }
 0x29a   : > { %4470 = dma.done.wait (%p6033_p6), [#allocation27], 16  }
 0x29b   : > { %4472 = vsyncadd (%p6033_p6), [#allocation27], 4294967280  ;;  %p6034_p4 = scmp.ne.s32.totalorder %s5946_s9, 0 }
 0x29d   : > { %4474 = dma.done.wait (%p6034_p4), [#allocation30], 1024  }
 0x29e   : > { %4476 = vsyncadd (%p6034_p4), [#allocation30], 4294966272  ;;  %p6035_p8 = scmp.ne.s32.totalorder %s5991_s13, 0 }
 0x2a0   : > { %4478 = dma.done.wait (%p6035_p8), [#allocation30], 16  }
 0x2a1   : > { %4480 = vsyncadd (%p6035_p8), [#allocation30], 4294967280  ;;  %p6036_p2 = scmp.ne.s32.totalorder %s5956_s26, 0 }
 0x2a3   : > { %4482 = dma.done.wait (%p6036_p2), [#allocation33], 16  }
 0x2a4   : > { %4484 = vsyncadd (%p6036_p2), [#allocation33], 4294967280  ;;  %p6037_p11 = scmp.ne.s32.totalorder %s5998_s22, 0 }
 0x2a6   : > { %4486 = dma.done.wait (%p6037_p11), [#allocation33], 16  }
 0x2a7   : > { %4488 = vsyncadd (%p6037_p11), [#allocation33], 4294967280  ;;  %v4586_v0 = vmov 0   ;;  %v4587_v1 = vmov 0.0   ;;  %v3607_v2 = vld [vmem:[#allocation8 + $0x4] ss:$12 sps:$4 sm:$0xff]   ;;  %v1004_v29 = vlaneseq }
 0x2a8   : > { %1179 = vmatprep.mubr.bf16.mxu0 %v4586_v0  ;;  %3112 = vmatprep.subr.bf16.mxu1 %v4587_v1  ;;  %v3609_v3 = vld [vmem:[#allocation8] ss:$12 sps:$4 sm:$0xff]   ;;  %v3610_v4 = vld [vmem:[#allocation8 + $0x1c] ss:$12 sps:$4 sm:$0xff]   ;;  %v3612_v5 = vld [vmem:[#allocation8 + $0x18] ss:$12 sps:$4 sm:$0xff]  }
 0x2a9   : > { %1147 = vmatprep.subr.bf16.mxu0 %v3607_v2  ;;  %v3613_v6 = vld [vmem:[#allocation8 + $0x34] ss:$12 sps:$4 sm:$0xff]   ;;  %v3615_v7 = vld [vmem:[#allocation8 + $0x30] ss:$12 sps:$4 sm:$0xff]   ;;  %v3616_v8 = vld [vmem:[#allocation8 + $0x4c] ss:$12 sps:$4 sm:$0xff]  }
 0x2aa   : > { %1148 = vmatpush1.bf16.msra.mxu0 %v3609_v3  ;;  %v3618_v9 = vld [vmem:[#allocation8 + $0x48] ss:$12 sps:$4 sm:$0xff]   ;;  %v3619_v10 = vld [vmem:[#allocation8 + $0x64] ss:$12 sps:$4 sm:$0xff]   ;;  %v3632_v12 = vld [vmem:[#allocation8 + $0x20] ss:$12 sps:$4 sm:$0xff]  }
 0x2ab   : > { %1149 = vmatprep.subr.bf16.mxu0 %v3610_v4  ;;  %v3631_v11 = vld [vmem:[#allocation8 + $0x8] ss:$12 sps:$4 sm:$0xff]   ;;  %v3621_v13 = vld [vmem:[#allocation8 + $0x60] ss:$12 sps:$4 sm:$0xff]   ;;  %v3624_v15 = vld [vmem:[#allocation8 + $0x78] ss:$12 sps:$4 sm:$0xff]  }
 0x2ac   : > { %3113 = vmatpush3.bf16.msra.mxu1 %v3631_v11  ;;  %v3622_v14 = vld [vmem:[#allocation8 + $0x7c] ss:$12 sps:$4 sm:$0xff]   ;;  %v3625_v16 = vld [vmem:[#allocation8 + $0x94] ss:$12 sps:$4 sm:$0xff]   ;;  %v3633_v17 = vld [vmem:[#allocation8 + $0x38] ss:$12 sps:$4 sm:$0xff]  }
 0x2ad   : > { %3114 = vmatprep.subr.bf16.mxu1 %v4587_v1  ;;  %v3634_v18 = vld [vmem:[#allocation8 + $0x50] ss:$12 sps:$4 sm:$0xff]   ;;  %v3628_v20 = vld [vmem:[#allocation8 + $0xac] ss:$12 sps:$4 sm:$0xff]   ;;  %v3635_v21 = vld [vmem:[#allocation8 + $0x68] ss:$12 sps:$4 sm:$0xff]  }
 0x2ae   : > { %1150 = vmatpush1.bf16.msra.mxu0 %v3612_v5  ;;  %v3627_v19 = vld [vmem:[#allocation8 + $0x90] ss:$12 sps:$4 sm:$0xff]   ;;  %v3630_v22 = vld [vmem:[#allocation8 + $0xa8] ss:$12 sps:$4 sm:$0xff]   ;;  %v3636_v25 = vld [vmem:[#allocation8 + $0x80] ss:$12 sps:$4 sm:$0xff]  }
 0x2af   : > { %1151 = vmatprep.subr.bf16.mxu0 %v3613_v6  ;;  %v5517_v23 = vld [vmem:[%s5457_s6] sm:$0xff]  ;;  %v5520_v24 = vld [vmem:[%s5457_s6 + $0x8] sm:$0xff]  ;;  %vm4588_vm0 = vmmov 0   ;;  %v5536_v30 = vshrl.u32 %v1004_v29, 7  ;;  %vm1234_vm1 = vcmask 261120   ;;  %vm1282_vm2 = vcmask 130048  }
 0x2b0   : > { %3115 = vmatpush3.bf16.msra.mxu1 %v3632_v12  ;;  %v969_v26 = vpack.c.bf16 %v5520_v24, %v5517_v23  ;;  %v3637_v27 = vld [vmem:[#allocation8 + $0x98] ss:$12 sps:$4 sm:$0xff]   ;;  %v3638_v28 = vld [vmem:[#allocation8 + $0xb0] ss:$12 sps:$4 sm:$0xff]   ;;  %3128 = vmatprep.mubr.msk.bf16.mxu1 %vm4588_vm0, %v4587_v1  ;;  %v1002_v32 = vld [vmem:[#allocation10] sm:$0x7] }
 0x2b1   : > { %3116 = vmatprep.subr.bf16.mxu1 %v4587_v1  ;;  %v1006_v31 = vsub.s32 0, %v5536_v30  ;;  %v1010_v33 = vsub.s32 1, %v5536_v30  ;;  %v1014_v47 = vsub.s32 2, %v5536_v30  ;;  %s4589_s14 = smov 96   ;;  %s4590_s25 = smov 32   ;;  %vm1481_vm3 = vcmask 523520  }
 0x2b2   : > { %1152 = vmatpush1.bf16.msra.mxu0 %v3615_v7  ;;  %s4591_s9 = smov 64   ;;  %vm1609_vm4 = vcmask 785920   ;;  %vm1737_vm5 = vcmask 1048320   ;;  %s2917_s26 = sshll.u32 %s5451_s8, 3 }
 0x2b3   : > { %1153 = vmatprep.subr.bf16.mxu0 %v3616_v8  ;;  %v1007_v34 = vrot.slane %v1002_v32, %v1006_v31  ;;  %v1011_v36 = vrot.slane %v1002_v32, %v1010_v33  ;;  %v1015_v48 = vrot.slane %v1002_v32, %v1014_v47  ;;  %s5644_s11 = scalar_lea.vmem [#allocation36], %s2917_s26  ;;  %s3032_s10 = sshll.u32 %s4791_s21, 7 }
 0x2b4   : > { %3117 = vmatpush3.bf16.msra.mxu1 %v3633_v17  ;;  %s2588_s13 = sshll.u32 %s5644_s11, 4  ;;  %s6038_s27 = sld [smem:[#allocation87_spill]]  ;;  %s5676_s13 = int_to_ptr.vmem [resolvable:$true] %s2588_s13 }
 0x2b5   : > { %3118 = vmatprep.subr.bf16.mxu1 %v4587_v1  ;;  %s2559_s28 = scalar_lea.sflag [#allocation37], %s5451_s8  ;;  %s4293_s29 = scalar_lea.vmem %s5676_s13, 128 }
 0x2b6   : > { %1154 = vmatpush1.bf16.msra.mxu0 %v3618_v9  ;;  %p4294_p13 = scmp.ne.s32.totalorder %s5676_s13, %s4293_s29  ;;  %p6040_p12 = scmp.ne.s32.totalorder %s6011_s1, 0 }
 0x2b7   : > { %1155 = vmatprep.subr.bf16.mxu0 %v3619_v10  ;;  %s4592_s2 = smov [#allocation36]  }
 0x2b8   : > { %3119 = vmatpush3.bf16.msra.mxu1 %v3634_v18  ;;  %p4295_p3 = pnand %p4294_p13, %p6040_p12  ;;  %s4297_s12 = sshll.u32 %s4592_s2, 4  ;;  %s4298_s12 = int_to_ptr.vmem [resolvable:$false] %s4297_s12 }
 0x2b9   : > { %3120 = vmatprep.subr.bf16.mxu1 %v4587_v1  ;;  %s4299_s6 = scalar_lea.vmem %s4298_s12, 256  ;;  %p4300_p7 = scmp.lt.s32.totalorder %s5676_s13, %s4298_s12 }
 0x2ba   : > { %1156 = vmatpush1.bf16.msra.mxu0 %v3621_v13  ;;  %s6039_s7 = smov %s6038_s27  ;;  %s5674_s3 = scalar_lea.hbm %s6038_s27, %s3032_s10 }
 0x2bb   : > { %1157 = vmatprep.subr.bf16.mxu0 %v3622_v14  ;;  %p4296_p0 = pneg %p4295_p3  ;;  %p4301_p9 = scmp.lt.s32.totalorder %s4299_s6, %s4293_s29 }
 0x2bc   : > { %3121 = vmatpush3.bf16.msra.mxu1 %v3635_v21 }
 0x2bd   : > { %3122 = vmatprep.subr.bf16.mxu1 %v4587_v1  ;;  %p4302_p1 = por %p4301_p9, %p4300_p7 }
 0x2be   : > { %1158 = vmatpush1.bf16.msra.mxu0 %v3624_v15 }
 0x2bf   : > { %1159 = vmatprep.subr.bf16.mxu0 %v3625_v16  ;;  %p4303_p5 = pnand %p4302_p1, %p4296_p0 }
 0x2c0   : > { %3123 = vmatpush3.bf16.msra.mxu1 %v3636_v25 }
 0x2c1   : > { %3124 = vmatprep.subr.bf16.mxu1 %v4587_v1 }
 0x2c2   : > { %1160 = vmatpush1.bf16.msra.mxu0 %v3627_v19 }
 0x2c3   : > { %1161 = vmatprep.subr.bf16.mxu0 %v3628_v20 }
 0x2c4   : > { %3125 = vmatpush3.bf16.msra.mxu1 %v3637_v27 }
 0x2c5   : > { %3126 = vmatprep.subr.bf16.mxu1 %v4587_v1 }
 0x2c6   : > { %1162 = vmatpush1.bf16.msra.mxu0 %v3630_v22 }
 0x2c7   : > { %3156 = vmatprep.subr.bf16.mxu0 %v4587_v1 }
 0x2c8   : > { %3127 = vmatpush3.bf16.msra.mxu1 %v3638_v28 }
 0x2c9   : > { %1180 = vmatmul.mubr.bf16.vlgmr.msra.gmra.mrb[0].mxu0 %v969_v26  ;;  %3132 = vmatprep.subr.bf16.mxu1 %v4587_v1 }
 0x2ca   : > { %3158 = vmatprep.mubr.msk.bf16.mxu0 %vm4588_vm0, %v4587_v1 }
 0x2cb   : > { %3129 = vmatmul.mubr.bf16.vlgmr.msra.gmra.mrb[0].mxu1 %v969_v26 }
 0x2cc   : > { %3134 = vmatprep.mubr.msk.bf16.mxu1 %vm4588_vm0, %v4587_v1 }
 0x39c   : > { %v1181_v35 = vpop.f32.mrb[0].mxu0 }
 0x39d   : > { %v1183_v37 = vpop.f32.mrb[1].mxu0  ;;  %v1182_v39 = vadd.f32 %v1181_v35, %v1007_v34 }
 0x39e   : > { %v1185_v38 = vpop.f32.mrb[2].mxu0  ;;  %v1184_v42 = vadd.f32 %v1183_v37, %v1011_v36  ;;  %v1224_v49 = vpop.f32.mrb[0].mxu1 }
 0x39f   : > { %v1186_v40 = vadd.f32 %v1185_v38, %v1007_v34  ;;  %v1187_v41 = vpop.f32.mrb[3].mxu0  ;;  %v1225_v50 = vadd.f32 %v1224_v49, %v1015_v48  ;;  %v3130_v51 = vpop.f32.mrb[1].mxu1 }
 0x3a0   : > { %v1188_v43 = vadd.f32 %v1187_v41, %v1011_v36  ;;  %v1227_v52 = vpop.f32.mrb[2].mxu1 }
 0x3a1   : > { %v1231_v44 = vpack.c.bf16 %v1186_v40, %v1182_v39  ;;  %v1228_v53 = vadd.f32 %v1227_v52, %v1015_v48  ;;  %v3131_v54 = vpop.f32.mrb[3].mxu1 }
 0x3a2   : > { %v1232_v45 = vpack.c.bf16 %v1188_v43, %v1184_v42 }
 0x3a3   : > { %v5550_v55 = vpack.c.bf16 %v1228_v53, %v1225_v50 }
 0x3a4   : > { %v1239_v46 = vsel %vm1234_vm1, %v1232_v45, 0 }
 0x3a5   : > { %3133 = vmatpush3.bf16.xpose.msra.mxu1 %v1239_v46 }
 0x3a6   : > { %3138 = vmatprep.subr.bf16.mxu1 %v4587_v1 }
 0x3ac   : > { %3135 = vmatmul.mubr.msk.bf16.vlgmr.msra.gmra.mrb[4].mxu1 %vm1234_vm1, %v1231_v44 }
 0x3ad   : > { %3140 = vmatprep.mubr.msk.bf16.mxu1 %vm4588_vm0, %v4587_v1  ;;  %3139 = vmatpush3.bf16.msra.mxu1 %v5550_v55 }
 0x3ae   : > { %3144 = vmatprep.subr.bf16.mxu1 %v4587_v1 }
 0x47f   : > { %v1275_v56 = vpop.f32.mrb[4].mxu1 }
 0x480   : > { %v3136_v57 = vpop.f32.mrb[5].mxu1  ;;  %v1283_v58 = vsel %vm1282_vm2, %v1275_v56, -inf }
 0x481   : > { %1284 = vmax.xlane.f32.xlu0 %v1283_v58  ;;  %v1278_v59 = vpop.f32.mrb[6].mxu1 }
 0x482   : > { %v3137_v60 = vpop.f32.mrb[7].mxu1  ;;  %v1286_v61 = vsel %vm1282_vm2, %v1278_v59, -inf }
 0x485   : > { %1287 = vmax.xlane.f32.xlu0 %v1286_v61 }
 0x49b   : > { %1356 = vrot.lane.b32.xlu0 %v1232_v45, %s4589_s14 }
 0x49f   : > { %1613 = vrot.lane.b32.xlu0 %v1232_v45, %s4590_s25 }
 0x50e   : > { %v1285_v62 = vpop.xlane.xlu0 %1284 }
 0x50f   : > { %v1289_v63 = vsub.f32 %v1275_v56, %v1285_v62 }
 0x511   : > { %v1291_v2 = vmul.f32 1.442695, %v1289_v63 }
 0x512   : > { %v1288_v3 = vpop.xlane.xlu0 %1287 }
 0x513   : > { %3703 = vpow2.f32 %v1291_v2  ;;  %v1290_v4 = vsub.f32 %v1278_v59, %v1288_v3 }
 0x515   : > { %v1293_v5 = vmul.f32 1.442695, %v1290_v4 }
 0x516   : > { %v1357_v13 = vpop.permute.xlu0 %1356 }
 0x517   : > { %3705 = vpow2.f32 %v1293_v5  ;;  %v1362_v22 = vsel %vm1234_vm1, %v1357_v13, 0 }
 0x51a   : > { %v1614_v20 = vpop.permute.xlu0 %1613 }
 0x51b   : > { %v1619_v26 = vsel %vm1234_vm1, %v1614_v20, 0 }
 0x51d   : > { %v3704_v6 = vpop.eup %3703 }
 0x51e   : > { %v1295_v7 = vsel %vm1282_vm2, %v3704_v6, 0.0 }
 0x51f   : > { %1296 = vadd.xlane.f32.xlu1 %v1295_v7 }
 0x521   : > { %v3706_v8 = vpop.eup %3705 }
 0x522   : > { %v1298_v9 = vsel %vm1282_vm2, %v3706_v8, 0.0 }
 0x523   : > { %1299 = vadd.xlane.f32.xlu1 %v1298_v9 }
 0x534   : > { %1353 = vrot.lane.b32.xlu1 %v1231_v44, %s4589_s14 }
 0x538   : > { %1485 = vrot.lane.b32.xlu1 %v1232_v45, %s4591_s9 }
 0x53c   : > { %1483 = vrot.lane.b32.xlu1 %v1231_v44, %s4591_s9 }
 0x540   : > { %1611 = vrot.lane.b32.xlu1 %v1231_v44, %s4590_s25 }
 0x5ac   : > { %v1297_v10 = vpop.xlane.xlu1 %1296 }
 0x5ad   : > { %3707 = vrcp.f32 %v1297_v10 }
 0x5b0   : > { %v1300_v11 = vpop.xlane.xlu1 %1299 }
 0x5b1   : > { %3709 = vrcp.f32 %v1300_v11 }
 0x5b4   : > { %v1354_v12 = vpop.permute.xlu1 %1353 }
 0x5b7   : > { %v3708_v15 = vpop.eup %3707 }
 0x5b8   : > { %v1486_v14 = vpop.permute.xlu1 %1485  ;;  %v1303_v18 = vmul.f32 %v3708_v15, %v3704_v6 }
 0x5b9   : > { %v1491_v16 = vsel %vm1234_vm1, %v1486_v14, 0 }
 0x5ba   : > { %3157 = vmatpush3.bf16.xpose.msra.mxu0 %v1491_v16 }
 0x5bb   : > { %v3710_v17 = vpop.eup %3709  ;;  %3168 = vmatprep.subr.bf16.mxu0 %v4587_v1 }
 0x5bc   : > { %v1304_v19 = vmul.f32 %v3710_v17, %v3706_v8  ;;  %v1484_v25 = vpop.permute.xlu1 %1483 }
 0x5be   : > { %v1305_v21 = vpack.c.bf16 %v1304_v19, %v1303_v18 }
 0x5c0   : > { %3141 = vmatmul.mubr.msk.bf16.vlgmr.msra.gmra.mrb[8].mxu1 %vm1282_vm2, %v1305_v21  ;;  %v1612_v27 = vpop.permute.xlu1 %1611 }
 0x5c1   : > { %3145 = vmatpush3.bf16.xpose.msra.mxu1 %v1362_v22  ;;  %3159 = vmatmul.mubr.msk.bf16.vlgmr.msra.gmra.mrb[4].mxu0 %vm1234_vm1, %v1484_v25 }
 0x5c2   : > { %3169 = vmatpush3.bf16.xpose.msra.mxu0 %v1619_v26  ;;  %3146 = vmatprep.mubr.msk.bf16.mxu1 %vm4588_vm0, %v4587_v1 }
 0x5c3   : > { %3170 = vmatprep.mubr.msk.bf16.mxu0 %vm4588_vm0, %v4587_v1  ;;  %3150 = vmatprep.subr.bf16.mxu1 %v4587_v1 }
 0x5c4   : > { %3180 = vmatprep.subr.bf16.mxu0 %v4587_v1 }
 0x5c8   : > { %3147 = vmatmul.mubr.msk.bf16.vlgmr.msra.gmra.mrb[12].mxu1 %vm1234_vm1, %v1354_v12 }
 0x5c9   : > { %3171 = vmatmul.mubr.msk.bf16.vlgmr.msra.gmra.mrb[8].mxu0 %vm1234_vm1, %v1612_v27  ;;  %3152 = vmatprep.mubr.msk.bf16.mxu1 %vm4588_vm0, %v4587_v1 }
 0x5ca   : > { %3196 = vmatprep.mubr.msk.bf16.mxu0 %vm4588_vm0, %v4587_v1 }
 0x693   : > { %v1343_v28 = vpop.f32.mrb[8].mxu1 }
 0x694   : > { %v3142_v29 = vpop.f32.mrb[9].mxu1  ;;  %v1527_v32 = vpop.f32.mrb[4].mxu0 }
 0x695   : > { %v1346_v34 = vpop.f32.mrb[10].mxu1  ;;  %v3160_v35 = vpop.f32.mrb[5].mxu0  ;;  %v1534_v50 = vsel %vm1282_vm2, %v1527_v32, -inf }
 0x696   : > { %v1350_v36 = vpack.c.bf16 %v1346_v34, %v1343_v28  ;;  %v3143_v37 = vpop.f32.mrb[11].mxu1  ;;  %v1530_v38 = vpop.f32.mrb[6].mxu0 }
 0x697   : > { %v3161_v39 = vpop.f32.mrb[7].mxu0  ;;  %v1537_v52 = vsel %vm1282_vm2, %v1530_v38, -inf }
 0x698   : > { %1351 = vst.msk [vmem:[#allocation2] sm:$0xff] %vm1234_vm1, %v1350_v36 }
 0x69b   : > { %v1398_v40 = vpop.f32.mrb[12].mxu1 }
 0x69c   : > { %v3148_v41 = vpop.f32.mrb[13].mxu1  ;;  %v1655_v42 = vpop.f32.mrb[8].mxu0  ;;  %v1405_v43 = vsel %vm1282_vm2, %v1398_v40, -inf }
 0x69d   : > { %v3172_v44 = vpop.f32.mrb[9].mxu0  ;;  %1406 = vmax.xlane.f32.xlu0 %v1405_v43  ;;  %v1401_v45 = vpop.f32.mrb[14].mxu1  ;;  %v1662_v53 = vsel %vm1282_vm2, %v1655_v42, -inf }
 0x69e   : > { %v3149_v46 = vpop.f32.mrb[15].mxu1  ;;  %v1658_v47 = vpop.f32.mrb[10].mxu0  ;;  %v1408_v48 = vsel %vm1282_vm2, %v1401_v45, -inf }
 0x69f   : > { %v3173_v49 = vpop.f32.mrb[11].mxu0  ;;  %1409 = vmax.xlane.f32.xlu1 %v1408_v48  ;;  %v1665_v51 = vsel %vm1282_vm2, %v1658_v47, -inf }
 0x6a1   : > { %1535 = vmax.xlane.f32.xlu0 %v1534_v50 }
 0x6a3   : > { %1666 = vmax.xlane.f32.xlu1 %v1665_v51  ;;  %v3639_v51 = vld [vmem:[#allocation11] sm:$0xff]  }
 0x6a4   : > { %3181 = vmatpush3.bf16.msra.mxu0 %v3639_v51  ;;  %v3671_v51 = vld [vmem:[#allocation20 + $0x40] sm:$0xff]  }
 0x6a5   : > { %1538 = vmax.xlane.f32.xlu0 %v1537_v52  ;;  %v3640_v52 = vld [vmem:[#allocation11 + $0x8] sm:$0xff]   ;;  %3182 = vmatprep.subr.bf16.mxu0 %v4587_v1 }
 0x6a8   : > { %3183 = vmatpush3.bf16.msra.mxu0 %v3640_v52  ;;  %v3672_v52 = vld [vmem:[#allocation20] sm:$0xff]  }
 0x6a9   : > { %1663 = vmax.xlane.f32.xlu0 %v1662_v53  ;;  %3184 = vmatprep.subr.bf16.mxu0 %v4587_v1  ;;  %v3641_v53 = vld [vmem:[#allocation11 + $0x10] sm:$0xff]  }
 0x6ac   : > { %3185 = vmatpush3.bf16.msra.mxu0 %v3641_v53  ;;  %v3673_v53 = vld [vmem:[#allocation20 + $0x48] sm:$0xff]  }
 0x6ad   : > { %3186 = vmatprep.subr.bf16.mxu0 %v4587_v1 }
 0x72a   : > { %v1407_v54 = vpop.xlane.xlu0 %1406 }
 0x72b   : > { %v1411_v2 = vsub.f32 %v1398_v40, %v1407_v54  ;;  %v3642_v54 = vld [vmem:[#allocation11 + $0x18] sm:$0xff]  }
 0x72c   : > { %v1410_v56 = vpop.xlane.xlu1 %1409  ;;  %3187 = vmatpush3.bf16.msra.mxu0 %v3642_v54  ;;  %v3674_v54 = vld [vmem:[#allocation20 + $0x8] sm:$0xff]  }
 0x72d   : > { %v1412_v3 = vsub.f32 %v1401_v45, %v1410_v56  ;;  %v1413_v8 = vmul.f32 1.442695, %v1411_v2  ;;  %3188 = vmatprep.subr.bf16.mxu0 %v4587_v1 }
 0x72e   : > { %v1536_v57 = vpop.xlane.xlu0 %1535 }
 0x72f   : > { %v1540_v58 = vsub.f32 %v1527_v32, %v1536_v57  ;;  %v1415_v9 = vmul.f32 1.442695, %v1412_v3  ;;  %v3643_v57 = vld [vmem:[#allocation11 + $0x20] sm:$0xff]  }
 0x730   : > { %v1667_v59 = vpop.xlane.xlu1 %1666  ;;  %3189 = vmatpush3.bf16.msra.mxu0 %v3643_v57  ;;  %v3676_v57 = vld [vmem:[#allocation20 + $0x10] sm:$0xff]  }
 0x731   : > { %v1542_v60 = vmul.f32 1.442695, %v1540_v58  ;;  %v1669_v61 = vsub.f32 %v1658_v47, %v1667_v59  ;;  %v3644_v59 = vld [vmem:[#allocation11 + $0x28] sm:$0xff]   ;;  %3190 = vmatprep.subr.bf16.mxu0 %v4587_v1 }
 0x732   : > { %v1539_v62 = vpop.xlane.xlu0 %1538 }
 0x733   : > { %3711 = vpow2.f32 %v1542_v60  ;;  %v1541_v63 = vsub.f32 %v1530_v38, %v1539_v62  ;;  %v1672_v4 = vmul.f32 1.442695, %v1669_v61 }
 0x734   : > { %3191 = vmatpush3.bf16.msra.mxu0 %v3644_v59  ;;  %v3679_v59 = vld [vmem:[#allocation20 + $0x60] sm:$0xff]  }
 0x735   : > { %v1544_v5 = vmul.f32 1.442695, %v1541_v63  ;;  %3192 = vmatprep.subr.bf16.mxu0 %v4587_v1  ;;  %v3645_v63 = vld [vmem:[#allocation11 + $0x30] sm:$0xff]  }
 0x736   : > { %v1664_v6 = vpop.xlane.xlu0 %1663 }
 0x737   : > { %3713 = vpow2.f32 %v1544_v5  ;;  %v1668_v7 = vsub.f32 %v1655_v42, %v1664_v6 }
 0x738   : > { %3715 = vpow2.f32 %v1672_v4  ;;  %3193 = vmatpush3.bf16.msra.mxu0 %v3645_v63  ;;  %v3646_v4 = vld [vmem:[#allocation11 + $0x38] sm:$0xff]  }
 0x739   : > { %v1670_v10 = vmul.f32 1.442695, %v1668_v7  ;;  %3194 = vmatprep.subr.bf16.mxu0 %v4587_v1 }
 0x73b   : > { %3717 = vpow2.f32 %v1670_v10 }
 0x73c   : > { %3719 = vpow2.f32 %v1413_v8  ;;  %3195 = vmatpush3.bf16.msra.mxu0 %v3646_v4 }
 0x73d   : > { %v3712_v11 = vpop.eup %3711  ;;  %3721 = vpow2.f32 %v1415_v9  ;;  %3072 = vmatprep.subr.bf16.mxu0 %v3671_v51 }
 0x73e   : > { %v1546_v12 = vsel %vm1282_vm2, %v3712_v11, 0.0 }
 0x73f   : > { %1547 = vadd.xlane.f32.xlu0 %v1546_v12 }
 0x741   : > { %v3714_v13 = vpop.eup %3713 }
 0x742   : > { %v1549_v14 = vsel %vm1282_vm2, %v3714_v13, 0.0  ;;  %v3716_v15 = vpop.eup %3715 }
 0x743   : > { %1550 = vadd.xlane.f32.xlu1 %v1549_v14  ;;  %v1677_v19 = vsel %vm1282_vm2, %v3716_v15, 0.0 }
 0x745   : > { %v3718_v16 = vpop.eup %3717 }
 0x746   : > { %v3720_v17 = vpop.eup %3719  ;;  %v1674_v18 = vsel %vm1282_vm2, %v3718_v16, 0.0 }
 0x747   : > { %v3722_v20 = vpop.eup %3721  ;;  %1675 = vadd.xlane.f32.xlu0 %v1674_v18  ;;  %1678 = vadd.xlane.f32.xlu1 %v1677_v19  ;;  %v1417_v21 = vsel %vm1282_vm2, %v3720_v17, 0.0 }
 0x748   : > { %v1420_v22 = vsel %vm1282_vm2, %v3722_v20, 0.0 }
 0x74b   : > { %1418 = vadd.xlane.f32.xlu0 %v1417_v21  ;;  %1421 = vadd.xlane.f32.xlu1 %v1420_v22 }
 0x75c   : > { %1557 = vrot.lane.b32.xlu1 %v5550_v55, %s4591_s9 }
 0x760   : > { %1685 = vrot.lane.b32.xlu1 %v5550_v55, %s4590_s25 }
 0x761   : > { %1429 = vrot.lane.b32.xlu0 %v5550_v55, %s4589_s14 }
 0x7cc   : > { %v1548_v25 = vpop.xlane.xlu0 %1547 }
 0x7d0   : > { %v1551_v26 = vpop.xlane.xlu1 %1550 }
 0x7d4   : > { %v1676_v27 = vpop.xlane.xlu0 %1675  ;;  %v1679_v28 = vpop.xlane.xlu1 %1678 }
 0x7d8   : > { %v1419_v29 = vpop.xlane.xlu0 %1418  ;;  %v1422_v32 = vpop.xlane.xlu1 %1421 }
 0x7d9   : > { %3723 = vrcp.f32 %v1419_v29  ;;  %v3652_v29 = vld [vmem:[#allocation17 + $0x14] ss:$8 sps:$4 sm:$0xff]  }
 0x7da   : > { %3725 = vrcp.f32 %v1422_v32  ;;  %v3650_v32 = vld [vmem:[#allocation17 + $0x10] ss:$8 sps:$4 sm:$0xff]  }
 0x7db   : > { %3727 = vrcp.f32 %v1551_v26 }
 0x7dc   : > { %v1430_v34 = vpop.permute.xlu0 %1429  ;;  %3729 = vrcp.f32 %v1548_v25  ;;  %v1558_v40 = vpop.permute.xlu1 %1557 }
 0x7dd   : > { %3151 = vmatpush3.bf16.msra.mxu1 %v1430_v34  ;;  %3731 = vrcp.f32 %v1676_v27  ;;  %v3647_v27 = vld [vmem:[#allocation17] ss:$8 sps:$4 sm:$0xff]  }
 0x7de   : > { %3162 = vmatprep.subr.bf16.mxu1 %v4587_v1  ;;  %3733 = vrcp.f32 %v1679_v28  ;;  %v3649_v28 = vld [vmem:[#allocation17 + $0x4] ss:$8 sps:$4 sm:$0xff]  }
 0x7e0   : > { %v1686_v47 = vpop.permute.xlu1 %1685 }
 0x7e3   : > { %v3724_v35 = vpop.eup %3723 }
 0x7e4   : > { %v3726_v36 = vpop.eup %3725  ;;  %v1425_v37 = vmul.f32 %v3724_v35, %v3720_v17 }
 0x7e5   : > { %v1426_v38 = vmul.f32 %v3726_v36, %v3722_v20  ;;  %v3728_v39 = vpop.eup %3727 }
 0x7e6   : > { %v3730_v41 = vpop.eup %3729  ;;  %v1555_v42 = vmul.f32 %v3728_v39, %v3714_v13  ;;  %v3655_v39 = vld [vmem:[#allocation17 + $0x24] ss:$8 sps:$4 sm:$0xff]  }
 0x7e7   : > { %v1427_v55 = vpack.c.bf16 %v1426_v38, %v1425_v37  ;;  %v1554_v43 = vmul.f32 %v3730_v41, %v3712_v11  ;;  %v3732_v44 = vpop.eup %3731  ;;  %v3658_v41 = vld [vmem:[#allocation17 + $0x34] ss:$8 sps:$4 sm:$0xff]  }
 0x7e8   : > { %v3734_v46 = vpop.eup %3733  ;;  %v1682_v48 = vmul.f32 %v3732_v44, %v3718_v16  ;;  %v2950_v16 = vld [vmem:[#allocation13] ss:$0 sm:$0xff]  ;;  %v3659_v44 = vld [vmem:[#allocation17 + $0x40] ss:$8 sps:$4 sm:$0xff]  }
 0x7e9   : > { %3153 = vmatmul.mubr.msk.bf16.vlgmr.msra.gmra.mrb[16].mxu1 %vm1282_vm2, %v1427_v55  ;;  %v1556_v45 = vpack.c.bf16 %v1555_v42, %v1554_v43  ;;  %v1683_v49 = vmul.f32 %v3734_v46, %v3716_v15  ;;  %v3656_v42 = vld [vmem:[#allocation17 + $0x30] ss:$8 sps:$4 sm:$0xff]   ;;  %v3661_v43 = vld [vmem:[#allocation17 + $0x44] ss:$8 sps:$4 sm:$0xff]  }
 0x7ea   : > { %3163 = vmatpush3.bf16.msra.mxu1 %v1558_v40  ;;  %3164 = vmatprep.mubr.msk.bf16.mxu1 %vm4588_vm0, %v4587_v1  ;;  %v3653_v40 = vld [vmem:[#allocation17 + $0x20] ss:$8 sps:$4 sm:$0xff]   ;;  %v3662_v46 = vld [vmem:[#allocation17 + $0x50] ss:$8 sps:$4 sm:$0xff]  }
 0x7eb   : > { %3174 = vmatprep.subr.bf16.mxu1 %v4587_v1  ;;  %v1684_v50 = vpack.c.bf16 %v1683_v49, %v1682_v48  ;;  %v3665_v48 = vld [vmem:[#allocation17 + $0x60] ss:$8 sps:$4 sm:$0xff]   ;;  %v3670_v49 = vld [vmem:[#allocation17 + $0x74] ss:$8 sps:$4 sm:$0xff]  }
 0x7f1   : > { %3165 = vmatmul.mubr.msk.bf16.vlgmr.msra.gmra.mrb[20].mxu1 %vm1282_vm2, %v1556_v45  ;;  %v3664_v45 = vld [vmem:[#allocation17 + $0x54] ss:$8 sps:$4 sm:$0xff]  }
 0x7f2   : > { %3175 = vmatpush3.bf16.msra.mxu1 %v1686_v47  ;;  %3176 = vmatprep.mubr.msk.bf16.mxu1 %vm4588_vm0, %v4587_v1  ;;  %v3667_v47 = vld [vmem:[#allocation17 + $0x64] ss:$8 sps:$4 sm:$0xff]  }
 0x7f3   : > { %2004 = vmatprep.subr.bf16.mxu1 %v3649_v28 }
 0x7f9   : > { %3177 = vmatmul.mubr.msk.bf16.vlgmr.msra.gmra.mrb[24].mxu1 %vm1282_vm2, %v1684_v50  ;;  %v3668_v50 = vld [vmem:[#allocation17 + $0x70] ss:$8 sps:$4 sm:$0xff]  }
 0x7fa   : > { %2036 = vmatprep.mubr.bf16.mxu1 %v4586_v0  ;;  %2005 = vmatpush1.bf16.msra.mxu1 %v3647_v27 }
 0x7fb   : > { %2006 = vmatprep.subr.bf16.mxu1 %v3652_v29 }
 0x7fe   : > { %2007 = vmatpush1.bf16.msra.mxu1 %v3650_v32 }
 0x7ff   : > { %2008 = vmatprep.subr.bf16.mxu1 %v3655_v39 }
 0x802   : > { %2009 = vmatpush1.bf16.msra.mxu1 %v3653_v40 }
 0x803   : > { %2010 = vmatprep.subr.bf16.mxu1 %v3658_v41 }
 0x806   : > { %2011 = vmatpush1.bf16.msra.mxu1 %v3656_v42 }
 0x807   : > { %2012 = vmatprep.subr.bf16.mxu1 %v3661_v43 }
 0x80a   : > { %2013 = vmatpush1.bf16.msra.mxu1 %v3659_v44 }
 0x80b   : > { %2014 = vmatprep.subr.bf16.mxu1 %v3664_v45 }
 0x80e   : > { %2015 = vmatpush1.bf16.msra.mxu1 %v3662_v46 }
 0x80f   : > { %2016 = vmatprep.subr.bf16.mxu1 %v3667_v47 }
 0x812   : > { %2017 = vmatpush1.bf16.msra.mxu1 %v3665_v48 }
 0x813   : > { %2018 = vmatprep.subr.bf16.mxu1 %v3670_v49 }
 0x816   : > { %2019 = vmatpush1.bf16.msra.mxu1 %v3668_v50 }
 0x817   : > { %3200 = vmatprep.subr.bf16.mxu1 %v4587_v1 }
 0x8bc   : > { %v1469_v56 = vpop.f32.mrb[16].mxu1 }
 0x8bd   : > { %v3154_v58 = vpop.f32.mrb[17].mxu1 }
 0x8be   : > { %v1472_v0 = vpop.f32.mrb[18].mxu1  ;;  %v3677_v58 = vld [vmem:[#allocation20 + $0x58] sm:$0xff]  }
 0x8bf   : > { %v1476_v60 = vpack.c.bf16 %v1472_v0, %v1469_v56  ;;  %v3155_v61 = vpop.f32.mrb[19].mxu1  ;;  %v3675_v56 = vld [vmem:[#allocation20 + $0x50] sm:$0xff]   ;;  %v3678_v0 = vld [vmem:[#allocation20 + $0x18] sm:$0xff]  }
 0x8c0   : > { %v3681_v61 = vld [vmem:[#allocation20 + $0x68] sm:$0xff]  }
 0x8c1   : > { %1478 = vrot.lane.b32.xlu1 %v1476_v60, %s4590_s25  ;;  %v3680_v60 = vld [vmem:[#allocation20 + $0x20] sm:$0xff]  }
 0x8c4   : > { %v1597_v62 = vpop.f32.mrb[20].mxu1 }
 0x8c5   : > { %v3166_v2 = vpop.f32.mrb[21].mxu1 }
 0x8c6   : > { %v1600_v3 = vpop.f32.mrb[22].mxu1 }
 0x8c7   : > { %v1604_v5 = vpack.c.bf16 %v1600_v3, %v1597_v62  ;;  %v3167_v6 = vpop.f32.mrb[23].mxu1 }
 0x8c9   : > { %1606 = vrot.lane.b32.xlu0 %v1604_v5, %s4591_s9 }
 0x8cc   : > { %v1725_v7 = vpop.f32.mrb[24].mxu1 }
 0x8cd   : > { %v3178_v8 = vpop.f32.mrb[25].mxu1 }
 0x8ce   : > { %v1728_v9 = vpop.f32.mrb[26].mxu1  ;;  %v2959_v8 = vld [vmem:[#allocation14] ss:$0 sm:$0xff] }
 0x8cf   : > { %v1732_v10 = vpack.c.bf16 %v1728_v9, %v1725_v7  ;;  %v3179_v11 = vpop.f32.mrb[27].mxu1 }
 0x8d1   : > { %1734 = vrot.lane.b32.xlu1 %v1732_v10, %s4589_s14 }
 0x933   : > { %v1479_v12 = vpop.permute.xlu1 %1478 }
 0x934   : > { %1482 = vst.msk [vmem:[#allocation2] sm:$0xff] %vm1481_vm3, %v1479_v12  ;;  %v2960_v12 = vld [vmem:[#allocation16] ss:$0 sm:$0xff] }
 0x93b   : > { %v1607_v13 = vpop.permute.xlu0 %1606 }
 0x93c   : > { %1610 = vst.msk [vmem:[#allocation2] sm:$0xff] %vm1609_vm4, %v1607_v13 }
 0x943   : > { %v1735_v14 = vpop.permute.xlu1 %1734 }
 0x944   : > { %1738 = vst.msk [vmem:[#allocation2] sm:$0xff] %vm1737_vm5, %v1735_v14 }
 0x94b   : > { %v1739_v15 = vld [vmem:[#allocation2] sm:$0xff] }
 0x94c   : > { %3197 = vmatmul.mubr.bf16.vlgmr.msra.gmra.mrb[12].mxu0 %v1739_v15 }
 0x94d   : > { %3073 = vmatpush3.bf16.msra.mxu0 %v3672_v52 }
 0x94e   : > { %3074 = vmatprep.subr.bf16.mxu0 %v3673_v53 }
 0x951   : > { %3075 = vmatpush3.bf16.msra.mxu0 %v3674_v54 }
 0x952   : > { %3076 = vmatprep.subr.bf16.mxu0 %v3675_v56 }
 0x955   : > { %3077 = vmatpush3.bf16.msra.mxu0 %v3676_v57 }
 0x956   : > { %3078 = vmatprep.subr.bf16.mxu0 %v3677_v58 }
 0x959   : > { %3079 = vmatpush3.bf16.msra.mxu0 %v3678_v0 }
 0x95a   : > { %3080 = vmatprep.subr.bf16.mxu0 %v3679_v59 }
 0x95d   : > { %3081 = vmatpush3.bf16.msra.mxu0 %v3680_v60 }
 0x95e   : > { %3082 = vmatprep.subr.bf16.mxu0 %v3681_v61 }
 0xa1f   : > { %v1845_v17 = vpop.f32.mrb[12].mxu0 }
 0xa20   : > { %v1846_v18 = vadd.f32 %v2950_v16, %v1845_v17  ;;  %v3198_v19 = vpop.f32.mrb[13].mxu0  ;;  %v3682_v17 = vld [vmem:[#allocation20 + $0x28] sm:$0xff]  }
 0xa21   : > { %v1848_v20 = vpop.f32.mrb[14].mxu0  ;;  %3083 = vmatpush3.bf16.msra.mxu0 %v3682_v17  ;;  %v3684_v19 = vld [vmem:[#allocation20 + $0x30] sm:$0xff]  }
 0xa22   : > { %v1849_v21 = vadd.f32 %v2950_v16, %v1848_v20  ;;  %v3199_v22 = vpop.f32.mrb[15].mxu0  ;;  %v1852_v25 = vadd.f32 %v1846_v18, %v5517_v23  ;;  %v3683_v18 = vld [vmem:[#allocation20 + $0x70] sm:$0xff]   ;;  %v3685_v20 = vld [vmem:[#allocation20 + $0x78] sm:$0xff]  }
 0xa23   : > { %3084 = vmatprep.subr.bf16.mxu0 %v3683_v18  ;;  %v1912_v22 = vld [vmem:[#allocation19] sm:$0x3] }
 0xa24   : > { %1856 = vadd.xlane.f32.xlu0 %v1852_v25  ;;  %v1853_v26 = vadd.f32 %v1849_v21, %v5520_v24  ;;  %v3686_v21 = vld [vmem:[#allocation20 + $0x38] sm:$0xff]  }
 0xa25   : > { %3085 = vmatpush3.bf16.msra.mxu0 %v3684_v19 }
 0xa26   : > { %1858 = vadd.xlane.f32.xlu1 %v1853_v26  ;;  %3086 = vmatprep.subr.bf16.mxu0 %v3685_v20 }
 0xa29   : > { %3087 = vmatpush3.bf16.msra.mxu0 %v3686_v21 }
 0xa2a   : > { %3220 = vmatprep.subr.bf16.mxu0 %v4587_v1 }
 0xab1   : > { %v1857_v34 = vpop.xlane.xlu0 %1856 }
 0xab2   : > { %v1861_v35 = vmul.f32 0.0078125, %v1857_v34 }
 0xab3   : > { %v1859_v36 = vpop.xlane.xlu1 %1858 }
 0xab4   : > { %v5623_v37 = vsub.f32 %v1852_v25, %v1861_v35  ;;  %v1862_v38 = vmul.f32 0.0078125, %v1859_v36  ;;  %v1917_v25 = vrot.slane %v1912_v22, %v1006_v31  ;;  %v2977_v31 = vld [vmem:[#allocation22] ss:$0 sm:$0xff] }
 0xab6   : > { %v5625_v55 = vsub.f32 %v1853_v26, %v1862_v38  ;;  %v1865_v23 = vmul.f32 %v5623_v37, %v5623_v37  ;;  %v1921_v26 = vrot.slane %v1912_v22, %v1010_v33  ;;  %v3689_v22 = vld [vmem:[#allocation26 + $0x10] sm:$0xff]  }
 0xab8   : > { %1867 = vadd.xlane.f32.xlu0 %v1865_v23  ;;  %v1866_v24 = vmul.f32 %v5625_v55, %v5625_v55 }
 0xabc   : > { %1869 = vadd.xlane.f32.xlu0 %v1866_v24 }
 0xb45   : > { %v1868_v62 = vpop.xlane.xlu0 %1867 }
 0xb46   : > { %v1871_v63 = vmul.f32 0.0078125, %v1868_v62 }
 0xb48   : > { %v1873_v2 = vadd.f32 1e-05, %v1871_v63 }
 0xb49   : > { %v1870_v3 = vpop.xlane.xlu0 %1869 }
 0xb4a   : > { %3735 = vrsqrt.f32 %v1873_v2  ;;  %v1872_v4 = vmul.f32 0.0078125, %v1870_v3  ;;  %v2996_v3 = vld [vmem:[#allocation23] ss:$0 sm:$0xff] }
 0xb4c   : > { %v1874_v5 = vadd.f32 1e-05, %v1872_v4 }
 0xb4e   : > { %3737 = vrsqrt.f32 %v1874_v5 }
 0xb54   : > { %v3736_v6 = vpop.eup %3735 }
 0xb55   : > { %v1877_v7 = vmul.f32 %v3736_v6, %v5623_v37  ;;  %v2997_v6 = vld [vmem:[#allocation25] ss:$0 sm:$0xff] }
 0xb57   : > { %v1885_v11 = vmul.f32 %v2959_v8, %v1877_v7 }
 0xb58   : > { %v3738_v9 = vpop.eup %3737 }
 0xb59   : > { %v1878_v10 = vmul.f32 %v3738_v9, %v5625_v55  ;;  %v1893_v14 = vadd.f32 %v2960_v12, %v1885_v11 }
 0xb5b   : > { %v1886_v13 = vmul.f32 %v2959_v8, %v1878_v10 }
 0xb5d   : > { %v1894_v15 = vadd.f32 %v2960_v12, %v1886_v13  ;;  %v3687_v12 = vld [vmem:[#allocation26] sm:$0xff]   ;;  %v3688_v13 = vld [vmem:[#allocation26 + $0x8] sm:$0xff]  }
 0xb5f   : > { %v1895_v16 = vpack.c.bf16 %v1894_v15, %v1893_v14 }
 0xb61   : > { %2037 = vmatmul.mubr.bf16.vlgmr.msra.gmra.mrb[28].mxu1 %v1895_v16 }
 0xb62   : > { %3216 = vmatprep.mubr.msk.bf16.mxu1 %vm4588_vm0, %v4587_v1  ;;  %3201 = vmatpush3.bf16.msra.mxu1 %v3687_v12 }
 0xb63   : > { %3202 = vmatprep.subr.bf16.mxu1 %v4587_v1 }
 0xb66   : > { %3203 = vmatpush3.bf16.msra.mxu1 %v3688_v13 }
 0xb67   : > { %3204 = vmatprep.subr.bf16.mxu1 %v4587_v1 }
 0xb6a   : > { %3205 = vmatpush3.bf16.msra.mxu1 %v3689_v22 }
 0xb6b   : > { %3206 = vmatprep.subr.bf16.mxu1 %v4587_v1 }
 0xc34   : > { %v2038_v27 = vpop.f32.mrb[28].mxu1 }
 0xc35   : > { %v2039_v28 = vadd.f32 %v2038_v27, %v1917_v25  ;;  %v2040_v29 = vpop.f32.mrb[29].mxu1  ;;  %v3692_v27 = vld [vmem:[#allocation26 + $0x28] sm:$0xff]  }
 0xc36   : > { %v2041_v32 = vadd.f32 %v2040_v29, %v1921_v26  ;;  %v2042_v34 = vpop.f32.mrb[30].mxu1  ;;  %v3694_v29 = vld [vmem:[#allocation26 + $0x38] sm:$0xff]  }
 0xc37   : > { %v2043_v35 = vadd.f32 %v2042_v34, %v1917_v25  ;;  %v2044_v36 = vpop.f32.mrb[31].mxu1  ;;  %v2047_v38 = vmax.f32 %v2039_v28, 0.0  ;;  %v3690_v25 = vld [vmem:[#allocation26 + $0x18] sm:$0xff]   ;;  %v3693_v28 = vld [vmem:[#allocation26 + $0x30] sm:$0xff]  }
 0xc38   : > { %v2045_v37 = vadd.f32 %v2044_v36, %v1921_v26  ;;  %v2048_v23 = vmax.f32 %v2041_v32, 0.0  ;;  %3207 = vmatpush3.bf16.msra.mxu1 %v3690_v25  ;;  %v3691_v26 = vld [vmem:[#allocation26 + $0x20] sm:$0xff]   ;;  %v3696_v34 = vld [vmem:[#allocation29 + $0x8] sm:$0xff]  }
 0xc39   : > { %v2049_v55 = vmax.f32 %v2043_v35, 0.0  ;;  %3208 = vmatprep.subr.bf16.mxu1 %v4587_v1  ;;  %v3695_v32 = vld [vmem:[#allocation29] sm:$0xff]   ;;  %v3697_v35 = vld [vmem:[#allocation29 + $0x10] sm:$0xff]   ;;  %v3698_v36 = vld [vmem:[#allocation29 + $0x18] sm:$0xff]  }
 0xc3a   : > { %v2050_v24 = vmax.f32 %v2045_v37, 0.0  ;;  %v3699_v37 = vld [vmem:[#allocation29 + $0x20] sm:$0xff]  }
 0xc3b   : > { %v2051_v39 = vpack.c.bf16 %v2049_v55, %v2047_v38  ;;  %v3700_v38 = vld [vmem:[#allocation29 + $0x28] sm:$0xff]  }
 0xc3c   : > { %v2052_v40 = vpack.c.bf16 %v2050_v24, %v2048_v23  ;;  %3209 = vmatpush3.bf16.msra.mxu1 %v3691_v26 }
 0xc3d   : > { %3210 = vmatprep.subr.bf16.mxu1 %v4587_v1 }
 0xc3e   : > { %2220 = vmatprep.mubr.bf16.mxu0 %v2052_v40 }
 0xc3f   : > { %2221 = vmatmul.mubr.bf16.vlgmr.msra.gmra.mrb[16].mxu0 %v2051_v39 }
 0xc40   : > { %3236 = vmatprep.mubr.msk.bf16.mxu0 %vm4588_vm0, %v4587_v1  ;;  %3211 = vmatpush3.bf16.msra.mxu1 %v3692_v27 }
 0xc41   : > { %3212 = vmatprep.subr.bf16.mxu1 %v4587_v1  ;;  %3221 = vmatpush3.bf16.msra.mxu0 %v3695_v32 }
 0xc42   : > { %3222 = vmatprep.subr.bf16.mxu0 %v4587_v1 }
 0xc44   : > { %3213 = vmatpush3.bf16.msra.mxu1 %v3693_v28 }
 0xc45   : > { %3214 = vmatprep.subr.bf16.mxu1 %v4587_v1  ;;  %3223 = vmatpush3.bf16.msra.mxu0 %v3696_v34 }
 0xc46   : > { %3224 = vmatprep.subr.bf16.mxu0 %v4587_v1 }
 0xc48   : > { %3215 = vmatpush3.bf16.msra.mxu1 %v3694_v29 }
 0xc49   : > { %3225 = vmatpush3.bf16.msra.mxu0 %v3697_v35 }
 0xc4a   : > { %3226 = vmatprep.subr.bf16.mxu0 %v4587_v1 }
 0xc4d   : > { %3227 = vmatpush3.bf16.msra.mxu0 %v3698_v36 }
 0xc4e   : > { %3228 = vmatprep.subr.bf16.mxu0 %v4587_v1 }
 0xc51   : > { %3229 = vmatpush3.bf16.msra.mxu0 %v3699_v37 }
 0xc52   : > { %3230 = vmatprep.subr.bf16.mxu0 %v4587_v1 }
 0xc55   : > { %3231 = vmatpush3.bf16.msra.mxu0 %v3700_v38 }
 0xc56   : > { %3232 = vmatprep.subr.bf16.mxu0 %v4587_v1 }
 0xd12   : > { %v3088_v30 = vpop.f32.mrb[16].mxu0 }
 0xd13   : > { %v3089_v33 = vpop.f32.mrb[17].mxu0 }
 0xd14   : > { %v3090_v41 = vadd.f32 %v3089_v33, %v3088_v30  ;;  %v3091_v42 = vpop.f32.mrb[18].mxu0  ;;  %v2998_v33 = vld [vmem:[#allocation32] ss:$0 sm:$0xff] }
 0xd15   : > { %v3092_v43 = vpop.f32.mrb[19].mxu0 }
 0xd16   : > { %v2223_v44 = vadd.f32 %v3090_v41, %v2977_v31  ;;  %v3093_v45 = vadd.f32 %v3092_v43, %v3091_v42 }
 0xd18   : > { %v2226_v46 = vadd.f32 %v3093_v45, %v2977_v31  ;;  %v2239_v47 = vadd.f32 %v2223_v44, %v1893_v14  ;;  %v2999_v45 = vld [vmem:[#allocation34] ss:$0 sm:$0xff] }
 0xd1a   : > { %v3036_v48 = vpack.c.bf16 %v2226_v46, %v2223_v44  ;;  %2243 = vadd.xlane.f32.xlu0 %v2239_v47  ;;  %v2240_v49 = vadd.f32 %v2226_v46, %v1894_v15 }
 0xd1c   : > { %3037 = vst [vmem:[%s5644_s11] sm:$0xff] %v3036_v48   ;;  %2245 = vadd.xlane.f32.xlu1 %v2240_v49 }
 0xda7   : > { %v2244_v50 = vpop.xlane.xlu0 %2243 }
 0xda8   : > { %v2247_v51 = vmul.f32 0.0078125, %v2244_v50  ;;  %v3701_v50 = vld [vmem:[#allocation29 + $0x30] sm:$0xff]  }
 0xda9   : > { %v2246_v52 = vpop.xlane.xlu1 %2245  ;;  %3233 = vmatpush3.bf16.msra.mxu0 %v3701_v50 }
 0xdaa   : > { %v2249_v53 = vsub.f32 %v2239_v47, %v2247_v51  ;;  %v2248_v54 = vmul.f32 0.0078125, %v2246_v52  ;;  %3234 = vmatprep.subr.bf16.mxu0 %v4587_v1  ;;  %v3702_v51 = vld [vmem:[#allocation29 + $0x38] sm:$0xff]  }
 0xdab   : > { %v3000_v52 = vld [vmem:[#allocation28] ss:$0 sm:$0xff] }
 0xdac   : > { %v2250_v56 = vsub.f32 %v2240_v49, %v2248_v54  ;;  %v2251_v57 = vmul.f32 %v2249_v53, %v2249_v53 }
 0xdad   : > { %3235 = vmatpush3.bf16.msra.mxu0 %v3702_v51 }
 0xdae   : > { %2253 = vadd.xlane.f32.xlu0 %v2251_v57  ;;  %v2252_v58 = vmul.f32 %v2250_v56, %v2250_v56 }
 0xdb0   : > { %2255 = vadd.xlane.f32.xlu1 %v2252_v58 }
 0xe3b   : > { %v2254_v0 = vpop.xlane.xlu0 %2253 }
 0xe3c   : > { %v2257_v59 = vmul.f32 0.0078125, %v2254_v0 }
 0xe3d   : > { %v2256_v60 = vpop.xlane.xlu1 %2255 }
 0xe3e   : > { %v2259_v61 = vadd.f32 1e-05, %v2257_v59  ;;  %v2258_v62 = vmul.f32 0.0078125, %v2256_v60 }
 0xe40   : > { %3739 = vrsqrt.f32 %v2259_v61  ;;  %v2260_v63 = vadd.f32 1e-05, %v2258_v62 }
 0xe42   : > { %3741 = vrsqrt.f32 %v2260_v63 }
 0xe4a   : > { %v3740_v2 = vpop.eup %3739 }
 0xe4b   : > { %v2263_v4 = vmul.f32 %v3740_v2, %v2249_v53 }
 0xe4c   : > { %v3742_v5 = vpop.eup %3741 }
 0xe4d   : > { %v2271_v7 = vmul.f32 %v2996_v3, %v2263_v4  ;;  %v2264_v8 = vmul.f32 %v3742_v5, %v2250_v56 }
 0xe4f   : > { %v5647_v9 = vadd.f32 %v2997_v6, %v2271_v7  ;;  %v2272_v10 = vmul.f32 %v2996_v3, %v2264_v8 }
 0xe51   : > { %2283 = vadd.xlane.f32.xlu0 %v5647_v9  ;;  %v5650_v11 = vadd.f32 %v2997_v6, %v2272_v10 }
 0xe53   : > { %2285 = vadd.xlane.f32.xlu1 %v5650_v11 }
 0xede   : > { %v2284_v14 = vpop.xlane.xlu0 %2283 }
 0xedf   : > { %v2287_v15 = vmul.f32 0.0078125, %v2284_v14 }
 0xee0   : > { %v2286_v16 = vpop.xlane.xlu1 %2285 }
 0xee1   : > { %v2289_v17 = vsub.f32 %v5647_v9, %v2287_v15  ;;  %v2288_v18 = vmul.f32 0.0078125, %v2286_v16 }
 0xee3   : > { %v2290_v19 = vsub.f32 %v5650_v11, %v2288_v18  ;;  %v2291_v20 = vmul.f32 %v2289_v17, %v2289_v17 }
 0xee5   : > { %2293 = vadd.xlane.f32.xlu0 %v2291_v20  ;;  %v2292_v21 = vmul.f32 %v2290_v19, %v2290_v19 }
 0xee7   : > { %2295 = vadd.xlane.f32.xlu1 %v2292_v21 }
 0xf72   : > { %v2294_v55 = vpop.xlane.xlu0 %2293 }
 0xf73   : > { %v2297_v23 = vmul.f32 0.0078125, %v2294_v55 }
 0xf74   : > { %v2296_v24 = vpop.xlane.xlu1 %2295 }
 0xf75   : > { %v2299_v39 = vadd.f32 1e-05, %v2297_v23  ;;  %v2298_v40 = vmul.f32 0.0078125, %v2296_v24 }
 0xf77   : > { %3743 = vrsqrt.f32 %v2299_v39  ;;  %v2300_v30 = vadd.f32 1e-05, %v2298_v40 }
 0xf79   : > { %3745 = vrsqrt.f32 %v2300_v30 }
 0xf81   : > { %v3744_v31 = vpop.eup %3743 }
 0xf82   : > { %v2303_v41 = vmul.f32 %v3744_v31, %v2289_v17 }
 0xf83   : > { %v3746_v42 = vpop.eup %3745 }
 0xf84   : > { %v2304_v43 = vmul.f32 %v3746_v42, %v2290_v19  ;;  %v2311_v44 = vmul.f32 %v2998_v33, %v2303_v41 }
 0xf86   : > { %v2312_v46 = vmul.f32 %v2998_v33, %v2304_v43  ;;  %v2319_v47 = vadd.f32 %v2999_v45, %v2311_v44 }
 0xf88   : > { %v2320_v48 = vadd.f32 %v2999_v45, %v2312_v46 }
 0xf8a   : > { %v2321_v49 = vpack.c.bf16 %v2320_v48, %v2319_v47 }
 0xf8c   : > { %3217 = vmatmul.mubr.bf16.vlgmr.msra.gmra.mrb[32].mxu1 %v2321_v49 }
0x105f   : > { %v2427_v53 = vpop.f32.mrb[32].mxu1 }
0x1060   : > { %v2428_v54 = vadd.f32 %v3000_v52, %v2427_v53  ;;  %v3218_v56 = vpop.f32.mrb[33].mxu1 }
0x1061   : > { %v2430_v57 = vpop.f32.mrb[34].mxu1 }
0x1062   : > { %v2431_v58 = vadd.f32 %v3000_v52, %v2430_v57  ;;  %v3219_v0 = vpop.f32.mrb[35].mxu1  ;;  %v2434_v59 = vmax.f32 %v2428_v54, 0.0 }
0x1064   : > { %v2435_v60 = vmax.f32 %v2431_v58, 0.0 }
0x1066   : > { %v2436_v61 = vpack.c.bf16 %v2435_v60, %v2434_v59 }
0x1068   : > { %3237 = vmatmul.mubr.bf16.vlgmr.msra.gmra.mrb[20].mxu0 %v2436_v61 }
0x1069   : > { %4306 = shalt.err (!%p4303_p5)
}
0x106a   : > { %s4307_s14 = scalar_lea.hbm %s5674_s3, 128  ;;  %s4311_s11 = scalar_lea.hbm %s6039_s7, 256 }
0x106b   : > { %p4308_p10 = scmp.ne.s32.totalorder %s5674_s3, %s4307_s14  ;;  %p4312_p8 = scmp.lt.u32.totalorder %s5674_s3, %s6039_s7 }
0x106c   : > { %p4313_p2 = scmp.lt.u32.totalorder %s4311_s11, %s4307_s14  ;;  %p4315_p13 = scmp.lt.u32.totalorder %s4307_s14, %s5674_s3 }
0x106d   : > { %p4309_p6 = pnand %p4308_p10, %p6040_p12 }
0x106e   : > { %p4314_p11 = por %p4313_p2, %p4312_p8 }
0x106f   : > { %p4310_p4 = pneg %p4309_p6 }
0x1070   : > { %p4316_p3 = por %p4315_p13, %p4314_p11 }
0x1072   : > { %p4317_p0 = pnand %p4316_p3, %p4310_p4 }
0x1074   : > { %4320 = shalt.err (!%p4317_p0)
}
0x1075   : > { %s4593_s0 = smov 4   ;;  %v3009_v1 = vld [vmem:[#allocation31] ss:$0 sm:$0xff]  ;;  %s952_s27 = scalar_lea.vmem [#allocation35], %s2903_s30 }
0x1076   : > { %3303 = dma.vmem_to_hbm [thread:$0]  (%p6040_p12), %s5676_s13, 128, %s5674_s3, %s2559_s28, %s4591_s9, %s4591_s9, %s4593_s0  }
0x1077   : > { %s2572_s29 = sshll.u32 %s952_s27, 4  ;;  %s3031_s2 = sshll.u32 %s4791_s21, 8  ;;  %s5708_s29 = int_to_ptr.vmem [resolvable:$true] %s2572_s29 }
0x1078   : > { %s6041_s3 = sld [smem:[#allocation86_spill]]  ;;  %s2554_s21 = scalar_lea.sflag [#allocation7], %s5451_s8 }
0x1079   : > { %s4321_s30 = scalar_lea.vmem %s5708_s29, 256  ;;  %s4594_s6 = smov [#allocation35]  }
0x107a   : > { %p4322_p7 = scmp.ne.s32.totalorder %s5708_s29, %s4321_s30  ;;  %s4325_s14 = sshll.u32 %s4594_s6, 4  ;;  %s4326_s14 = int_to_ptr.vmem [resolvable:$false] %s4325_s14 }
0x107b   : > { %s4327_s25 = scalar_lea.vmem %s4326_s14, 512  ;;  %p4328_p5 = scmp.lt.s32.totalorder %s5708_s29, %s4326_s14 }
0x107c   : > { %p4323_p9 = pnand %p4322_p7, %p6040_p12  ;;  %p4329_p10 = scmp.lt.s32.totalorder %s4327_s25, %s4321_s30 }
0x107e   : > { %s6042_s12 = smov %s6041_s3  ;;  %s5713_s28 = scalar_lea.hbm %s6041_s3, %s3031_s2 }
0x107f   : > { %p4324_p1 = pneg %p4323_p9  ;;  %p4330_p6 = por %p4329_p10, %p4328_p5 }
0x1081   : > { %p4331_p4 = pnand %p4330_p6, %p4324_p1 }
0x113b   : > { %v2542_v62 = vpop.f32.mrb[20].mxu0 }
0x113c   : > { %v2543_v63 = vadd.f32 %v3009_v1, %v2542_v62  ;;  %v3238_v2 = vpop.f32.mrb[21].mxu0 }
0x113d   : > { %v2545_v3 = vpop.f32.mrb[22].mxu0 }
0x113e   : > { %v2549_v4 = vadd.f32 %v2543_v63, %v5647_v9  ;;  %v2546_v5 = vadd.f32 %v3009_v1, %v2545_v3  ;;  %v3239_v6 = vpop.f32.mrb[23].mxu0 }
0x1140   : > { %2551 = vst [vmem:[%s952_s27] sm:$0xff] %v2549_v4  ;;  %v2550_v7 = vadd.f32 %v2546_v5, %v5650_v11 }
0x1142   : > { %2552 = vst [vmem:[%s952_s27 + $0x8] sm:$0xff] %v2550_v7 }
0x1143   : > { %4334 = shalt.err (!%p4331_p4)
}
0x1144   : > { %s4335_s26 = scalar_lea.hbm %s5713_s28, 256  ;;  %s4339_s22 = scalar_lea.hbm %s6042_s12, 512 }
0x1145   : > { %p4336_p8 = scmp.ne.s32.totalorder %s5713_s28, %s4335_s26  ;;  %p4340_p13 = scmp.lt.u32.totalorder %s5713_s28, %s6042_s12 }
0x1146   : > { %p4341_p3 = scmp.lt.u32.totalorder %s4339_s22, %s4335_s26  ;;  %p4343_p7 = scmp.lt.u32.totalorder %s4335_s26, %s5713_s28 }
0x1147   : > { %p4337_p2 = pnand %p4336_p8, %p6040_p12 }
0x1148   : > { %p4342_p0 = por %p4341_p3, %p4340_p13 }
0x1149   : > { %p4338_p11 = pneg %p4337_p2 }
0x114a   : > { %p4344_p9 = por %p4343_p7, %p4342_p0 }
0x114c   : > { %p4345_p1 = pnand %p4344_p9, %p4338_p11 }
0x114e   : > { %4348 = shalt.err (!%p4345_p1)
}
0x114f   : > { %s4595_s2 = smov 128   ;;  %s4596_s9 = smov 8  }
0x1150   : > { %3302 = dma.vmem_to_hbm [thread:$0]  (%p6040_p12), %s5708_s29, 256, %s5713_s28, %s2554_s21, %s4595_s2, %s4595_s2, %s4596_s9  }
0x1151 PF: > { %s6043_s13 = sld [smem:[#allocation61_spill]]  ;;  %s6044_s3 = sld [smem:[#allocation64_spill]] }
0x1152   : > { %p6045_p5 = scmp.ne.s32.totalorder %s6012_s4, 0 }
0x1157   : > { %s2603_s30 = sand.u32 1, %s6043_s13   ;;  %p6046_p10 = scmp.ge.s32.totalorder %s6044_s3, 2 }
0x1158   : > { %s2604_s6 = scalar_lea.sflag [#allocation7], %s2603_s30 }
0x1159   : > { %p3366_p6 = pnand %p6046_p10, %p6045_p5 }
0x115b   : > { %4490 = dma.done.wait (!%p3366_p6), %s2604_s6, 256  }
0x115c   : > { %4492 = vsyncadd (!%p3366_p6), %s2604_s6, 4294967040  ;;  %s2613_s14 = scalar_lea.sflag [#allocation37], %s2603_s30 }
0x115d   : > { %4494 = dma.done.wait (!%p3366_p6), %s2613_s14, 128  }
0x115e   : > { %4496 = vsyncadd (!%p3366_p6), %s2613_s14, 4294967168  ;;  %s6047_s27 = sld [smem:[#allocation54_spill]]  ;;  %s6048_s28 = sld [smem:[#allocation56_spill]] }
0x115f   : > { %s6049_s0 = sld [smem:[#allocation58_spill]]  ;;  %s6050_s22 = sld [smem:[#allocation60_spill]] }
0x1160   : > { %s6051_s2 = sld [smem:[#allocation62_spill]]  ;;  %s6052_s25 = sld [smem:[#allocation63_spill]] }
0x1161   : > { %s6053_s8 = smov %s5387_s23  ;;  %p48_p12 = scmp.ge.s32.totalorder %s5375_s20, 4  }
0x1162   : > { %s5749_s3 = smov 0   ;;  %s5754_s29 = smov 0  }
0x1163   : > { %s5759_s4 = smov 0   ;;  %s6055_s30 = smov %s4527_s5 }
0x1164   : > { %s5764_s5 = smov 0   ;;  %s5769_s23 = smov 0  }
0x1165   : > { %s6056_s1 = smov %s4543_s24  ;;  %s5774_s24 = smov 0  }
0x1166   : > { %s6057_s26 = smov %s6053_s8  ;;  %50 = sbr.rel (!%p48_p12) target bundleno = 46 (0x2e), region = 236 }
0x116d   :  { %2618 = vsyncpa [#allocation6], 1 }
0x116e   :  { %2620 = vsyncpa [#allocation6 + $0x1], 1 }
0x116f   :  { %2621 = vsyncpa [#allocation9], 1 }
0x1170   :  { %2622 = vsyncpa [#allocation12], 1 }
0x1171   :  { %2623 = vsyncpa [#allocation15], 1 }
0x1172   :  { %2624 = vsyncpa [#allocation18], 1 }
0x1173   :  { %2625 = vsyncpa [#allocation21], 1 }
0x1174   :  { %2626 = vsyncpa [#allocation24], 1 }
0x1175   :  { %2627 = vsyncpa [#allocation27], 1 }
0x1176   :  { %2628 = vsyncpa [#allocation30], 1 }
0x1177   :  { %2629 = vsyncpa [#allocation33], 1 }
0x1178   :  { %2630 = vsyncpa [#allocation7], 1 }
0x1179   :  { %2632 = vsyncpa [#allocation7 + $0x1], 1 }
0x117a   :  { %2633 = vsyncpa [#allocation37], 1 }
0x117b   :  { %2635 = vsyncpa [#allocation37 + $0x1], 1 }

</bundles_post_ra>
